<compile_context>
chip_gen: v6e
topology: v6e:2x2x1
jax: 0.10.0
libtpu: 0.0.40
codegen_flags: <defaults>
</compile_context>

<pallas_src>
import jax
import jax.numpy as jnp
from jax.experimental import pallas as pl
from jax.experimental.pallas import tpu as pltpu

NUM_CLASSES = 10
NEG_SLOPE = 0.01                     # F.leaky_relu default negative_slope
ROW_TILE = 1024                      # patch rows per grid step (multiple of 16)
BATCH_TILE = 512                     # fc-head rows per grid step
VMEM_LIMIT = 48 * 1024 * 1024        # explicit budget, fits v7x 64 MiB/TC


def _round_up(x, m):
    return (x + m - 1) // m * m


def _leaky_relu(x):
    return jnp.where(x > 0, x, NEG_SLOPE * x)


# ---------------------------------------------------------------------------
# Pallas kernels
# ---------------------------------------------------------------------------
def conv_pool_kernel(p_ref, w_ref, b_ref, o_ref):
    """Fused conv (im2col matmul) + 2x2 max-pool + bias + LeakyReLU.

    p_ref: (4, nt, K) bf16  im2col patch rows, one slab per pool position
    w_ref: (K, Cout)  bf16  conv weight (HWIO flattened), VMEM-resident
    b_ref: (1, Cout)  f32   VMEM-resident
    o_ref: (nt, Cout) bf16  pooled activations
    """
    _, nt, k = p_ref.shape
    # One contiguous MXU stream over all four pool positions (M = 4*nt).
    # Slabs are sublane-aligned (nt % 16 == 0), so the reshape is layout-free.
    z = jnp.dot(p_ref[...].reshape(4 * nt, k), w_ref[...],
                preferred_element_type=jnp.float32)            # (4*nt, Cout) f32
    # Max over the 2x2 pool window FIRST, then bias + LeakyReLU once
    # (both monotone -> identical result, ~4x less VPU work).
    m = jnp.maximum(jnp.maximum(z[:nt], z[nt:2 * nt]),
                    jnp.maximum(z[2 * nt:3 * nt], z[3 * nt:]))
    o_ref[...] = _leaky_relu(m + b_ref[...]).astype(o_ref.dtype)


def fc_head_kernel(x_ref, w1_ref, b1_ref, w2_ref, b2_ref, feat_ref, y_ref):
    """feat = leaky_relu(x @ W1 + b1);  y = feat @ W2 + b2 (fused head)."""
    h = jnp.dot(x_ref[...], w1_ref[...],
                preferred_element_type=jnp.float32) + b1_ref[...]
    h = _leaky_relu(h)
    feat_ref[...] = h
    # Logits are only 10 lanes (masked store) -- accepted, volume is tiny.
    y_ref[...] = jnp.dot(h.astype(w2_ref.dtype), w2_ref[...],
                         preferred_element_type=jnp.float32) + b2_ref[...]


# ---------------------------------------------------------------------------
# Wrapper-side layout plumbing: im2col grouped by pool position (bf16)
# ---------------------------------------------------------------------------
def _pooled_patches(x, ksize, pad):
    """x: (B, H, W, C) NHWC.

    Returns (patches, (Ho//2, Wo//2)) with patches of shape
    (4, B * Ho//2 * Wo//2, ksize*ksize*C); leading axis enumerates the four
    conv-output positions inside each 2x2 max-pool window.  Patch feature
    order is (dy, dx, cin), matching HWIO weights reshaped to (k*k*Cin, Cout).
    """
    b, h, w, c = x.shape
    if pad:
        x = jnp.pad(x, ((0, 0), (pad, pad), (pad, pad), (0, 0)))
    hp, wp = h + 2 * pad, w + 2 * pad
    ho, wo = hp - ksize + 1, wp - ksize + 1

    cols = []
    for dy in range(ksize):
        rows = [x[:, dy:dy + ho, dx:dx + wo, :] for dx in range(ksize)]
        cols.append(jnp.stack(rows, axis=3))           # (B, Ho, Wo, k, C)
    patches = jnp.stack(cols, axis=3)                  # (B, Ho, Wo, k, k, C)

    kdim = ksize * ksize * c
    patches = patches.reshape(b, ho, wo, kdim)
    patches = patches.reshape(b, ho // 2, 2, wo // 2, 2, kdim)
    patches = patches.transpose(2, 4, 0, 1, 3, 5)      # (2, 2, B, Ho/2, Wo/2, K)
    patches = patches.reshape(4, b * (ho // 2) * (wo // 2), kdim)
    return patches, (ho // 2, wo // 2)


def _conv_pool_call(patches, w2d, bias_2d):
    """patches: (4, N, K) bf16; w2d: (K, Cout) bf16; bias_2d: (1, Cout) f32."""
    _, n, k = patches.shape
    cout = w2d.shape[-1]
    nt = ROW_TILE if n >= ROW_TILE else _round_up(n, 16)
    n_pad = _round_up(n, nt)
    if n_pad != n:                                     # zero rows -> sliced off
        patches = jnp.pad(patches, ((0, 0), (0, n_pad - n), (0, 0)))

    out = pl.pallas_call(
        conv_pool_kernel,
        out_shape=jax.ShapeDtypeStruct((n_pad, cout), jnp.bfloat16),
        grid_spec=pltpu.PrefetchScalarGridSpec(
            num_scalar_prefetch=0,
            grid=(n_pad // nt,),
            in_specs=[
                pl.BlockSpec((4, nt, k), lambda i: (0, i, 0)),   # pipelined
                pl.BlockSpec((k, cout), lambda i: (0, 0)),       # resident
                pl.BlockSpec((1, cout), lambda i: (0, 0)),       # resident
            ],
            out_specs=pl.BlockSpec((nt, cout), lambda i: (i, 0)),
        ),
        compiler_params=pltpu.CompilerParams(
            dimension_semantics=("parallel",),         # megacore-shardable
            vmem_limit_bytes=VMEM_LIMIT),
    )(patches, w2d, bias_2d)
    return out[:n] if n_pad != n else out


def _fc_head_call(flat, w1, b1, w2, b2):
    """flat: (B, 576) bf16; returns (feat (B,128) f32, logits (B,10) f32)."""
    b, d = flat.shape
    d1 = w1.shape[1]
    d2 = w2.shape[1]
    bt = BATCH_TILE if b >= BATCH_TILE else _round_up(b, 16)
    b_pad = _round_up(b, bt)
    if b_pad != b:
        flat = jnp.pad(flat, ((0, b_pad - b), (0, 0)))

    feat, logits = pl.pallas_call(
        fc_head_kernel,
        out_shape=(jax.ShapeDtypeStruct((b_pad, d1), jnp.float32),
                   jax.ShapeDtypeStruct((b_pad, d2), jnp.float32)),
        grid_spec=pltpu.PrefetchScalarGridSpec(
            num_scalar_prefetch=0,
            grid=(b_pad // bt,),
            in_specs=[
                pl.BlockSpec((bt, d), lambda i: (i, 0)),
                pl.BlockSpec((d, d1), lambda i: (0, 0)),    # resident
                pl.BlockSpec((1, d1), lambda i: (0, 0)),    # resident
                pl.BlockSpec((d1, d2), lambda i: (0, 0)),   # resident
                pl.BlockSpec((1, d2), lambda i: (0, 0)),    # resident
            ],
            out_specs=(pl.BlockSpec((bt, d1), lambda i: (i, 0)),
                       pl.BlockSpec((bt, d2), lambda i: (i, 0))),
        ),
        compiler_params=pltpu.CompilerParams(
            dimension_semantics=("parallel",),
            vmem_limit_bytes=VMEM_LIMIT),
    )(flat, w1, b1, w2, b2)
    return feat[:b], logits[:b]


# ---------------------------------------------------------------------------
# Full forward
# ---------------------------------------------------------------------------
@jax.jit
def cifar_cnn_forward(x_nchw, kp):
    """x_nchw: (B, 3, 32, 32) float32 -> (features (B,128), logits (B,10))."""
    b = x_nchw.shape[0]
    x = jnp.transpose(x_nchw, (0, 2, 3, 1)).astype(jnp.bfloat16)   # NHWC bf16

    # conv1 (3->16, k5, pad 0) + LeakyReLU + 2x2 max-pool
    p, (h1, w1s) = _pooled_patches(x, 5, 0)
    x = _conv_pool_call(p, kp["conv1.w"], kp["conv1.b"]).reshape(b, h1, w1s, 16)

    # conv2 (16->32, k5, pad 1) + LeakyReLU + 2x2 max-pool
    p, (h2, w2s) = _pooled_patches(x, 5, 1)
    x = _conv_pool_call(p, kp["conv2.w"], kp["conv2.b"]).reshape(b, h2, w2s, 32)

    # conv3 (32->64, k3, pad 1) + LeakyReLU + 2x2 max-pool
    p, (h3, w3s) = _pooled_patches(x, 3, 1)
    x = _conv_pool_call(p, kp["conv3.w"], kp["conv3.b"]).reshape(b, h3, w3s, 64)

    # fc1.w was pre-permuted to HWC row order, so PyTorch's CHW flatten is a
    # plain contiguous reshape here (no NHWC->NCHW relayout pass).
    flat = x.reshape(b, h3 * w3s * 64)
    return _fc_head_call(flat, kp["fc1.w"], kp["fc1.b"], kp["fc2.w"], kp["fc2.b"])


# ---------------------------------------------------------------------------
# Params (PyTorch-style uniform(+-1/sqrt(fan_in)) init), conv weights in HWIO
# ---------------------------------------------------------------------------
def init_params(key):
    ks = jax.random.split(key, 10)

    def u(k, shape, fan_in):
        bound = 1.0 / (fan_in ** 0.5)
        return jax.random.uniform(k, shape, jnp.float32, -bound, bound)

    return {
        "conv1.w": u(ks[0], (5, 5, 3, 16), 3 * 25),
        "conv1.b": u(ks[1], (16,), 3 * 25),
        "conv2.w": u(ks[2], (5, 5, 16, 32), 16 * 25),
        "conv2.b": u(ks[3], (32,), 16 * 25),
        "conv3.w": u(ks[4], (3, 3, 32, 64), 32 * 9),
        "conv3.b": u(ks[5], (64,), 32 * 9),
        "fc1.w": u(ks[6], (576, 128), 576),     # rows in PyTorch CHW order
        "fc1.b": u(ks[7], (128,), 576),
        "fc2.w": u(ks[8], (128, NUM_CLASSES), 128),
        "fc2.b": u(ks[9], (NUM_CLASSES,), 128),
    }


def prepare_params(params):
    """One-time host-side conversion into kernel-ready layout (bf16 weights,
    2-D biases, fc1.w rows permuted CHW -> HWC)."""
    def conv_w(w):                       # (kh, kw, Cin, Cout) -> (K, Cout) bf16
        return w.reshape(-1, w.shape[-1]).astype(jnp.bfloat16)

    # HWC row index r' = h*192 + w*64 + c  ->  CHW row index c*9 + h*3 + w
    r = jnp.arange(3 * 3 * 64)
    hh, rem = r // (3 * 64), r % (3 * 64)
    ww, cc = rem // 64, rem % 64
    perm = cc * 9 + hh * 3 + ww
    w1_hwc = params["fc1.w"][perm, :]

    return {
        "conv1.w": conv_w(params["conv1.w"]),
        "conv1.b": params["conv1.b"].reshape(1, -1).astype(jnp.float32),
        "conv2.w": conv_w(params["conv2.w"]),
        "conv2.b": params["conv2.b"].reshape(1, -1).astype(jnp.float32),
        "conv3.w": conv_w(params["conv3.w"]),
        "conv3.b": params["conv3.b"].reshape(1, -1).astype(jnp.float32),
        "fc1.w": w1_hwc.astype(jnp.bfloat16),
        "fc1.b": params["fc1.b"].reshape(1, -1).astype(jnp.float32),
        "fc2.w": params["fc2.w"].astype(jnp.bfloat16),
        "fc2.b": params["fc2.b"].reshape(1, -1).astype(jnp.float32),
    }


# ---------------------------------------------------------------------------
# Pure-JAX reference (mirrors the PyTorch module exactly, f32)
# ---------------------------------------------------------------------------
def reference_forward(x_nchw, params):
    x = jnp.transpose(x_nchw, (0, 2, 3, 1)).astype(jnp.float32)

    def conv(x, w, b_, pad):
        y = jax.lax.conv_general_dilated(
            x, w, window_strides=(1, 1),
            padding=[(pad, pad), (pad, pad)],
            dimension_numbers=("NHWC", "HWIO", "NHWC"))
        return y + b_[None, None, None, :]

    def pool(x):
        return jax.lax.reduce_window(
            x, -jnp.inf, jax.lax.max,
            window_dimensions=(1, 2, 2, 1), window_strides=(1, 2, 2, 1),
            padding="VALID")

    x = pool(_leaky_relu(conv(x, params["conv1.w"], params["conv1.b"], 0)))
    x = pool(_leaky_relu(conv(x, params["conv2.w"], params["conv2.b"], 1)))
    x = pool(_leaky_relu(conv(x, params["conv3.w"], params["conv3.b"], 1)))
    b = x.shape[0]
    flat = jnp.transpose(x, (0, 3, 1, 2)).reshape(b, -1)     # PyTorch CHW flatten
    feat = _leaky_relu(flat @ params["fc1.w"] + params["fc1.b"])
    y = feat @ params["fc2.w"] + params["fc2.b"]
    return feat, y


if __name__ == "__main__":
    key = jax.random.PRNGKey(0)
    k_params, k_x = jax.random.split(key)
    params = init_params(k_params)
    kparams = prepare_params(params)

    # CIFAR-shaped input (fc1 expects 64*3*3, which implies 32x32 spatial)
    x = jax.random.normal(k_x, (2, 3, 32, 32), jnp.float32)

    feat, logits = cifar_cnn_forward(x, kparams)
    feat = jax.block_until_ready(feat)
    logits = jax.block_until_ready(logits)

    ref_feat, ref_logits = reference_forward(x, params)
    assert feat.shape == (2, 128) and logits.shape == (2, NUM_CLASSES)
    assert jnp.allclose(feat, ref_feat, rtol=2e-2, atol=2e-2), "features mismatch"
    assert jnp.allclose(logits, ref_logits, rtol=2e-2, atol=2e-2), "logits mismatch"

    print("KERNEL_OK")
</pallas_src>

<mosaic_0001>
module attributes {stable_mosaic.version = 11 : i64} {
  func.func @conv_pool_kernel(%arg0: i32, %arg1: memref<4x400x75xbf16, #tpu.memory_space<vmem>>, %arg2: memref<75x16xbf16, #tpu.memory_space<vmem>>, %arg3: memref<1x16xf32, #tpu.memory_space<vmem>>, %arg4: memref<400x16xbf16, #tpu.memory_space<vmem>>) attributes {dimension_semantics = [#tpu.dimension_semantics<parallel>], iteration_bounds = array<i64: 1>, scalar_prefetch = 0 : i64, scratch_operands = 0 : i64, tpu.core_type = #tpu.core_type<tc>, window_params = [{transform_indices = @transform_0, window_bounds = array<i64: 4, 400, 75>}, {pipeline_mode = #tpu.pipeline_mode<synchronous>, transform_indices = @transform_1, window_bounds = array<i64: 75, 16>}, {pipeline_mode = #tpu.pipeline_mode<synchronous>, transform_indices = @transform_2, window_bounds = array<i64: 1, 16>}, {transform_indices = @transform_3, window_bounds = array<i64: 400, 16>}]} {
    %c0 = arith.constant 0 : index
    %c0_0 = arith.constant 0 : index
    %c0_1 = arith.constant 0 : index
    %0 = vector.load %arg1[%c0, %c0_0, %c0_1] : memref<4x400x75xbf16, #tpu.memory_space<vmem>>, vector<4x400x75xbf16>
    %1 = vector.shape_cast %0 : vector<4x400x75xbf16> to vector<1600x75xbf16>
    %c0_2 = arith.constant 0 : index
    %c0_3 = arith.constant 0 : index
    %2 = vector.load %arg2[%c0_2, %c0_3] : memref<75x16xbf16, #tpu.memory_space<vmem>>, vector<75x16xbf16>
    %cst = arith.constant dense<0.000000e+00> : vector<1600x16xf32>
    %3 = tpu.matmul %1, %2, %cst {dimension_numbers = #tpu.dot_dimension_numbers<[1], [0], [0], [1], [0, 0, 1, 1], [], []>} : vector<1600x75xbf16>, vector<75x16xbf16>, vector<1600x16xf32> -> vector<1600x16xf32>
    %4 = vector.extract_strided_slice %3 {offsets = [0, 0], sizes = [400, 16], strides = [1, 1]} : vector<1600x16xf32> to vector<400x16xf32>
    %5 = vector.extract_strided_slice %3 {offsets = [400, 0], sizes = [400, 16], strides = [1, 1]} : vector<1600x16xf32> to vector<400x16xf32>
    %6 = arith.maximumf %4, %5 : vector<400x16xf32>
    %7 = vector.extract_strided_slice %3 {offsets = [800, 0], sizes = [400, 16], strides = [1, 1]} : vector<1600x16xf32> to vector<400x16xf32>
    %8 = vector.extract_strided_slice %3 {offsets = [1200, 0], sizes = [400, 16], strides = [1, 1]} : vector<1600x16xf32> to vector<400x16xf32>
    %9 = arith.maximumf %7, %8 : vector<400x16xf32>
    %10 = arith.maximumf %6, %9 : vector<400x16xf32>
    %c0_4 = arith.constant 0 : index
    %c0_5 = arith.constant 0 : index
    %11 = vector.load %arg3[%c0_4, %c0_5] : memref<1x16xf32, #tpu.memory_space<vmem>>, vector<1x16xf32>
    %12 = vector.broadcast %11 : vector<1x16xf32> to vector<400x16xf32>
    %13 = arith.addf %10, %12 : vector<400x16xf32>
    %cst_6 = arith.constant 0.000000e+00 : f32
    %14 = vector.broadcast %cst_6 : f32 to vector<400x16xf32>
    %15 = arith.cmpf ogt, %13, %14 : vector<400x16xf32>
    %cst_7 = arith.constant 0.00999999977 : f32
    %16 = vector.broadcast %cst_7 : f32 to vector<400x16xf32>
    %17 = arith.mulf %16, %13 : vector<400x16xf32>
    %18 = arith.select %15, %13, %17 : vector<400x16xi1>, vector<400x16xf32>
    %19 = arith.truncf %18 : vector<400x16xf32> to vector<400x16xbf16>
    %c0_8 = arith.constant 0 : index
    %c0_9 = arith.constant 0 : index
    %20 = vector.load %arg4[%c0_8, %c0_9] : memref<400x16xbf16, #tpu.memory_space<vmem>>, vector<400x16xbf16>
    tpu.vector_store %arg4[%c0_8, %c0_9], %19 {strides = array<i32>} : memref<400x16xbf16, #tpu.memory_space<vmem>>, vector<400x16xbf16>,
    return
  }
  func.func @transform_0(%arg0: i32) -> (i32, i32, i32) {
    %c0_i32 = arith.constant 0 : i32
    %c0_i32_0 = arith.constant 0 : i32
    %c0_i32_1 = arith.constant 0 : i32
    return %c0_i32, %arg0, %c0_i32_0 : i32, i32, i32
  }
  func.func @transform_1(%arg0: i32) -> (i32, i32) {
    %c0_i32 = arith.constant 0 : i32
    %c0_i32_0 = arith.constant 0 : i32
    %c0_i32_1 = arith.constant 0 : i32
    return %c0_i32, %c0_i32_0 : i32, i32
  }
  func.func @transform_2(%arg0: i32) -> (i32, i32) {
    %c0_i32 = arith.constant 0 : i32
    %c0_i32_0 = arith.constant 0 : i32
    %c0_i32_1 = arith.constant 0 : i32
    return %c0_i32, %c0_i32_0 : i32, i32
  }
  func.func @transform_3(%arg0: i32) -> (i32, i32) {
    %c0_i32 = arith.constant 0 : i32
    %c0_i32_0 = arith.constant 0 : i32
    return %arg0, %c0_i32 : i32, i32
  }
}

module attributes {stable_mosaic.version = 11 : i64} {
  func.func @conv_pool_kernel(%arg0: i32, %arg1: memref<4x80x400xbf16, #tpu.memory_space<vmem>>, %arg2: memref<400x32xbf16, #tpu.memory_space<vmem>>, %arg3: memref<1x32xf32, #tpu.memory_space<vmem>>, %arg4: memref<80x32xbf16, #tpu.memory_space<vmem>>) attributes {dimension_semantics = [#tpu.dimension_semantics<parallel>], iteration_bounds = array<i64: 1>, scalar_prefetch = 0 : i64, scratch_operands = 0 : i64, tpu.core_type = #tpu.core_type<tc>, window_params = [{transform_indices = @transform_0, window_bounds = array<i64: 4, 80, 400>}, {pipeline_mode = #tpu.pipeline_mode<synchronous>, transform_indices = @transform_1, window_bounds = array<i64: 400, 32>}, {pipeline_mode = #tpu.pipeline_mode<synchronous>, transform_indices = @transform_2, window_bounds = array<i64: 1, 32>}, {transform_indices = @transform_3, window_bounds = array<i64: 80, 32>}]} {
    %c0 = arith.constant 0 : index
    %c0_0 = arith.constant 0 : index
    %c0_1 = arith.constant 0 : index
    %0 = vector.load %arg1[%c0, %c0_0, %c0_1] : memref<4x80x400xbf16, #tpu.memory_space<vmem>>, vector<4x80x400xbf16>
    %1 = vector.shape_cast %0 : vector<4x80x400xbf16> to vector<320x400xbf16>
    %c0_2 = arith.constant 0 : index
    %c0_3 = arith.constant 0 : index
    %2 = vector.load %arg2[%c0_2, %c0_3] : memref<400x32xbf16, #tpu.memory_space<vmem>>, vector<400x32xbf16>
    %cst = arith.constant dense<0.000000e+00> : vector<320x32xf32>
    %3 = tpu.matmul %1, %2, %cst {dimension_numbers = #tpu.dot_dimension_numbers<[1], [0], [0], [1], [0, 0, 1, 1], [], []>} : vector<320x400xbf16>, vector<400x32xbf16>, vector<320x32xf32> -> vector<320x32xf32>
    %4 = vector.extract_strided_slice %3 {offsets = [0, 0], sizes = [80, 32], strides = [1, 1]} : vector<320x32xf32> to vector<80x32xf32>
    %5 = vector.extract_strided_slice %3 {offsets = [80, 0], sizes = [80, 32], strides = [1, 1]} : vector<320x32xf32> to vector<80x32xf32>
    %6 = arith.maximumf %4, %5 : vector<80x32xf32>
    %7 = vector.extract_strided_slice %3 {offsets = [160, 0], sizes = [80, 32], strides = [1, 1]} : vector<320x32xf32> to vector<80x32xf32>
    %8 = vector.extract_strided_slice %3 {offsets = [240, 0], sizes = [80, 32], strides = [1, 1]} : vector<320x32xf32> to vector<80x32xf32>
    %9 = arith.maximumf %7, %8 : vector<80x32xf32>
    %10 = arith.maximumf %6, %9 : vector<80x32xf32>
    %c0_4 = arith.constant 0 : index
    %c0_5 = arith.constant 0 : index
    %11 = vector.load %arg3[%c0_4, %c0_5] : memref<1x32xf32, #tpu.memory_space<vmem>>, vector<1x32xf32>
    %12 = vector.broadcast %11 : vector<1x32xf32> to vector<80x32xf32>
    %13 = arith.addf %10, %12 : vector<80x32xf32>
    %cst_6 = arith.constant 0.000000e+00 : f32
    %14 = vector.broadcast %cst_6 : f32 to vector<80x32xf32>
    %15 = arith.cmpf ogt, %13, %14 : vector<80x32xf32>
    %cst_7 = arith.constant 0.00999999977 : f32
    %16 = vector.broadcast %cst_7 : f32 to vector<80x32xf32>
    %17 = arith.mulf %16, %13 : vector<80x32xf32>
    %18 = arith.select %15, %13, %17 : vector<80x32xi1>, vector<80x32xf32>
    %19 = arith.truncf %18 : vector<80x32xf32> to vector<80x32xbf16>
    %c0_8 = arith.constant 0 : index
    %c0_9 = arith.constant 0 : index
    %20 = vector.load %arg4[%c0_8, %c0_9] : memref<80x32xbf16, #tpu.memory_space<vmem>>, vector<80x32xbf16>
    tpu.vector_store %arg4[%c0_8, %c0_9], %19 {strides = array<i32>} : memref<80x32xbf16, #tpu.memory_space<vmem>>, vector<80x32xbf16>,
    return
  }
  func.func @transform_0(%arg0: i32) -> (i32, i32, i32) {
    %c0_i32 = arith.constant 0 : i32
    %c0_i32_0 = arith.constant 0 : i32
    %c0_i32_1 = arith.constant 0 : i32
    return %c0_i32, %arg0, %c0_i32_0 : i32, i32, i32
  }
  func.func @transform_1(%arg0: i32) -> (i32, i32) {
    %c0_i32 = arith.constant 0 : i32
    %c0_i32_0 = arith.constant 0 : i32
    %c0_i32_1 = arith.constant 0 : i32
    return %c0_i32, %c0_i32_0 : i32, i32
  }
  func.func @transform_2(%arg0: i32) -> (i32, i32) {
    %c0_i32 = arith.constant 0 : i32
    %c0_i32_0 = arith.constant 0 : i32
    %c0_i32_1 = arith.constant 0 : i32
    return %c0_i32, %c0_i32_0 : i32, i32
  }
  func.func @transform_3(%arg0: i32) -> (i32, i32) {
    %c0_i32 = arith.constant 0 : i32
    %c0_i32_0 = arith.constant 0 : i32
    return %arg0, %c0_i32 : i32, i32
  }
}

module attributes {stable_mosaic.version = 11 : i64} {
  func.func @conv_pool_kernel(%arg0: i32, %arg1: memref<4x32x288xbf16, #tpu.memory_space<vmem>>, %arg2: memref<288x64xbf16, #tpu.memory_space<vmem>>, %arg3: memref<1x64xf32, #tpu.memory_space<vmem>>, %arg4: memref<32x64xbf16, #tpu.memory_space<vmem>>) attributes {dimension_semantics = [#tpu.dimension_semantics<parallel>], iteration_bounds = array<i64: 1>, scalar_prefetch = 0 : i64, scratch_operands = 0 : i64, tpu.core_type = #tpu.core_type<tc>, window_params = [{transform_indices = @transform_0, window_bounds = array<i64: 4, 32, 288>}, {pipeline_mode = #tpu.pipeline_mode<synchronous>, transform_indices = @transform_1, window_bounds = array<i64: 288, 64>}, {pipeline_mode = #tpu.pipeline_mode<synchronous>, transform_indices = @transform_2, window_bounds = array<i64: 1, 64>}, {transform_indices = @transform_3, window_bounds = array<i64: 32, 64>}]} {
    %c0 = arith.constant 0 : index
    %c0_0 = arith.constant 0 : index
    %c0_1 = arith.constant 0 : index
    %0 = vector.load %arg1[%c0, %c0_0, %c0_1] : memref<4x32x288xbf16, #tpu.memory_space<vmem>>, vector<4x32x288xbf16>
    %1 = vector.shape_cast %0 : vector<4x32x288xbf16> to vector<128x288xbf16>
    %c0_2 = arith.constant 0 : index
    %c0_3 = arith.constant 0 : index
    %2 = vector.load %arg2[%c0_2, %c0_3] : memref<288x64xbf16, #tpu.memory_space<vmem>>, vector<288x64xbf16>
    %cst = arith.constant dense<0.000000e+00> : vector<128x64xf32>
    %3 = tpu.matmul %1, %2, %cst {dimension_numbers = #tpu.dot_dimension_numbers<[1], [0], [0], [1], [0, 0, 1, 1], [], []>} : vector<128x288xbf16>, vector<288x64xbf16>, vector<128x64xf32> -> vector<128x64xf32>
    %4 = vector.extract_strided_slice %3 {offsets = [0, 0], sizes = [32, 64], strides = [1, 1]} : vector<128x64xf32> to vector<32x64xf32>
    %5 = vector.extract_strided_slice %3 {offsets = [32, 0], sizes = [32, 64], strides = [1, 1]} : vector<128x64xf32> to vector<32x64xf32>
    %6 = arith.maximumf %4, %5 : vector<32x64xf32>
    %7 = vector.extract_strided_slice %3 {offsets = [64, 0], sizes = [32, 64], strides = [1, 1]} : vector<128x64xf32> to vector<32x64xf32>
    %8 = vector.extract_strided_slice %3 {offsets = [96, 0], sizes = [32, 64], strides = [1, 1]} : vector<128x64xf32> to vector<32x64xf32>
    %9 = arith.maximumf %7, %8 : vector<32x64xf32>
    %10 = arith.maximumf %6, %9 : vector<32x64xf32>
    %c0_4 = arith.constant 0 : index
    %c0_5 = arith.constant 0 : index
    %11 = vector.load %arg3[%c0_4, %c0_5] : memref<1x64xf32, #tpu.memory_space<vmem>>, vector<1x64xf32>
    %12 = vector.broadcast %11 : vector<1x64xf32> to vector<32x64xf32>
    %13 = arith.addf %10, %12 : vector<32x64xf32>
    %cst_6 = arith.constant 0.000000e+00 : f32
    %14 = vector.broadcast %cst_6 : f32 to vector<32x64xf32>
    %15 = arith.cmpf ogt, %13, %14 : vector<32x64xf32>
    %cst_7 = arith.constant 0.00999999977 : f32
    %16 = vector.broadcast %cst_7 : f32 to vector<32x64xf32>
    %17 = arith.mulf %16, %13 : vector<32x64xf32>
    %18 = arith.select %15, %13, %17 : vector<32x64xi1>, vector<32x64xf32>
    %19 = arith.truncf %18 : vector<32x64xf32> to vector<32x64xbf16>
    %c0_8 = arith.constant 0 : index
    %c0_9 = arith.constant 0 : index
    %20 = vector.load %arg4[%c0_8, %c0_9] : memref<32x64xbf16, #tpu.memory_space<vmem>>, vector<32x64xbf16>
    tpu.vector_store %arg4[%c0_8, %c0_9], %19 {strides = array<i32>} : memref<32x64xbf16, #tpu.memory_space<vmem>>, vector<32x64xbf16>,
    return
  }
  func.func @transform_0(%arg0: i32) -> (i32, i32, i32) {
    %c0_i32 = arith.constant 0 : i32
    %c0_i32_0 = arith.constant 0 : i32
    %c0_i32_1 = arith.constant 0 : i32
    return %c0_i32, %arg0, %c0_i32_0 : i32, i32, i32
  }
  func.func @transform_1(%arg0: i32) -> (i32, i32) {
    %c0_i32 = arith.constant 0 : i32
    %c0_i32_0 = arith.constant 0 : i32
    %c0_i32_1 = arith.constant 0 : i32
    return %c0_i32, %c0_i32_0 : i32, i32
  }
  func.func @transform_2(%arg0: i32) -> (i32, i32) {
    %c0_i32 = arith.constant 0 : i32
    %c0_i32_0 = arith.constant 0 : i32
    %c0_i32_1 = arith.constant 0 : i32
    return %c0_i32, %c0_i32_0 : i32, i32
  }
  func.func @transform_3(%arg0: i32) -> (i32, i32) {
    %c0_i32 = arith.constant 0 : i32
    %c0_i32_0 = arith.constant 0 : i32
    return %arg0, %c0_i32 : i32, i32
  }
}

module attributes {stable_mosaic.version = 11 : i64} {
  func.func @fc_head_kernel(%arg0: i32, %arg1: memref<16x576xbf16, #tpu.memory_space<vmem>>, %arg2: memref<576x128xbf16, #tpu.memory_space<vmem>>, %arg3: memref<1x128xf32, #tpu.memory_space<vmem>>, %arg4: memref<128x10xbf16, #tpu.memory_space<vmem>>, %arg5: memref<1x10xf32, #tpu.memory_space<vmem>>, %arg6: memref<16x128xf32, #tpu.memory_space<vmem>>, %arg7: memref<16x10xf32, #tpu.memory_space<vmem>>) attributes {dimension_semantics = [#tpu.dimension_semantics<parallel>], iteration_bounds = array<i64: 1>, scalar_prefetch = 0 : i64, scratch_operands = 0 : i64, tpu.core_type = #tpu.core_type<tc>, window_params = [{transform_indices = @transform_0, window_bounds = array<i64: 16, 576>}, {pipeline_mode = #tpu.pipeline_mode<synchronous>, transform_indices = @transform_1, window_bounds = array<i64: 576, 128>}, {pipeline_mode = #tpu.pipeline_mode<synchronous>, transform_indices = @transform_2, window_bounds = array<i64: 1, 128>}, {pipeline_mode = #tpu.pipeline_mode<synchronous>, transform_indices = @transform_3, window_bounds = array<i64: 128, 10>}, {pipeline_mode = #tpu.pipeline_mode<synchronous>, transform_indices = @transform_4, window_bounds = array<i64: 1, 10>}, {transform_indices = @transform_5, window_bounds = array<i64: 16, 128>}, {transform_indices = @transform_6, window_bounds = array<i64: 16, 10>}]} {
    %c0 = arith.constant 0 : index
    %c0_0 = arith.constant 0 : index
    %0 = vector.load %arg1[%c0, %c0_0] : memref<16x576xbf16, #tpu.memory_space<vmem>>, vector<16x576xbf16>
    %c0_1 = arith.constant 0 : index
    %c0_2 = arith.constant 0 : index
    %1 = vector.load %arg2[%c0_1, %c0_2] : memref<576x128xbf16, #tpu.memory_space<vmem>>, vector<576x128xbf16>
    %cst = arith.constant dense<0.000000e+00> : vector<16x128xf32>
    %2 = tpu.matmul %0, %1, %cst {dimension_numbers = #tpu.dot_dimension_numbers<[1], [0], [0], [1], [0, 0, 1, 1], [], []>} : vector<16x576xbf16>, vector<576x128xbf16>, vector<16x128xf32> -> vector<16x128xf32>
    %c0_3 = arith.constant 0 : index
    %c0_4 = arith.constant 0 : index
    %3 = vector.load %arg3[%c0_3, %c0_4] : memref<1x128xf32, #tpu.memory_space<vmem>>, vector<1x128xf32>
    %4 = vector.broadcast %3 : vector<1x128xf32> to vector<16x128xf32>
    %5 = arith.addf %2, %4 : vector<16x128xf32>
    %cst_5 = arith.constant 0.000000e+00 : f32
    %6 = vector.broadcast %cst_5 : f32 to vector<16x128xf32>
    %7 = arith.cmpf ogt, %5, %6 : vector<16x128xf32>
    %cst_6 = arith.constant 0.00999999977 : f32
    %8 = vector.broadcast %cst_6 : f32 to vector<16x128xf32>
    %9 = arith.mulf %8, %5 : vector<16x128xf32>
    %10 = arith.select %7, %5, %9 : vector<16x128xi1>, vector<16x128xf32>
    %c0_7 = arith.constant 0 : index
    %c0_8 = arith.constant 0 : index
    %11 = vector.load %arg6[%c0_7, %c0_8] : memref<16x128xf32, #tpu.memory_space<vmem>>, vector<16x128xf32>
    tpu.vector_store %arg6[%c0_7, %c0_8], %10 {strides = array<i32>} : memref<16x128xf32, #tpu.memory_space<vmem>>, vector<16x128xf32>,
    %12 = arith.truncf %10 : vector<16x128xf32> to vector<16x128xbf16>
    %c0_9 = arith.constant 0 : index
    %c0_10 = arith.constant 0 : index
    %13 = vector.load %arg4[%c0_9, %c0_10] : memref<128x10xbf16, #tpu.memory_space<vmem>>, vector<128x10xbf16>
    %cst_11 = arith.constant dense<0.000000e+00> : vector<16x10xf32>
    %14 = tpu.matmul %12, %13, %cst_11 {dimension_numbers = #tpu.dot_dimension_numbers<[1], [0], [0], [1], [0, 0, 1, 1], [], []>} : vector<16x128xbf16>, vector<128x10xbf16>, vector<16x10xf32> -> vector<16x10xf32>
    %c0_12 = arith.constant 0 : index
    %c0_13 = arith.constant 0 : index
    %15 = vector.load %arg5[%c0_12, %c0_13] : memref<1x10xf32, #tpu.memory_space<vmem>>, vector<1x10xf32>
    %16 = vector.broadcast %15 : vector<1x10xf32> to vector<16x10xf32>
    %17 = arith.addf %14, %16 : vector<16x10xf32>
    %c0_14 = arith.constant 0 : index
    %c0_15 = arith.constant 0 : index
    %18 = vector.load %arg7[%c0_14, %c0_15] : memref<16x10xf32, #tpu.memory_space<vmem>>, vector<16x10xf32>
    tpu.vector_store %arg7[%c0_14, %c0_15], %17 {strides = array<i32>} : memref<16x10xf32, #tpu.memory_space<vmem>>, vector<16x10xf32>,
    return
  }
  func.func @transform_0(%arg0: i32) -> (i32, i32) {
    %c0_i32 = arith.constant 0 : i32
    %c0_i32_0 = arith.constant 0 : i32
    return %arg0, %c0_i32 : i32, i32
  }
  func.func @transform_1(%arg0: i32) -> (i32, i32) {
    %c0_i32 = arith.constant 0 : i32
    %c0_i32_0 = arith.constant 0 : i32
    %c0_i32_1 = arith.constant 0 : i32
    return %c0_i32, %c0_i32_0 : i32, i32
  }
  func.func @transform_2(%arg0: i32) -> (i32, i32) {
    %c0_i32 = arith.constant 0 : i32
    %c0_i32_0 = arith.constant 0 : i32
    %c0_i32_1 = arith.constant 0 : i32
    return %c0_i32, %c0_i32_0 : i32, i32
  }
  func.func @transform_3(%arg0: i32) -> (i32, i32) {
    %c0_i32 = arith.constant 0 : i32
    %c0_i32_0 = arith.constant 0 : i32
    %c0_i32_1 = arith.constant 0 : i32
    return %c0_i32, %c0_i32_0 : i32, i32
  }
  func.func @transform_4(%arg0: i32) -> (i32, i32) {
    %c0_i32 = arith.constant 0 : i32
    %c0_i32_0 = arith.constant 0 : i32
    %c0_i32_1 = arith.constant 0 : i32
    return %c0_i32, %c0_i32_0 : i32, i32
  }
  func.func @transform_5(%arg0: i32) -> (i32, i32) {
    %c0_i32 = arith.constant 0 : i32
    %c0_i32_0 = arith.constant 0 : i32
    return %arg0, %c0_i32 : i32, i32
  }
  func.func @transform_6(%arg0: i32) -> (i32, i32) {
    %c0_i32 = arith.constant 0 : i32
    %c0_i32_0 = arith.constant 0 : i32
    return %arg0, %c0_i32 : i32, i32
  }
}

</mosaic_0001>

<bundles_post_ra>
// kernel: cifar_cnn_forward.4
= control target key start
LH: loop header
LB: loop body
LE: loop exit
PB: predicated region body
PF: predicated region fallthrough
CT: control target
= control target key end

     0   :  { %vm1055_vm0 = vcmask 1044480   ;;  %vm1056_vm1 = vcmask 1045504   ;;  %v3245_v1 = vmov 65535   ;;  %vm754_vm2 = vcmask 613376   ;;  %s4235_s1 = inlined_call_operand.vmem [shape: bf16[75,16], index: 1, kind: input, shape index: {}]   ;;  %s4236_s0 = inlined_call_operand.vmem [shape: bf16[4,400,75], index: 0, kind: input, shape index: {}]   ;;  %s4237_s2 = inlined_call_operand.vmem [shape: f32[1,16], index: 2, kind: input, shape index: {}]   ;;  %s4238_s3 = inlined_call_operand.vmem [shape: bf16[400,16], index: 3, kind: output, shape index: {}]  }
   0x1   :  { %v3139_v0 = vld [vmem:[%s4235_s1 + $0x20] sm:$0x3f]   ;;  %v1057_v2 = vsel %vm1055_vm0, 4294967295, %v3245_v1  ;;  %v3140_v5 = vld [vmem:[%s4235_s1 + $0x18] sm:$0xff]   ;;  %v3145_v7 = vld [vmem:[%s4236_s0 + $0x190] sm:$0xff]   ;;  %vm2452_vm4 = vcmask 125952  }
   0x2   :  { %v1058_v3 = vsel %vm1056_vm1, %v1057_v2, 0  ;;  %v3144_v6 = vld [vmem:[%s4236_s0] sm:$0xff]   ;;  %v3141_v8 = vld [vmem:[%s4235_s1 + $0x10] sm:$0xff]   ;;  %3028 = vmatprep.mubr.msk.bf16.mxu1 %vm754_vm2, %v3145_v7  ;;  %v3142_v9 = vld [vmem:[%s4235_s1 + $0x8] sm:$0xff]  }
   0x3   :  { %v1060_v4 = vand.u32 %v3139_v0, %v1058_v3  ;;  %2928 = vmatprep.mubr.msk.bf16.mxu0 %vm754_vm2, %v3144_v6  ;;  %v3143_v10 = vld [vmem:[%s4235_s1] sm:$0xff]   ;;  %v3146_v11 = vld [vmem:[%s4236_s0 + $0x8] sm:$0xff]   ;;  %v3147_v12 = vld [vmem:[%s4236_s0 + $0x198] sm:$0xff]  }
   0x4   :  { %v3148_v13 = vld [vmem:[%s4236_s0 + $0x10] sm:$0xff]   ;;  %v3149_v14 = vld [vmem:[%s4236_s0 + $0x1a0] sm:$0xff]   ;;  %v3150_v15 = vld [vmem:[%s4236_s0 + $0x18] sm:$0xff]  }
   0x5   :  { %2918 = vmatprep.subr.bf16.mxu0 %v1060_v4  ;;  %3128 = vmatprep.subr.bf16.mxu1 %v1060_v4  ;;  %v3151_v16 = vld [vmem:[%s4236_s0 + $0x1a8] sm:$0xff]   ;;  %v3152_v17 = vld [vmem:[%s4236_s0 + $0x20] sm:$0xff]   ;;  %v3153_v18 = vld [vmem:[%s4236_s0 + $0x1b0] sm:$0xff]  }
   0x6   :  { %2919 = vmatpush3.bf16.msra.mxu0 %v1060_v4  ;;  %3133 = vmatpush3.bf16.msra.mxu1 %v1060_v4  ;;  %v3154_v19 = vld [vmem:[%s4236_s0 + $0x28] sm:$0xff]   ;;  %v3155_v20 = vld [vmem:[%s4236_s0 + $0x1b8] sm:$0xff]   ;;  %v3156_v21 = vld [vmem:[%s4236_s0 + $0x30] sm:$0xff]  }
   0x7   :  { %2920 = vmatprep.subr.bf16.mxu0 %v3140_v5  ;;  %3129 = vmatprep.subr.bf16.mxu1 %v3140_v5  ;;  %v3157_v22 = vld [vmem:[%s4236_s0 + $0x1c0] sm:$0xff]   ;;  %v3158_v23 = vld [vmem:[%s4236_s0 + $0x38] sm:$0xff]   ;;  %v3159_v24 = vld [vmem:[%s4236_s0 + $0x1c8] sm:$0xff]  }
   0x8   :  { %v3160_v25 = vld [vmem:[%s4236_s0 + $0x40] sm:$0xff]   ;;  %v3161_v26 = vld [vmem:[%s4236_s0 + $0x1d0] sm:$0xff]   ;;  %v3162_v27 = vld [vmem:[%s4236_s0 + $0x48] sm:$0xff]  }
   0x9   :  { %v3163_v28 = vld [vmem:[%s4236_s0 + $0x1d8] sm:$0xff]   ;;  %v3164_v29 = vld [vmem:[%s4236_s0 + $0x50] sm:$0xff]   ;;  %v3165_v30 = vld [vmem:[%s4236_s0 + $0x1e0] sm:$0xff]  }
   0xa   :  { %2921 = vmatpush3.bf16.msra.mxu0 %v3140_v5  ;;  %3134 = vmatpush3.bf16.msra.mxu1 %v3140_v5  ;;  %v3166_v31 = vld [vmem:[%s4236_s0 + $0x58] sm:$0xff]   ;;  %v3167_v32 = vld [vmem:[%s4236_s0 + $0x1e8] sm:$0xff]   ;;  %v3168_v33 = vld [vmem:[%s4236_s0 + $0x60] sm:$0xff]  }
   0xb   :  { %2922 = vmatprep.subr.bf16.mxu0 %v3141_v8  ;;  %3130 = vmatprep.subr.bf16.mxu1 %v3141_v8  ;;  %v3169_v34 = vld [vmem:[%s4236_s0 + $0x1f0] sm:$0xff]   ;;  %v3170_v35 = vld [vmem:[%s4236_s0 + $0x68] sm:$0xff]   ;;  %v3171_v36 = vld [vmem:[%s4236_s0 + $0x1f8] sm:$0xff]  }
   0xc   :  { %v3172_v37 = vld [vmem:[%s4236_s0 + $0x70] sm:$0xff]   ;;  %v3173_v38 = vld [vmem:[%s4236_s0 + $0x200] sm:$0xff]   ;;  %v3174_v39 = vld [vmem:[%s4236_s0 + $0x78] sm:$0xff]  }
   0xd   :  { %v3175_v40 = vld [vmem:[%s4236_s0 + $0x208] sm:$0xff]   ;;  %v3176_v41 = vld [vmem:[%s4236_s0 + $0x80] sm:$0xff]   ;;  %v3177_v42 = vld [vmem:[%s4236_s0 + $0x210] sm:$0xff]  }
   0xe   :  { %2923 = vmatpush3.bf16.msra.mxu0 %v3141_v8  ;;  %3135 = vmatpush3.bf16.msra.mxu1 %v3141_v8  ;;  %v3178_v43 = vld [vmem:[%s4236_s0 + $0x88] sm:$0xff]   ;;  %v3179_v44 = vld [vmem:[%s4236_s0 + $0x218] sm:$0xff]   ;;  %v3180_v45 = vld [vmem:[%s4236_s0 + $0x90] sm:$0xff]  }
   0xf   :  { %2924 = vmatprep.subr.bf16.mxu0 %v3142_v9  ;;  %3131 = vmatprep.subr.bf16.mxu1 %v3142_v9  ;;  %v3181_v46 = vld [vmem:[%s4236_s0 + $0x220] sm:$0xff]   ;;  %v3182_v47 = vld [vmem:[%s4236_s0 + $0x98] sm:$0xff]   ;;  %v3183_v48 = vld [vmem:[%s4236_s0 + $0x228] sm:$0xff]  }
  0x10   :  { %v3184_v49 = vld [vmem:[%s4236_s0 + $0xa0] sm:$0xff]   ;;  %v3185_v50 = vld [vmem:[%s4236_s0 + $0x230] sm:$0xff]   ;;  %v3186_v51 = vld [vmem:[%s4236_s0 + $0xa8] sm:$0xff]  }
  0x11   :  { %v3187_v52 = vld [vmem:[%s4236_s0 + $0x238] sm:$0xff]   ;;  %v3188_v53 = vld [vmem:[%s4236_s0 + $0xb0] sm:$0xff]   ;;  %v3189_v54 = vld [vmem:[%s4236_s0 + $0x240] sm:$0xff]  }
  0x12   :  { %2925 = vmatpush3.bf16.msra.mxu0 %v3142_v9  ;;  %3136 = vmatpush3.bf16.msra.mxu1 %v3142_v9  ;;  %v3190_v55 = vld [vmem:[%s4236_s0 + $0xb8] sm:$0xff]   ;;  %v3191_v56 = vld [vmem:[%s4236_s0 + $0x248] sm:$0xff]   ;;  %v3192_v57 = vld [vmem:[%s4236_s0 + $0xc0] sm:$0xff]  }
  0x13   :  { %2926 = vmatprep.subr.bf16.mxu0 %v3143_v10  ;;  %3132 = vmatprep.subr.bf16.mxu1 %v3143_v10  ;;  %v3193_v58 = vld [vmem:[%s4236_s0 + $0x250] sm:$0xff]   ;;  %v3194_v59 = vld [vmem:[%s4236_s0 + $0xc8] sm:$0xff]   ;;  %v3195_v60 = vld [vmem:[%s4236_s0 + $0x258] sm:$0xff]  }
  0x14   :  { %v3196_v61 = vld [vmem:[%s4236_s0 + $0xd0] sm:$0xff]   ;;  %v3197_v62 = vld [vmem:[%s4236_s0 + $0x260] sm:$0xff]   ;;  %v3198_v63 = vld [vmem:[%s4236_s0 + $0xd8] sm:$0xff]  }
  0x15   :  { %v3199_v0 = vld [vmem:[%s4236_s0 + $0x268] sm:$0xff]   ;;  %v3200_v1 = vld [vmem:[%s4236_s0 + $0xe0] sm:$0xff]   ;;  %v3201_v2 = vld [vmem:[%s4236_s0 + $0x270] sm:$0xff]  }
  0x16   :  { %2927 = vmatpush3.bf16.msra.mxu0 %v3143_v10  ;;  %3137 = vmatpush3.bf16.msra.mxu1 %v3143_v10  ;;  %v3202_v3 = vld [vmem:[%s4236_s0 + $0xe8] sm:$0xff]   ;;  %v3203_v4 = vld [vmem:[%s4236_s0 + $0x278] sm:$0xff]   ;;  %v3204_v5 = vld [vmem:[%s4236_s0 + $0xf0] sm:$0xff]  }
  0x17   :  { %v3205_v6 = vld [vmem:[%s4236_s0 + $0x280] sm:$0xff]   ;;  %v3206_v7 = vld [vmem:[%s4236_s0 + $0xf8] sm:$0xff]   ;;  %v3207_v8 = vld [vmem:[%s4236_s0 + $0x288] sm:$0xff]  }
  0x18   :  { %v3208_v9 = vld [vmem:[%s4236_s0 + $0x100] sm:$0xff]   ;;  %v3209_v10 = vld [vmem:[%s4236_s0 + $0x290] sm:$0xff]  }
  0x19   :  { %2929 = vmatmul.mubr.msk.bf16.vlgmr.msra.gmra.mxu0 %vm754_vm2, %v3146_v11  ;;  %3029 = vmatmul.mubr.msk.bf16.vlgmr.msra.gmra.mxu1 %vm754_vm2, %v3147_v12  ;;  %v3210_v11 = vld [vmem:[%s4236_s0 + $0x108] sm:$0xff]   ;;  %v3211_v12 = vld [vmem:[%s4236_s0 + $0x298] sm:$0xff]  }
  0x1a   :  { %2932 = vmatprep.mubr.msk.bf16.mxu0 %vm754_vm2, %v3148_v13  ;;  %3032 = vmatprep.mubr.msk.bf16.mxu1 %vm754_vm2, %v3149_v14  ;;  %v3212_v13 = vld [vmem:[%s4236_s0 + $0x110] sm:$0xff]   ;;  %v3213_v14 = vld [vmem:[%s4236_s0 + $0x2a0] sm:$0xff]  }
  0x21   :  { %2933 = vmatmul.mubr.msk.bf16.gmra.mxu0 %vm754_vm2, %v3150_v15  ;;  %3033 = vmatmul.mubr.msk.bf16.gmra.mxu1 %vm754_vm2, %v3151_v16  ;;  %v3214_v15 = vld [vmem:[%s4236_s0 + $0x118] sm:$0xff]   ;;  %v3215_v16 = vld [vmem:[%s4236_s0 + $0x2a8] sm:$0xff]  }
  0x22   :  { %2936 = vmatprep.mubr.msk.bf16.mxu0 %vm754_vm2, %v3152_v17  ;;  %3036 = vmatprep.mubr.msk.bf16.mxu1 %vm754_vm2, %v3153_v18  ;;  %v3216_v17 = vld [vmem:[%s4236_s0 + $0x120] sm:$0xff]   ;;  %v3217_v18 = vld [vmem:[%s4236_s0 + $0x2b0] sm:$0xff]  }
  0x29   :  { %2937 = vmatmul.mubr.msk.bf16.gmra.mxu0 %vm754_vm2, %v3154_v19  ;;  %3037 = vmatmul.mubr.msk.bf16.gmra.mxu1 %vm754_vm2, %v3155_v20  ;;  %v3218_v19 = vld [vmem:[%s4236_s0 + $0x128] sm:$0xff]   ;;  %v3219_v20 = vld [vmem:[%s4236_s0 + $0x2b8] sm:$0xff]  }
  0x2a   :  { %2940 = vmatprep.mubr.msk.bf16.mxu0 %vm754_vm2, %v3156_v21  ;;  %3040 = vmatprep.mubr.msk.bf16.mxu1 %vm754_vm2, %v3157_v22  ;;  %v3220_v21 = vld [vmem:[%s4236_s0 + $0x130] sm:$0xff]   ;;  %v3221_v22 = vld [vmem:[%s4236_s0 + $0x2c0] sm:$0xff]  }
  0x31   :  { %2941 = vmatmul.mubr.msk.bf16.gmra.mxu0 %vm754_vm2, %v3158_v23  ;;  %3041 = vmatmul.mubr.msk.bf16.gmra.mxu1 %vm754_vm2, %v3159_v24  ;;  %v3222_v23 = vld [vmem:[%s4236_s0 + $0x138] sm:$0xff]   ;;  %v3223_v24 = vld [vmem:[%s4236_s0 + $0x2c8] sm:$0xff]  }
  0x32   :  { %2944 = vmatprep.mubr.msk.bf16.mxu0 %vm754_vm2, %v3160_v25  ;;  %3044 = vmatprep.mubr.msk.bf16.mxu1 %vm754_vm2, %v3161_v26  ;;  %v3224_v25 = vld [vmem:[%s4236_s0 + $0x140] sm:$0xff]   ;;  %v3225_v26 = vld [vmem:[%s4236_s0 + $0x2d0] sm:$0xff]  }
  0x39   :  { %2945 = vmatmul.mubr.msk.bf16.gmra.mxu0 %vm754_vm2, %v3162_v27  ;;  %3045 = vmatmul.mubr.msk.bf16.gmra.mxu1 %vm754_vm2, %v3163_v28  ;;  %v3226_v27 = vld [vmem:[%s4236_s0 + $0x148] sm:$0xff]   ;;  %v3227_v28 = vld [vmem:[%s4236_s0 + $0x2d8] sm:$0xff]  }
  0x3a   :  { %2948 = vmatprep.mubr.msk.bf16.mxu0 %vm754_vm2, %v3164_v29  ;;  %3048 = vmatprep.mubr.msk.bf16.mxu1 %vm754_vm2, %v3165_v30  ;;  %v3228_v29 = vld [vmem:[%s4236_s0 + $0x150] sm:$0xff]   ;;  %v3229_v30 = vld [vmem:[%s4236_s0 + $0x2e0] sm:$0xff]  }
  0x41   :  { %2949 = vmatmul.mubr.msk.bf16.gmra.mxu0 %vm754_vm2, %v3166_v31  ;;  %3049 = vmatmul.mubr.msk.bf16.gmra.mxu1 %vm754_vm2, %v3167_v32  ;;  %v3230_v31 = vld [vmem:[%s4236_s0 + $0x158] sm:$0xff]   ;;  %v3231_v32 = vld [vmem:[%s4236_s0 + $0x2e8] sm:$0xff]  }
  0x42   :  { %2952 = vmatprep.mubr.msk.bf16.mxu0 %vm754_vm2, %v3168_v33  ;;  %3052 = vmatprep.mubr.msk.bf16.mxu1 %vm754_vm2, %v3169_v34  ;;  %v3232_v33 = vld [vmem:[%s4236_s0 + $0x160] sm:$0xff]   ;;  %v3233_v34 = vld [vmem:[%s4236_s0 + $0x2f0] sm:$0xff]  }
  0x49   :  { %2953 = vmatmul.mubr.msk.bf16.gmra.mxu0 %vm754_vm2, %v3170_v35  ;;  %3053 = vmatmul.mubr.msk.bf16.gmra.mxu1 %vm754_vm2, %v3171_v36  ;;  %v3234_v35 = vld [vmem:[%s4236_s0 + $0x168] sm:$0xff]   ;;  %v3235_v36 = vld [vmem:[%s4236_s0 + $0x2f8] sm:$0xff]  }
  0x4a   :  { %2956 = vmatprep.mubr.msk.bf16.mxu0 %vm754_vm2, %v3172_v37  ;;  %3056 = vmatprep.mubr.msk.bf16.mxu1 %vm754_vm2, %v3173_v38  ;;  %v3236_v37 = vld [vmem:[%s4236_s0 + $0x170] sm:$0xff]   ;;  %v3237_v38 = vld [vmem:[%s4236_s0 + $0x300] sm:$0xff]  }
  0x51   :  { %2957 = vmatmul.mubr.msk.bf16.gmra.mxu0 %vm754_vm2, %v3174_v39  ;;  %3057 = vmatmul.mubr.msk.bf16.gmra.mxu1 %vm754_vm2, %v3175_v40  ;;  %v3238_v39 = vld [vmem:[%s4236_s0 + $0x178] sm:$0xff]   ;;  %v3239_v40 = vld [vmem:[%s4236_s0 + $0x308] sm:$0xff]  }
  0x52   :  { %2960 = vmatprep.mubr.msk.bf16.mxu0 %vm754_vm2, %v3176_v41  ;;  %3060 = vmatprep.mubr.msk.bf16.mxu1 %vm754_vm2, %v3177_v42  ;;  %v3240_v41 = vld [vmem:[%s4236_s0 + $0x180] sm:$0xff]   ;;  %v3241_v42 = vld [vmem:[%s4236_s0 + $0x310] sm:$0xff]  }
  0x59   :  { %2961 = vmatmul.mubr.msk.bf16.gmra.mxu0 %vm754_vm2, %v3178_v43  ;;  %3061 = vmatmul.mubr.msk.bf16.gmra.mxu1 %vm754_vm2, %v3179_v44  ;;  %v3242_v43 = vld [vmem:[%s4236_s0 + $0x188] sm:$0xff]   ;;  %v3243_v44 = vld [vmem:[%s4236_s0 + $0x318] sm:$0xff]  }
  0x5a   :  { %2964 = vmatprep.mubr.msk.bf16.mxu0 %vm754_vm2, %v3180_v45  ;;  %3064 = vmatprep.mubr.msk.bf16.mxu1 %vm754_vm2, %v3181_v46 }
  0x61   :  { %2965 = vmatmul.mubr.msk.bf16.gmra.mxu0 %vm754_vm2, %v3182_v47  ;;  %3065 = vmatmul.mubr.msk.bf16.gmra.mxu1 %vm754_vm2, %v3183_v48 }
  0x62   :  { %2968 = vmatprep.mubr.msk.bf16.mxu0 %vm754_vm2, %v3184_v49  ;;  %3068 = vmatprep.mubr.msk.bf16.mxu1 %vm754_vm2, %v3185_v50 }
  0x69   :  { %2969 = vmatmul.mubr.msk.bf16.gmra.mxu0 %vm754_vm2, %v3186_v51  ;;  %3069 = vmatmul.mubr.msk.bf16.gmra.mxu1 %vm754_vm2, %v3187_v52 }
  0x6a   :  { %2972 = vmatprep.mubr.msk.bf16.mxu0 %vm754_vm2, %v3188_v53  ;;  %3072 = vmatprep.mubr.msk.bf16.mxu1 %vm754_vm2, %v3189_v54 }
  0x71   :  { %2973 = vmatmul.mubr.msk.bf16.gmra.mxu0 %vm754_vm2, %v3190_v55  ;;  %3073 = vmatmul.mubr.msk.bf16.gmra.mxu1 %vm754_vm2, %v3191_v56 }
  0x72   :  { %2976 = vmatprep.mubr.msk.bf16.mxu0 %vm754_vm2, %v3192_v57  ;;  %3076 = vmatprep.mubr.msk.bf16.mxu1 %vm754_vm2, %v3193_v58 }
  0x79   :  { %2977 = vmatmul.mubr.msk.bf16.gmra.mxu0 %vm754_vm2, %v3194_v59  ;;  %3077 = vmatmul.mubr.msk.bf16.gmra.mxu1 %vm754_vm2, %v3195_v60 }
  0x7a   :  { %2980 = vmatprep.mubr.msk.bf16.mxu0 %vm754_vm2, %v3196_v61  ;;  %3080 = vmatprep.mubr.msk.bf16.mxu1 %vm754_vm2, %v3197_v62 }
  0x81   :  { %2981 = vmatmul.mubr.msk.bf16.gmra.mxu0 %vm754_vm2, %v3198_v63  ;;  %3081 = vmatmul.mubr.msk.bf16.gmra.mxu1 %vm754_vm2, %v3199_v0 }
  0x82   :  { %2984 = vmatprep.mubr.msk.bf16.mxu0 %vm754_vm2, %v3200_v1  ;;  %3084 = vmatprep.mubr.msk.bf16.mxu1 %vm754_vm2, %v3201_v2 }
  0x89   :  { %2985 = vmatmul.mubr.msk.bf16.gmra.mxu0 %vm754_vm2, %v3202_v3  ;;  %3085 = vmatmul.mubr.msk.bf16.gmra.mxu1 %vm754_vm2, %v3203_v4 }
  0x8a   :  { %2988 = vmatprep.mubr.msk.bf16.mxu0 %vm754_vm2, %v3204_v5  ;;  %3088 = vmatprep.mubr.msk.bf16.mxu1 %vm754_vm2, %v3205_v6 }
  0x91   :  { %2989 = vmatmul.mubr.msk.bf16.gmra.mxu0 %vm754_vm2, %v3206_v7  ;;  %3089 = vmatmul.mubr.msk.bf16.gmra.mxu1 %vm754_vm2, %v3207_v8 }
  0x92   :  { %2992 = vmatprep.mubr.msk.bf16.mxu0 %vm754_vm2, %v3208_v9  ;;  %3092 = vmatprep.mubr.msk.bf16.mxu1 %vm754_vm2, %v3209_v10 }
  0x99   :  { %2993 = vmatmul.mubr.msk.bf16.gmra.mxu0 %vm754_vm2, %v3210_v11  ;;  %3093 = vmatmul.mubr.msk.bf16.gmra.mxu1 %vm754_vm2, %v3211_v12 }
  0x9a   :  { %2996 = vmatprep.mubr.msk.bf16.mxu0 %vm754_vm2, %v3212_v13  ;;  %3096 = vmatprep.mubr.msk.bf16.mxu1 %vm754_vm2, %v3213_v14 }
  0xa1   :  { %2997 = vmatmul.mubr.msk.bf16.gmra.mxu0 %vm754_vm2, %v3214_v15  ;;  %3097 = vmatmul.mubr.msk.bf16.gmra.mxu1 %vm754_vm2, %v3215_v16 }
  0xa2   :  { %3000 = vmatprep.mubr.msk.bf16.mxu0 %vm754_vm2, %v3216_v17  ;;  %3100 = vmatprep.mubr.msk.bf16.mxu1 %vm754_vm2, %v3217_v18 }
  0xa9   :  { %3001 = vmatmul.mubr.msk.bf16.gmra.mxu0 %vm754_vm2, %v3218_v19  ;;  %3101 = vmatmul.mubr.msk.bf16.gmra.mxu1 %vm754_vm2, %v3219_v20 }
  0xaa   :  { %3004 = vmatprep.mubr.msk.bf16.mxu0 %vm754_vm2, %v3220_v21  ;;  %3104 = vmatprep.mubr.msk.bf16.mxu1 %vm754_vm2, %v3221_v22 }
  0xb1   :  { %3005 = vmatmul.mubr.msk.bf16.gmra.mxu0 %vm754_vm2, %v3222_v23  ;;  %3105 = vmatmul.mubr.msk.bf16.gmra.mxu1 %vm754_vm2, %v3223_v24 }
  0xb2   :  { %3008 = vmatprep.mubr.msk.bf16.mxu0 %vm754_vm2, %v3224_v25  ;;  %3108 = vmatprep.mubr.msk.bf16.mxu1 %vm754_vm2, %v3225_v26 }
  0xb9   :  { %3009 = vmatmul.mubr.msk.bf16.gmra.mxu0 %vm754_vm2, %v3226_v27  ;;  %3109 = vmatmul.mubr.msk.bf16.gmra.mxu1 %vm754_vm2, %v3227_v28 }
  0xba   :  { %3012 = vmatprep.mubr.msk.bf16.mxu0 %vm754_vm2, %v3228_v29  ;;  %3112 = vmatprep.mubr.msk.bf16.mxu1 %vm754_vm2, %v3229_v30 }
  0xc1   :  { %3013 = vmatmul.mubr.msk.bf16.gmra.mxu0 %vm754_vm2, %v3230_v31  ;;  %3113 = vmatmul.mubr.msk.bf16.gmra.mxu1 %vm754_vm2, %v3231_v32 }
  0xc2   :  { %3016 = vmatprep.mubr.msk.bf16.mxu0 %vm754_vm2, %v3232_v33  ;;  %3116 = vmatprep.mubr.msk.bf16.mxu1 %vm754_vm2, %v3233_v34 }
  0xc9   :  { %3017 = vmatmul.mubr.msk.bf16.gmra.mxu0 %vm754_vm2, %v3234_v35  ;;  %3117 = vmatmul.mubr.msk.bf16.gmra.mxu1 %vm754_vm2, %v3235_v36 }
  0xca   :  { %3020 = vmatprep.mubr.msk.bf16.mxu0 %vm754_vm2, %v3236_v37  ;;  %3120 = vmatprep.mubr.msk.bf16.mxu1 %vm754_vm2, %v3237_v38 }
  0xd1   :  { %3021 = vmatmul.mubr.msk.bf16.gmra.mxu0 %vm754_vm2, %v3238_v39  ;;  %3121 = vmatmul.mubr.msk.bf16.gmra.mxu1 %vm754_vm2, %v3239_v40 }
  0xd2   :  { %3024 = vmatprep.mubr.msk.bf16.mxu0 %vm754_vm2, %v3240_v41  ;;  %3124 = vmatprep.mubr.msk.bf16.mxu1 %vm754_vm2, %v3241_v42 }
  0xd9   :  { %v3679_v45 = vpop.f32.mrf.mxu0  ;;  %3025 = vmatmul.mubr.msk.bf16.gmra.mxu0 %vm754_vm2, %v3242_v43  ;;  %v3682_v46 = vpop.f32.mrf.mxu1  ;;  %3125 = vmatmul.mubr.msk.bf16.gmra.mxu1 %vm754_vm2, %v3243_v44 }
  0xdb   :  { %v3685_v47 = vpop.f32.mrf.mxu0  ;;  %v3687_v48 = vpop.f32.mrf.mxu1 }
  0xdd   :  { %v3689_v49 = vpop.f32.mrf.mxu0  ;;  %v3691_v50 = vpop.f32.mrf.mxu1 }
  0xdf   :  { %v3693_v51 = vpop.f32.mrf.mxu0  ;;  %v3695_v52 = vpop.f32.mrf.mxu1 }
  0xe1   :  { %v3697_v53 = vpop.f32.mrf.mxu0  ;;  %v3699_v54 = vpop.f32.mrf.mxu1 }
  0xe3   :  { %v3701_v55 = vpop.f32.mrf.mxu0  ;;  %v3703_v56 = vpop.f32.mrf.mxu1 }
  0xe5   :  { %v3705_v57 = vpop.f32.mrf.mxu0  ;;  %v3707_v58 = vpop.f32.mrf.mxu1 }
  0xe7   :  { %v3709_v59 = vpop.f32.mrf.mxu0  ;;  %v3711_v60 = vpop.f32.mrf.mxu1 }
  0xe9   :  { %v3713_v61 = vpop.f32.mrf.mxu0  ;;  %v3715_v62 = vpop.f32.mrf.mxu1 }
  0xeb   :  { %v3717_v63 = vpop.f32.mrf.mxu0  ;;  %v3719_v0 = vpop.f32.mrf.mxu1 }
  0xed   :  { %v3721_v1 = vpop.f32.mrf.mxu0  ;;  %v3723_v2 = vpop.f32.mrf.mxu1 }
  0xef   :  { %v3725_v3 = vpop.f32.mrf.mxu0  ;;  %v3727_v4 = vpop.f32.mrf.mxu1 }
  0xf1   :  { %v3729_v5 = vpop.f32.mrf.mxu0  ;;  %v3731_v6 = vpop.f32.mrf.mxu1 }
  0xf3   :  { %v3733_v7 = vpop.f32.mrf.mxu0  ;;  %v3735_v8 = vpop.f32.mrf.mxu1 }
  0xf5   :  { %v3737_v9 = vpop.f32.mrf.mxu0  ;;  %v3739_v10 = vpop.f32.mrf.mxu1 }
  0xf7   :  { %v3741_v11 = vpop.f32.mrf.mxu0  ;;  %v3743_v12 = vpop.f32.mrf.mxu1 }
  0xf9   :  { %v3745_v13 = vpop.f32.mrf.mxu0  ;;  %v3747_v14 = vpop.f32.mrf.mxu1 }
  0xfb   :  { %v3749_v15 = vpop.f32.mrf.mxu0  ;;  %v3751_v16 = vpop.f32.mrf.mxu1 }
  0xfd   :  { %v3753_v17 = vpop.f32.mrf.mxu0  ;;  %v3755_v18 = vpop.f32.mrf.mxu1 }
  0xff   :  { %v3757_v19 = vpop.f32.mrf.mxu0  ;;  %v3759_v20 = vpop.f32.mrf.mxu1 }
 0x101   :  { %v3761_v21 = vpop.f32.mrf.mxu0  ;;  %v3763_v22 = vpop.f32.mrf.mxu1 }
 0x103   :  { %v3765_v23 = vpop.f32.mrf.mxu0  ;;  %v3767_v24 = vpop.f32.mrf.mxu1 }
 0x105   :  { %v3769_v25 = vpop.f32.mrf.mxu0  ;;  %v3771_v26 = vpop.f32.mrf.mxu1 }
 0x106   :  { %4239 = vst [vmem:[#allocation2_spill] sm:$0xff] %v3769_v25  ;;  %4240 = vst [vmem:[#allocation3_spill] sm:$0xff] %v3771_v26 }
 0x107   :  { %v3773_v27 = vpop.f32.mrf.mxu0  ;;  %v3775_v28 = vpop.f32.mrf.mxu1 }
 0x109   :  { %v3777_v29 = vpop.f32.mrf.mxu0  ;;  %v3779_v30 = vpop.f32.mrf.mxu1 }
 0x10a   :  { %4241 = vst [vmem:[#allocation4_spill] sm:$0xff] %v3777_v29  ;;  %4242 = vst [vmem:[#allocation5_spill] sm:$0xff] %v3779_v30 }
 0x10b   :  { %v3781_v31 = vpop.f32.mrf.mxu0  ;;  %v3783_v32 = vpop.f32.mrf.mxu1 }
 0x10d   :  { %v3785_v33 = vpop.f32.mrf.mxu0  ;;  %v3787_v34 = vpop.f32.mrf.mxu1 }
 0x10e   :  { %4243 = vst [vmem:[#allocation6_spill] sm:$0xff] %v3785_v33  ;;  %4244 = vst [vmem:[#allocation7_spill] sm:$0xff] %v3787_v34 }
 0x10f   :  { %v3789_v35 = vpop.f32.mrf.mxu0  ;;  %v3791_v36 = vpop.f32.mrf.mxu1 }
 0x111   :  { %v3793_v37 = vpop.f32.mrf.mxu0  ;;  %v3795_v38 = vpop.f32.mrf.mxu1 }
 0x112   :  { %4245 = vst [vmem:[#allocation8_spill] sm:$0xff] %v3793_v37  ;;  %4246 = vst [vmem:[#allocation9_spill] sm:$0xff] %v3795_v38 }
 0x113   :  { %v3797_v39 = vpop.f32.mrf.mxu0  ;;  %v3799_v40 = vpop.f32.mrf.mxu1 }
 0x114   :  { %4247 = vst [vmem:[#allocation10_spill] sm:$0xff] %v3797_v39  ;;  %4248 = vst [vmem:[#allocation11_spill] sm:$0xff] %v3799_v40 }
 0x115   :  { %v3801_v41 = vpop.f32.mrf.mxu0  ;;  %v3803_v42 = vpop.f32.mrf.mxu1 }
 0x116   :  { %4249 = vst [vmem:[#allocation12_spill] sm:$0xff] %v3801_v41  ;;  %4250 = vst [vmem:[#allocation13_spill] sm:$0xff] %v3803_v42 }
 0x117   :  { %v3805_v43 = vpop.f32.mrf.mxu0  ;;  %v3807_v44 = vpop.f32.mrf.mxu1 }
 0x118   :  { %4251 = vst [vmem:[#allocation14_spill] sm:$0xff] %v3805_v43  ;;  %4252 = vst [vmem:[#allocation15_spill] sm:$0xff] %v3807_v44 }
 0x119   :  { %v3809_v34 = vpop.f32.mrf.mxu0  ;;  %v3811_v33 = vpop.f32.mrf.mxu1 }
 0x11a   :  { %4253 = vst [vmem:[#allocation16_spill] sm:$0xff] %v3809_v34  ;;  %4254 = vst [vmem:[#allocation17_spill] sm:$0xff] %v3811_v33 }
 0x11b   :  { %v3813_v30 = vpop.f32.mrf.mxu0  ;;  %v3815_v37 = vpop.f32.mrf.mxu1 }
 0x11c   :  { %4255 = vst [vmem:[#allocation18_spill] sm:$0xff] %v3813_v30  ;;  %4256 = vst [vmem:[#allocation19_spill] sm:$0xff] %v3815_v37 }
 0x11d   :  { %v3817_v38 = vpop.f32.mrf.mxu0  ;;  %v3819_v29 = vpop.f32.mrf.mxu1 }
 0x11e   :  { %4257 = vst [vmem:[#allocation20_spill] sm:$0xff] %v3817_v38  ;;  %4258 = vst [vmem:[#allocation21_spill] sm:$0xff] %v3819_v29 }
 0x11f   :  { %v3821_v40 = vpop.f32.mrf.mxu0  ;;  %v3823_v41 = vpop.f32.mrf.mxu1 }
 0x120   :  { %4259 = vst [vmem:[#allocation22_spill] sm:$0xff] %v3821_v40  ;;  %4260 = vst [vmem:[#allocation23_spill] sm:$0xff] %v3823_v41 }
 0x121   :  { %v3825_v42 = vpop.f32.mrf.mxu0  ;;  %v3827_v43 = vpop.f32.mrf.mxu1 }
 0x122   :  { %4261 = vst [vmem:[#allocation24_spill] sm:$0xff] %v3825_v42  ;;  %4262 = vst [vmem:[#allocation25_spill] sm:$0xff] %v3827_v43 }
 0x123   :  { %v3829_v44 = vpop.f32.mrf.mxu0  ;;  %v3831_v34 = vpop.f32.mrf.mxu1 }
 0x124   :  { %4263 = vst [vmem:[#allocation26_spill] sm:$0xff] %v3829_v44  ;;  %4264 = vst [vmem:[#allocation27_spill] sm:$0xff] %v3831_v34 }
 0x125   :  { %v3833_v33 = vpop.f32.mrf.mxu0  ;;  %v3835_v30 = vpop.f32.mrf.mxu1 }
 0x126   :  { %4265 = vst [vmem:[#allocation28_spill] sm:$0xff] %v3833_v33  ;;  %4266 = vst [vmem:[#allocation29_spill] sm:$0xff] %v3835_v30 }
 0x127   :  { %v3837_v37 = vpop.f32.mrf.mxu0  ;;  %v3839_v38 = vpop.f32.mrf.mxu1 }
 0x128   :  { %4267 = vst [vmem:[#allocation30_spill] sm:$0xff] %v3837_v37  ;;  %4268 = vst [vmem:[#allocation31_spill] sm:$0xff] %v3839_v38 }
 0x129   :  { %v3841_v29 = vpop.f32.mrf.mxu0  ;;  %v3843_v40 = vpop.f32.mrf.mxu1 }
 0x12a   :  { %4269 = vst [vmem:[#allocation32_spill] sm:$0xff] %v3841_v29  ;;  %4270 = vst [vmem:[#allocation33_spill] sm:$0xff] %v3843_v40 }
 0x12b   :  { %v3845_v41 = vpop.f32.mrf.mxu0  ;;  %v3847_v42 = vpop.f32.mrf.mxu1 }
 0x12c   :  { %4271 = vst [vmem:[#allocation34_spill] sm:$0xff] %v3845_v41  ;;  %4272 = vst [vmem:[#allocation35_spill] sm:$0xff] %v3847_v42 }
 0x12d   :  { %v3849_v43 = vpop.f32.mrf.mxu0  ;;  %v3851_v44 = vpop.f32.mrf.mxu1 }
 0x12e   :  { %4273 = vst [vmem:[#allocation36_spill] sm:$0xff] %v3849_v43  ;;  %4274 = vst [vmem:[#allocation37_spill] sm:$0xff] %v3851_v44 }
 0x12f   :  { %v3853_v34 = vpop.f32.mrf.mxu0  ;;  %v3855_v33 = vpop.f32.mrf.mxu1 }
 0x130   :  { %4275 = vst [vmem:[#allocation38_spill] sm:$0xff] %v3853_v34  ;;  %4276 = vst [vmem:[#allocation39_spill] sm:$0xff] %v3855_v33 }
 0x131   :  { %v3857_v30 = vpop.f32.mrf.mxu0  ;;  %v3859_v37 = vpop.f32.mrf.mxu1 }
 0x132   :  { %4277 = vst [vmem:[#allocation40_spill] sm:$0xff] %v3857_v30  ;;  %4278 = vst [vmem:[#allocation41_spill] sm:$0xff] %v3859_v37  ;;  %v3878_v37 = vld [vmem:[%s4237_s2] ss:$0 sm:$0xff] }
 0x133   :  { %v3861_v38 = vpop.f32.mrf.mxu0  ;;  %v3863_v29 = vpop.f32.mrf.mxu1 }
 0x134   :  { %4279 = vst [vmem:[#allocation42_spill] sm:$0xff] %v3861_v38  ;;  %4280 = vst [vmem:[#allocation43_spill] sm:$0xff] %v3863_v29 }
 0x135   :  { %v3865_v40 = vpop.f32.mrf.mxu0  ;;  %v3867_v41 = vpop.f32.mrf.mxu1 }
 0x136   :  { %4281 = vst [vmem:[#allocation44_spill] sm:$0xff] %v3865_v40  ;;  %4282 = vst [vmem:[#allocation45_spill] sm:$0xff] %v3867_v41 }
 0x137   :  { %v3869_v42 = vpop.f32.mrf.mxu0  ;;  %v3871_v43 = vpop.f32.mrf.mxu1 }
 0x138   :  { %4283 = vst [vmem:[#allocation46_spill] sm:$0xff] %v3869_v42  ;;  %4284 = vst [vmem:[#allocation47_spill] sm:$0xff] %v3871_v43 }
 0x139   :  { %v2978_v44 = vpop.f32.mrf.mxu0  ;;  %v3078_v34 = vpop.f32.mrf.mxu1 }
 0x13a   :  { %v1895_v33 = vmax.f32 %v3685_v47, %v2978_v44  ;;  %v1945_v30 = vmax.f32 %v3687_v48, %v3078_v34 }
 0x13b   :  { %v3880_v29 = vpop.f32.mrf.mxu0  ;;  %v3882_v40 = vpop.f32.mrf.mxu1 }
 0x13c   :  { %4285 = vst [vmem:[#allocation48_spill] sm:$0xff] %v3880_v29  ;;  %4286 = vst [vmem:[#allocation49_spill] sm:$0xff] %v3882_v40  ;;  %v1995_v41 = vmax.f32 %v1895_v33, %v1945_v30 }
 0x13d   :  { %v2979_v38 = vpop.f32.mrf.mxu0  ;;  %v3079_v42 = vpop.f32.mrf.mxu1 }
 0x13e   :  { %v2052_v43 = vadd.f32 %v3878_v37, %v1995_v41  ;;  %v1896_v39 = vmax.f32 %v3693_v51, %v2979_v38  ;;  %v1946_v47 = vmax.f32 %v3695_v52, %v3079_v42 }
 0x13f   :  { %v3887_v44 = vpop.f32.mrf.mxu0  ;;  %v3889_v48 = vpop.f32.mrf.mxu1 }
 0x140   :  { %4287 = vst [vmem:[#allocation50_spill] sm:$0xff] %v3887_v44  ;;  %4288 = vst [vmem:[#allocation51_spill] sm:$0xff] %v3889_v48  ;;  %vm2102_vm3 = vcmp.gt.f32.partialorder %v2052_v43, 0.0  ;;  %v2152_v34 = vmul.f32 0.01, %v2052_v43  ;;  %v1996_v26 = vmax.f32 %v1896_v39, %v1946_v47 }
 0x141   :  { %v2982_v29 = vpop.f32.mrf.mxu0  ;;  %v3082_v25 = vpop.f32.mrf.mxu1 }
 0x142   :  { %v2202_v40 = vsel %vm2102_vm3, %v2052_v43, %v2152_v34  ;;  %v2053_v30 = vadd.f32 %v3878_v37, %v1996_v26  ;;  %v1899_v33 = vmax.f32 %v3701_v55, %v2982_v29  ;;  %v1949_v41 = vmax.f32 %v3703_v56, %v3082_v25 }
 0x143   :  { %v2763_v51 = vpack.c.bf16 %v2202_v40, %v2202_v40  ;;  %v1304_v38 = vpop.f32.mrf.mxu0  ;;  %v1704_v52 = vpop.f32.mrf.mxu1 }
 0x144   :  { %vm2103_vm5 = vcmp.gt.f32.partialorder %v2053_v30, 0.0  ;;  %v2153_v42 = vmul.f32 0.01, %v2053_v30  ;;  %v1999_v44 = vmax.f32 %v1899_v33, %v1949_v41  ;;  %v1897_v48 = vmax.f32 %v3679_v45, %v1304_v38 }
 0x145   :  { %2453 = vst.msk [vmem:[%s4238_s3] sm:$0xf] %vm2452_vm4, %v2763_v51  ;;  %v1947_v39 = vmax.f32 %v3682_v46, %v1704_v52  ;;  %v2983_v26 = vpop.f32.mrf.mxu0  ;;  %v3083_v43 = vpop.f32.mrf.mxu1 }
 0x146   :  { %v2203_v55 = vsel %vm2103_vm5, %v2053_v30, %v2153_v42  ;;  %v2056_v56 = vadd.f32 %v3878_v37, %v1999_v44  ;;  %v1900_v25 = vmax.f32 %v3709_v59, %v2983_v26  ;;  %v1950_v29 = vmax.f32 %v3711_v60, %v3083_v43 }
 0x147   :  { %v2764_v40 = vpack.c.bf16 %v2203_v55, %v2203_v55  ;;  %v1997_v47 = vmax.f32 %v1897_v48, %v1947_v39  ;;  %v1307_v34 = vpop.f32.mrf.mxu0  ;;  %v1707_v45 = vpop.f32.mrf.mxu1 }
 0x148   :  { %vm2106_vm6 = vcmp.gt.f32.partialorder %v2056_v56, 0.0  ;;  %v2156_v33 = vmul.f32 0.01, %v2056_v56  ;;  %v2000_v41 = vmax.f32 %v1900_v25, %v1950_v29  ;;  %v1898_v51 = vmax.f32 %v3689_v49, %v1307_v34 }
 0x149   :  { %2454 = vst.msk [vmem:[%s4238_s3 + $0x4] sm:$0xf] %vm2452_vm4, %v2764_v40  ;;  %v2054_v46 = vadd.f32 %v3878_v37, %v1997_v47  ;;  %v1948_v59 = vmax.f32 %v3691_v50, %v1707_v45  ;;  %v2986_v44 = vpop.f32.mrf.mxu0  ;;  %v3086_v60 = vpop.f32.mrf.mxu1 }
 0x14a   :  { %v2206_v30 = vsel %vm2106_vm6, %v2056_v56, %v2156_v33  ;;  %v2057_v48 = vadd.f32 %v3878_v37, %v2000_v41  ;;  %v1903_v38 = vmax.f32 %v3717_v63, %v2986_v44  ;;  %v1953_v52 = vmax.f32 %v3719_v0, %v3086_v60 }
 0x14b   :  { %v2767_v42 = vpack.c.bf16 %v2206_v30, %v2206_v30  ;;  %vm2104_vm7 = vcmp.gt.f32.partialorder %v2054_v46, 0.0  ;;  %v2154_v49 = vmul.f32 0.01, %v2054_v46  ;;  %v1998_v39 = vmax.f32 %v1898_v51, %v1948_v59  ;;  %v1320_v26 = vpop.f32.mrf.mxu0  ;;  %v1720_v43 = vpop.f32.mrf.mxu1 }
 0x14c   :  { %vm2107_vm8 = vcmp.gt.f32.partialorder %v2057_v48, 0.0  ;;  %v2157_v55 = vmul.f32 0.01, %v2057_v48  ;;  %v2003_v25 = vmax.f32 %v1903_v38, %v1953_v52  ;;  %v1901_v50 = vmax.f32 %v3697_v53, %v1320_v26 }
 0x14d   :  { %2457 = vst.msk [vmem:[%s4238_s3 + $0x10] sm:$0xf] %vm2452_vm4, %v2767_v42  ;;  %v2204_v56 = vsel %vm2104_vm7, %v2054_v46, %v2154_v49  ;;  %v2055_v63 = vadd.f32 %v3878_v37, %v1998_v39  ;;  %v1951_v0 = vmax.f32 %v3699_v54, %v1720_v43  ;;  %v2987_v29 = vpop.f32.mrf.mxu0  ;;  %v3087_v40 = vpop.f32.mrf.mxu1 }
 0x14e   :  { %v2765_v47 = vpack.c.bf16 %v2204_v56, %v2204_v56  ;;  %v2207_v34 = vsel %vm2107_vm8, %v2057_v48, %v2157_v55  ;;  %v2060_v45 = vadd.f32 %v3878_v37, %v2003_v25  ;;  %v1904_v33 = vmax.f32 %v3725_v3, %v2987_v29 }
 0x14f   :  { %v2768_v41 = vpack.c.bf16 %v2207_v34, %v2207_v34  ;;  %vm2105_vm9 = vcmp.gt.f32.partialorder %v2055_v63, 0.0  ;;  %v2155_v53 = vmul.f32 0.01, %v2055_v63  ;;  %v2001_v51 = vmax.f32 %v1901_v50, %v1951_v0  ;;  %v1323_v59 = vpop.f32.mrf.mxu0  ;;  %v1723_v44 = vpop.f32.mrf.mxu1 }
 0x150   :  { %2455 = vst.msk [vmem:[%s4238_s3 + $0x8] sm:$0xf] %vm2452_vm4, %v2765_v47  ;;  %vm2110_vm10 = vcmp.gt.f32.partialorder %v2060_v45, 0.0  ;;  %v2160_v54 = vmul.f32 0.01, %v2060_v45  ;;  %v1954_v46 = vmax.f32 %v3727_v4, %v3087_v40  ;;  %v1902_v60 = vmax.f32 %v3705_v57, %v1323_v59 }
 0x151   :  { %2458 = vst.msk [vmem:[%s4238_s3 + $0x14] sm:$0xf] %vm2452_vm4, %v2768_v41  ;;  %v2205_v3 = vsel %vm2105_vm9, %v2055_v63, %v2155_v53  ;;  %v2058_v30 = vadd.f32 %v3878_v37, %v2001_v51  ;;  %v1952_v48 = vmax.f32 %v3707_v58, %v1723_v44  ;;  %v2990_v38 = vpop.f32.mrf.mxu0  ;;  %v3090_v52 = vpop.f32.mrf.mxu1 }
 0x152   :  { %v2766_v42 = vpack.c.bf16 %v2205_v3, %v2205_v3  ;;  %v2210_v49 = vsel %vm2110_vm10, %v2060_v45, %v2160_v54  ;;  %v2004_v39 = vmax.f32 %v1904_v33, %v1954_v46  ;;  %v1907_v26 = vmax.f32 %v3733_v7, %v2990_v38 }
 0x153   :  { %v2771_v4 = vpack.c.bf16 %v2210_v49, %v2210_v49  ;;  %vm2108_vm11 = vcmp.gt.f32.partialorder %v2058_v30, 0.0  ;;  %v2158_v57 = vmul.f32 0.01, %v2058_v30  ;;  %v2002_v43 = vmax.f32 %v1902_v60, %v1952_v48  ;;  %v1336_v55 = vpop.f32.mrf.mxu0  ;;  %v1736_v25 = vpop.f32.mrf.mxu1 }
 0x154   :  { %2456 = vst.msk [vmem:[%s4238_s3 + $0xc] sm:$0xf] %vm2452_vm4, %v2766_v42  ;;  %v2061_v58 = vadd.f32 %v3878_v37, %v2004_v39  ;;  %v1957_v50 = vmax.f32 %v3735_v8, %v3090_v52  ;;  %v1905_v56 = vmax.f32 %v3713_v61, %v1336_v55  ;;  %v1955_v63 = vmax.f32 %v3715_v62, %v1736_v25 }
 0x155   :  { %2461 = vst.msk [vmem:[%s4238_s3 + $0x20] sm:$0xf] %vm2452_vm4, %v2771_v4  ;;  %v2208_v7 = vsel %vm2108_vm11, %v2058_v30, %v2158_v57  ;;  %v2059_v0 = vadd.f32 %v3878_v37, %v2002_v43  ;;  %v2991_v29 = vpop.f32.mrf.mxu0  ;;  %v3091_v40 = vpop.f32.mrf.mxu1 }
 0x156   :  { %v2769_v47 = vpack.c.bf16 %v2208_v7, %v2208_v7  ;;  %vm2111_vm12 = vcmp.gt.f32.partialorder %v2061_v58, 0.0  ;;  %v2161_v34 = vmul.f32 0.01, %v2061_v58  ;;  %v2007_v45 = vmax.f32 %v1907_v26, %v1957_v50 }
 0x157   :  { %vm2109_vm13 = vcmp.gt.f32.partialorder %v2059_v0, 0.0  ;;  %v2159_v8 = vmul.f32 0.01, %v2059_v0  ;;  %v2005_v33 = vmax.f32 %v1905_v56, %v1955_v63  ;;  %v1908_v61 = vmax.f32 %v3741_v11, %v2991_v29  ;;  %v1339_v62 = vpop.f32.mrf.mxu0  ;;  %v1739_v41 = vpop.f32.mrf.mxu1 }
 0x158   :  { %2459 = vst.msk [vmem:[%s4238_s3 + $0x18] sm:$0xf] %vm2452_vm4, %v2769_v47  ;;  %v2211_v53 = vsel %vm2111_vm12, %v2061_v58, %v2161_v34  ;;  %v2064_v51 = vadd.f32 %v3878_v37, %v2007_v45  ;;  %v1958_v59 = vmax.f32 %v3743_v12, %v3091_v40  ;;  %v1906_v44 = vmax.f32 %v3721_v1, %v1339_v62 }
 0x159   :  { %v2772_v54 = vpack.c.bf16 %v2211_v53, %v2211_v53  ;;  %v2209_v46 = vsel %vm2109_vm13, %v2059_v0, %v2159_v8  ;;  %v2062_v60 = vadd.f32 %v3878_v37, %v2005_v33  ;;  %v1956_v11 = vmax.f32 %v3723_v2, %v1739_v41  ;;  %v2994_v3 = vpop.f32.mrf.mxu0  ;;  %v3094_v30 = vpop.f32.mrf.mxu1 }
 0x15a   :  { %v2770_v48 = vpack.c.bf16 %v2209_v46, %v2209_v46  ;;  %vm2114_vm14 = vcmp.gt.f32.partialorder %v2064_v51, 0.0  ;;  %v2164_v38 = vmul.f32 0.01, %v2064_v51  ;;  %v2008_v52 = vmax.f32 %v1908_v61, %v1958_v59 }
 0x15b   :  { %2462 = vst.msk [vmem:[%s4238_s3 + $0x24] sm:$0xf] %vm2452_vm4, %v2772_v54  ;;  %vm2112_vm15 = vcmp.gt.f32.partialorder %v2062_v60, 0.0  ;;  %v2162_v12 = vmul.f32 0.01, %v2062_v60  ;;  %v2006_v1 = vmax.f32 %v1906_v44, %v1956_v11  ;;  %v1911_v42 = vmax.f32 %v3749_v15, %v2994_v3  ;;  %v1352_v49 = vpop.f32.mrf.mxu0  ;;  %v1752_v39 = vpop.f32.mrf.mxu1 }
 0x15c   :  { %2460 = vst.msk [vmem:[%s4238_s3 + $0x1c] sm:$0xf] %vm2452_vm4, %v2770_v48  ;;  %v2214_v2 = vsel %vm2114_vm14, %v2064_v51, %v2164_v38  ;;  %v2065_v26 = vadd.f32 %v3878_v37, %v2008_v52  ;;  %v1961_v4 = vmax.f32 %v3751_v16, %v3094_v30  ;;  %v1909_v57 = vmax.f32 %v3729_v5, %v1352_v49 }
 0x15d   :  { %v2775_v43 = vpack.c.bf16 %v2214_v2, %v2214_v2  ;;  %v2212_v55 = vsel %vm2112_vm15, %v2062_v60, %v2162_v12  ;;  %v2063_v25 = vadd.f32 %v3878_v37, %v2006_v1  ;;  %v1959_v15 = vmax.f32 %v3731_v6, %v1752_v39  ;;  %v2995_v58 = vpop.f32.mrf.mxu0  ;;  %v3095_v50 = vpop.f32.mrf.mxu1 }
 0x15e   :  { %v2773_v56 = vpack.c.bf16 %v2212_v55, %v2212_v55  ;;  %vm2115_vm0 = vcmp.gt.f32.partialorder %v2065_v26, 0.0  ;;  %v2165_v63 = vmul.f32 0.01, %v2065_v26  ;;  %v2011_v7 = vmax.f32 %v1911_v42, %v1961_v4 }
 0x15f   :  { %2465 = vst.msk [vmem:[%s4238_s3 + $0x30] sm:$0xf] %vm2452_vm4, %v2775_v43  ;;  %vm2113_vm1 = vcmp.gt.f32.partialorder %v2063_v25, 0.0  ;;  %v2163_v16 = vmul.f32 0.01, %v2063_v25  ;;  %v2009_v5 = vmax.f32 %v1909_v57, %v1959_v15  ;;  %v1912_v0 = vmax.f32 %v3757_v19, %v2995_v58  ;;  %v1355_v29 = vpop.f32.mrf.mxu0  ;;  %v1755_v40 = vpop.f32.mrf.mxu1 }
 0x160   :  { %2463 = vst.msk [vmem:[%s4238_s3 + $0x28] sm:$0xf] %vm2452_vm4, %v2773_v56  ;;  %v2215_v6 = vsel %vm2115_vm0, %v2065_v26, %v2165_v63  ;;  %v2068_v47 = vadd.f32 %v3878_v37, %v2011_v7  ;;  %v1962_v34 = vmax.f32 %v3759_v20, %v3095_v50  ;;  %v1910_v45 = vmax.f32 %v3737_v9, %v1355_v29 }
 0x161   :  { %v2776_v8 = vpack.c.bf16 %v2215_v6, %v2215_v6  ;;  %v2213_v33 = vsel %vm2113_vm1, %v2063_v25, %v2163_v16  ;;  %v2066_v61 = vadd.f32 %v3878_v37, %v2009_v5  ;;  %v1960_v19 = vmax.f32 %v3739_v10, %v1755_v40  ;;  %v2998_v62 = vpop.f32.mrf.mxu0  ;;  %v3098_v41 = vpop.f32.mrf.mxu1 }
 0x162   :  { %v2774_v53 = vpack.c.bf16 %v2213_v33, %v2213_v33  ;;  %vm2118_vm2 = vcmp.gt.f32.partialorder %v2068_v47, 0.0  ;;  %v2168_v51 = vmul.f32 0.01, %v2068_v47  ;;  %v2012_v59 = vmax.f32 %v1912_v0, %v1962_v34 }
 0x163   :  { %2466 = vst.msk [vmem:[%s4238_s3 + $0x34] sm:$0xf] %vm2452_vm4, %v2776_v8  ;;  %vm2116_vm3 = vcmp.gt.f32.partialorder %v2066_v61, 0.0  ;;  %v2166_v20 = vmul.f32 0.01, %v2066_v61  ;;  %v2010_v9 = vmax.f32 %v1910_v45, %v1960_v19  ;;  %v1915_v44 = vmax.f32 %v3765_v23, %v2998_v62  ;;  %v1368_v54 = vpop.f32.mrf.mxu0  ;;  %v1768_v46 = vpop.f32.mrf.mxu1 }
 0x164   :  { %2464 = vst.msk [vmem:[%s4238_s3 + $0x2c] sm:$0xf] %vm2452_vm4, %v2774_v53  ;;  %v2218_v10 = vsel %vm2118_vm2, %v2068_v47, %v2168_v51  ;;  %v2069_v60 = vadd.f32 %v3878_v37, %v2012_v59  ;;  %v1965_v11 = vmax.f32 %v3767_v24, %v3098_v41  ;;  %v1913_v3 = vmax.f32 %v3745_v13, %v1368_v54 }
 0x165   :  { %v2779_v30 = vpack.c.bf16 %v2218_v10, %v2218_v10  ;;  %v2216_v48 = vsel %vm2116_vm3, %v2066_v61, %v2166_v20  ;;  %v2067_v38 = vadd.f32 %v3878_v37, %v2010_v9  ;;  %v1963_v23 = vmax.f32 %v3747_v14, %v1768_v46  ;;  %v2999_v52 = vpop.f32.mrf.mxu0  ;;  %v3099_v12 = vpop.f32.mrf.mxu1  ;;  %v4289_v9 = vld [vmem:[#allocation2_spill] sm:$0xff] }
 0x166   :  { %v2777_v1 = vpack.c.bf16 %v2216_v48, %v2216_v48  ;;  %vm2119_vm5 = vcmp.gt.f32.partialorder %v2069_v60, 0.0  ;;  %v2169_v42 = vmul.f32 0.01, %v2069_v60  ;;  %v2015_v49 = vmax.f32 %v1915_v44, %v1965_v11 }
 0x167   :  { %2469 = vst.msk [vmem:[%s4238_s3 + $0x40] sm:$0xf] %vm2452_vm4, %v2779_v30  ;;  %vm2117_vm6 = vcmp.gt.f32.partialorder %v2067_v38, 0.0  ;;  %v2167_v24 = vmul.f32 0.01, %v2067_v38  ;;  %v2013_v13 = vmax.f32 %v1913_v3, %v1963_v23  ;;  %v1916_v39 = vmax.f32 %v3773_v27, %v2999_v52  ;;  %v1371_v2 = vpop.f32.mrf.mxu0  ;;  %v1771_v26 = vpop.f32.mrf.mxu1  ;;  %v4291_v52 = vld [vmem:[#allocation10_spill] sm:$0xff] }
 0x168   :  { %2467 = vst.msk [vmem:[%s4238_s3 + $0x38] sm:$0xf] %vm2452_vm4, %v2777_v1  ;;  %v2219_v14 = vsel %vm2119_vm5, %v2069_v60, %v2169_v42  ;;  %v2072_v4 = vadd.f32 %v3878_v37, %v2015_v49  ;;  %v1966_v57 = vmax.f32 %v3775_v28, %v3099_v12  ;;  %v1914_v43 = vmax.f32 %v3753_v17, %v1371_v2  ;;  %v4290_v60 = vld [vmem:[#allocation3_spill] sm:$0xff]  ;;  %v4293_v2 = vld [vmem:[#allocation4_spill] sm:$0xff] }
 0x169   :  { %v2780_v55 = vpack.c.bf16 %v2219_v14, %v2219_v14  ;;  %v2217_v25 = vsel %vm2117_vm6, %v2067_v38, %v2167_v24  ;;  %v2070_v15 = vadd.f32 %v3878_v37, %v2013_v13  ;;  %v1964_v27 = vmax.f32 %v3755_v18, %v1771_v26  ;;  %v3002_v58 = vpop.f32.mrf.mxu0  ;;  %v3102_v50 = vpop.f32.mrf.mxu1  ;;  %v4292_v13 = vld [vmem:[#allocation11_spill] sm:$0xff] }
 0x16a   :  { %v2778_v56 = vpack.c.bf16 %v2217_v25, %v2217_v25  ;;  %vm2122_vm7 = vcmp.gt.f32.partialorder %v2072_v4, 0.0  ;;  %v2172_v63 = vmul.f32 0.01, %v2072_v4  ;;  %v2016_v7 = vmax.f32 %v1916_v39, %v1966_v57 }
 0x16b   :  { %2470 = vst.msk [vmem:[%s4238_s3 + $0x44] sm:$0xf] %vm2452_vm4, %v2780_v55  ;;  %vm2120_vm8 = vcmp.gt.f32.partialorder %v2070_v15, 0.0  ;;  %v2170_v28 = vmul.f32 0.01, %v2070_v15  ;;  %v2014_v17 = vmax.f32 %v1914_v43, %v1964_v27  ;;  %v1919_v16 = vmax.f32 %v3781_v31, %v3002_v58  ;;  %v1384_v5 = vpop.f32.mrf.mxu0  ;;  %v1784_v0 = vpop.f32.mrf.mxu1  ;;  %v4294_v43 = vld [vmem:[#allocation5_spill] sm:$0xff] }
 0x16c   :  { %2468 = vst.msk [vmem:[%s4238_s3 + $0x3c] sm:$0xf] %vm2452_vm4, %v2778_v56  ;;  %v2222_v18 = vsel %vm2122_vm7, %v2072_v4, %v2172_v63  ;;  %v2073_v29 = vadd.f32 %v3878_v37, %v2016_v7  ;;  %v1969_v40 = vmax.f32 %v3783_v32, %v3102_v50  ;;  %v1917_v6 = vmax.f32 %v3761_v21, %v1384_v5  ;;  %v4295_v7 = vld [vmem:[#allocation14_spill] sm:$0xff] }
 0x16d   :  { %v2783_v47 = vpack.c.bf16 %v2222_v18, %v2222_v18  ;;  %v2220_v34 = vsel %vm2120_vm8, %v2070_v15, %v2170_v28  ;;  %v2071_v45 = vadd.f32 %v3878_v37, %v2014_v17  ;;  %v1967_v31 = vmax.f32 %v3763_v22, %v1784_v0  ;;  %v3003_v8 = vpop.f32.mrf.mxu0  ;;  %v3103_v33 = vpop.f32.mrf.mxu1  ;;  %v4296_v18 = vld [vmem:[#allocation15_spill] sm:$0xff] }
 0x16e   :  { %v2781_v61 = vpack.c.bf16 %v2220_v34, %v2220_v34  ;;  %vm2123_vm9 = vcmp.gt.f32.partialorder %v2073_v29, 0.0  ;;  %v2173_v19 = vmul.f32 0.01, %v2073_v29  ;;  %v2019_v62 = vmax.f32 %v1919_v16, %v1969_v40  ;;  %v4297_v40 = vld [vmem:[#allocation6_spill] sm:$0xff] }
 0x16f   :  { %2473 = vst.msk [vmem:[%s4238_s3 + $0x50] sm:$0xf] %vm2452_vm4, %v2783_v47  ;;  %vm2121_vm10 = vcmp.gt.f32.partialorder %v2071_v45, 0.0  ;;  %v2171_v32 = vmul.f32 0.01, %v2071_v45  ;;  %v2017_v21 = vmax.f32 %v1917_v6, %v1967_v31  ;;  %v1920_v41 = vmax.f32 %v3789_v35, %v3003_v8  ;;  %v1387_v53 = vpop.f32.mrf.mxu0  ;;  %v1787_v51 = vpop.f32.mrf.mxu1  ;;  %v4298_v31 = vld [vmem:[#allocation7_spill] sm:$0xff] }
 0x170   :  { %2471 = vst.msk [vmem:[%s4238_s3 + $0x48] sm:$0xf] %vm2452_vm4, %v2781_v61  ;;  %v2223_v22 = vsel %vm2123_vm9, %v2073_v29, %v2173_v19  ;;  %v2076_v59 = vadd.f32 %v3878_v37, %v2019_v62  ;;  %v1970_v20 = vmax.f32 %v3791_v36, %v3103_v33  ;;  %v1918_v44 = vmax.f32 %v4289_v9, %v1387_v53  ;;  %v4299_v53 = vld [vmem:[#allocation18_spill] sm:$0xff] }
 0x171   :  { %v2784_v54 = vpack.c.bf16 %v2223_v22, %v2223_v22  ;;  %v2221_v46 = vsel %vm2121_vm10, %v2071_v45, %v2171_v32  ;;  %v2074_v10 = vadd.f32 %v3878_v37, %v2017_v21  ;;  %v1968_v35 = vmax.f32 %v4290_v60, %v1787_v51  ;;  %v3006_v11 = vpop.f32.mrf.mxu0  ;;  %v3106_v3 = vpop.f32.mrf.mxu1 }
 0x172   :  { %v2782_v30 = vpack.c.bf16 %v2221_v46, %v2221_v46  ;;  %vm2126_vm11 = vcmp.gt.f32.partialorder %v2076_v59, 0.0  ;;  %v2176_v48 = vmul.f32 0.01, %v2076_v59  ;;  %v2020_v38 = vmax.f32 %v1920_v41, %v1970_v20  ;;  %v4301_v46 = vld [vmem:[#allocation8_spill] sm:$0xff] }
 0x173   :  { %2474 = vst.msk [vmem:[%s4238_s3 + $0x54] sm:$0xf] %vm2452_vm4, %v2784_v54  ;;  %vm2124_vm12 = vcmp.gt.f32.partialorder %v2074_v10, 0.0  ;;  %v2174_v36 = vmul.f32 0.01, %v2074_v10  ;;  %v2018_v23 = vmax.f32 %v1918_v44, %v1968_v35  ;;  %v1923_v12 = vmax.f32 %v4291_v52, %v3006_v11  ;;  %v1400_v1 = vpop.f32.mrf.mxu0  ;;  %v1800_v42 = vpop.f32.mrf.mxu1  ;;  %v4300_v44 = vld [vmem:[#allocation19_spill] sm:$0xff] }
 0x174   :  { %2472 = vst.msk [vmem:[%s4238_s3 + $0x4c] sm:$0xf] %vm2452_vm4, %v2782_v30  ;;  %v2226_v49 = vsel %vm2126_vm11, %v2076_v59, %v2176_v48  ;;  %v2077_v24 = vadd.f32 %v3878_v37, %v2020_v38  ;;  %v1973_v39 = vmax.f32 %v4292_v13, %v3106_v3  ;;  %v1921_v26 = vmax.f32 %v4293_v2, %v1400_v1  ;;  %v4302_v3 = vld [vmem:[#allocation9_spill] sm:$0xff] }
 0x175   :  { %v2787_v14 = vpack.c.bf16 %v2226_v49, %v2226_v49  ;;  %v2224_v4 = vsel %vm2124_vm12, %v2074_v10, %v2174_v36  ;;  %v2075_v57 = vadd.f32 %v3878_v37, %v2018_v23  ;;  %v1971_v55 = vmax.f32 %v4294_v43, %v1800_v42  ;;  %v3007_v25 = vpop.f32.mrf.mxu0  ;;  %v3107_v15 = vpop.f32.mrf.mxu1  ;;  %v4303_v42 = vld [vmem:[#allocation22_spill] sm:$0xff] }
 0x176   :  { %v2785_v27 = vpack.c.bf16 %v2224_v4, %v2224_v4  ;;  %vm2127_vm13 = vcmp.gt.f32.partialorder %v2077_v24, 0.0  ;;  %v2177_v58 = vmul.f32 0.01, %v2077_v24  ;;  %v2023_v50 = vmax.f32 %v1923_v12, %v1973_v39  ;;  %v4305_v4 = vld [vmem:[#allocation12_spill] sm:$0xff] }
 0x177   :  { %2477 = vst.msk [vmem:[%s4238_s3 + $0x60] sm:$0xf] %vm2452_vm4, %v2787_v14  ;;  %vm2125_vm14 = vcmp.gt.f32.partialorder %v2075_v57, 0.0  ;;  %v2175_v56 = vmul.f32 0.01, %v2075_v57  ;;  %v2021_v63 = vmax.f32 %v1921_v26, %v1971_v55  ;;  %v1924_v28 = vmax.f32 %v4295_v7, %v3007_v25  ;;  %v1403_v17 = vpop.f32.mrf.mxu0  ;;  %v1803_v16 = vpop.f32.mrf.mxu1  ;;  %v4304_v26 = vld [vmem:[#allocation23_spill] sm:$0xff] }
 0x178   :  { %2475 = vst.msk [vmem:[%s4238_s3 + $0x58] sm:$0xf] %vm2452_vm4, %v2785_v27  ;;  %v2227_v5 = vsel %vm2127_vm13, %v2077_v24, %v2177_v58  ;;  %v2080_v0 = vadd.f32 %v3878_v37, %v2023_v50  ;;  %v1974_v29 = vmax.f32 %v4296_v18, %v3107_v15  ;;  %v1922_v6 = vmax.f32 %v4297_v40, %v1403_v17  ;;  %v4306_v15 = vld [vmem:[#allocation13_spill] sm:$0xff] }
 0x179   :  { %v2788_v47 = vpack.c.bf16 %v2227_v5, %v2227_v5  ;;  %v2225_v34 = vsel %vm2125_vm14, %v2075_v57, %v2175_v56  ;;  %v2078_v45 = vadd.f32 %v3878_v37, %v2021_v63  ;;  %v1972_v8 = vmax.f32 %v4298_v31, %v1803_v16  ;;  %v3010_v33 = vpop.f32.mrf.mxu0  ;;  %v3110_v61 = vpop.f32.mrf.mxu1  ;;  %v4307_v16 = vld [vmem:[#allocation26_spill] sm:$0xff] }
 0x17a   :  { %v2786_v19 = vpack.c.bf16 %v2225_v34, %v2225_v34  ;;  %vm2130_vm15 = vcmp.gt.f32.partialorder %v2080_v0, 0.0  ;;  %v2180_v62 = vmul.f32 0.01, %v2080_v0  ;;  %v2024_v32 = vmax.f32 %v1924_v28, %v1974_v29  ;;  %v4309_v34 = vld [vmem:[#allocation16_spill] sm:$0xff] }
 0x17b   :  { %2478 = vst.msk [vmem:[%s4238_s3 + $0x64] sm:$0xf] %vm2452_vm4, %v2788_v47  ;;  %vm2128_vm0 = vcmp.gt.f32.partialorder %v2078_v45, 0.0  ;;  %v2178_v21 = vmul.f32 0.01, %v2078_v45  ;;  %v2022_v41 = vmax.f32 %v1922_v6, %v1972_v8  ;;  %v1927_v51 = vmax.f32 %v4299_v53, %v3010_v33  ;;  %v1416_v22 = vpop.f32.mrf.mxu0  ;;  %v1816_v59 = vpop.f32.mrf.mxu1  ;;  %v4308_v6 = vld [vmem:[#allocation27_spill] sm:$0xff] }
 0x17c   :  { %2476 = vst.msk [vmem:[%s4238_s3 + $0x5c] sm:$0xf] %vm2452_vm4, %v2786_v19  ;;  %v2230_v20 = vsel %vm2130_vm15, %v2080_v0, %v2180_v62  ;;  %v2081_v9 = vadd.f32 %v3878_v37, %v2024_v32  ;;  %v1977_v54 = vmax.f32 %v4300_v44, %v3110_v61  ;;  %v1925_v10 = vmax.f32 %v4301_v46, %v1416_v22  ;;  %v4310_v61 = vld [vmem:[#allocation17_spill] sm:$0xff] }
 0x17d   :  { %v2791_v60 = vpack.c.bf16 %v2230_v20, %v2230_v20  ;;  %v2228_v35 = vsel %vm2128_vm0, %v2078_v45, %v2178_v21  ;;  %v2079_v11 = vadd.f32 %v3878_v37, %v2022_v41  ;;  %v1975_v30 = vmax.f32 %v4302_v3, %v1816_v59  ;;  %v3011_v48 = vpop.f32.mrf.mxu0  ;;  %v3111_v38 = vpop.f32.mrf.mxu1  ;;  %v4311_v59 = vld [vmem:[#allocation30_spill] sm:$0xff] }
 0x17e   :  { %v2789_v36 = vpack.c.bf16 %v2228_v35, %v2228_v35  ;;  %vm2131_vm1 = vcmp.gt.f32.partialorder %v2081_v9, 0.0  ;;  %v2181_v23 = vmul.f32 0.01, %v2081_v9  ;;  %v2027_v52 = vmax.f32 %v1927_v51, %v1977_v54  ;;  %v4313_v35 = vld [vmem:[#allocation20_spill] sm:$0xff] }
 0x17f   :  { %2481 = vst.msk [vmem:[%s4238_s3 + $0x70] sm:$0xf] %vm2452_vm4, %v2791_v60  ;;  %vm2129_vm2 = vcmp.gt.f32.partialorder %v2079_v11, 0.0  ;;  %v2179_v12 = vmul.f32 0.01, %v2079_v11  ;;  %v2025_v1 = vmax.f32 %v1925_v10, %v1975_v30  ;;  %v1928_v49 = vmax.f32 %v4303_v42, %v3011_v48  ;;  %v1419_v24 = vpop.f32.mrf.mxu0  ;;  %v1819_v13 = vpop.f32.mrf.mxu1  ;;  %v4312_v10 = vld [vmem:[#allocation31_spill] sm:$0xff] }
 0x180   :  { %2479 = vst.msk [vmem:[%s4238_s3 + $0x68] sm:$0xf] %vm2452_vm4, %v2789_v36  ;;  %v2231_v39 = vsel %vm2131_vm1, %v2081_v9, %v2181_v23  ;;  %v2084_v2 = vadd.f32 %v3878_v37, %v2027_v52  ;;  %v1978_v14 = vmax.f32 %v4304_v26, %v3111_v38  ;;  %v1926_v57 = vmax.f32 %v4305_v4, %v1419_v24  ;;  %v4314_v38 = vld [vmem:[#allocation21_spill] sm:$0xff] }
 0x181   :  { %v2792_v43 = vpack.c.bf16 %v2231_v39, %v2231_v39  ;;  %v2229_v55 = vsel %vm2129_vm2, %v2079_v11, %v2179_v12  ;;  %v2082_v25 = vadd.f32 %v3878_v37, %v2025_v1  ;;  %v1976_v27 = vmax.f32 %v4306_v15, %v1819_v13  ;;  %v3014_v58 = vpop.f32.mrf.mxu0  ;;  %v3114_v50 = vpop.f32.mrf.mxu1  ;;  %v4315_v13 = vld [vmem:[#allocation34_spill] sm:$0xff] }
 0x182   :  { %v2790_v56 = vpack.c.bf16 %v2229_v55, %v2229_v55  ;;  %vm2134_vm3 = vcmp.gt.f32.partialorder %v2084_v2, 0.0  ;;  %v2184_v63 = vmul.f32 0.01, %v2084_v2  ;;  %v2028_v7 = vmax.f32 %v1928_v49, %v1978_v14  ;;  %v4317_v55 = vld [vmem:[#allocation24_spill] sm:$0xff] }
 0x183   :  { %2482 = vst.msk [vmem:[%s4238_s3 + $0x74] sm:$0xf] %vm2452_vm4, %v2792_v43  ;;  %vm2132_vm5 = vcmp.gt.f32.partialorder %v2082_v25, 0.0  ;;  %v2182_v28 = vmul.f32 0.01, %v2082_v25  ;;  %v2026_v17 = vmax.f32 %v1926_v57, %v1976_v27  ;;  %v1931_v5 = vmax.f32 %v4307_v16, %v3014_v58  ;;  %v1432_v0 = vpop.f32.mrf.mxu0  ;;  %v1832_v18 = vpop.f32.mrf.mxu1  ;;  %v4316_v57 = vld [vmem:[#allocation35_spill] sm:$0xff] }
 0x184   :  { %2480 = vst.msk [vmem:[%s4238_s3 + $0x6c] sm:$0xf] %vm2452_vm4, %v2790_v56  ;;  %v2234_v29 = vsel %vm2134_vm3, %v2084_v2, %v2184_v63  ;;  %v2085_v40 = vadd.f32 %v3878_v37, %v2028_v7  ;;  %v1981_v47 = vmax.f32 %v4308_v6, %v3114_v50  ;;  %v1929_v45 = vmax.f32 %v4309_v34, %v1432_v0  ;;  %v4318_v50 = vld [vmem:[#allocation25_spill] sm:$0xff] }
 0x185   :  { %v2795_v31 = vpack.c.bf16 %v2234_v29, %v2234_v29  ;;  %v2232_v8 = vsel %vm2132_vm5, %v2082_v25, %v2182_v28  ;;  %v2083_v33 = vadd.f32 %v3878_v37, %v2026_v17  ;;  %v1979_v19 = vmax.f32 %v4310_v61, %v1832_v18  ;;  %v3015_v62 = vpop.f32.mrf.mxu0  ;;  %v3115_v32 = vpop.f32.mrf.mxu1  ;;  %v4319_v18 = vld [vmem:[#allocation38_spill] sm:$0xff] }
 0x186   :  { %v2793_v21 = vpack.c.bf16 %v2232_v8, %v2232_v8  ;;  %vm2135_vm6 = vcmp.gt.f32.partialorder %v2085_v40, 0.0  ;;  %v2185_v41 = vmul.f32 0.01, %v2085_v40  ;;  %v2031_v53 = vmax.f32 %v1931_v5, %v1981_v47  ;;  %v4321_v8 = vld [vmem:[#allocation28_spill] sm:$0xff] }
 0x187   :  { %2485 = vst.msk [vmem:[%s4238_s3 + $0x80] sm:$0xf] %vm2452_vm4, %v2795_v31  ;;  %vm2133_vm7 = vcmp.gt.f32.partialorder %v2083_v33, 0.0  ;;  %v2183_v51 = vmul.f32 0.01, %v2083_v33  ;;  %v2029_v22 = vmax.f32 %v1929_v45, %v1979_v19  ;;  %v1932_v20 = vmax.f32 %v4311_v59, %v3015_v62  ;;  %v1435_v9 = vpop.f32.mrf.mxu0  ;;  %v1835_v44 = vpop.f32.mrf.mxu1  ;;  %v4320_v45 = vld [vmem:[#allocation39_spill] sm:$0xff] }
 0x188   :  { %2483 = vst.msk [vmem:[%s4238_s3 + $0x78] sm:$0xf] %vm2452_vm4, %v2793_v21  ;;  %v2235_v54 = vsel %vm2135_vm6, %v2085_v40, %v2185_v41  ;;  %v2088_v46 = vadd.f32 %v3878_v37, %v2031_v53  ;;  %v1982_v60 = vmax.f32 %v4312_v10, %v3115_v32  ;;  %v1930_v11 = vmax.f32 %v4313_v35, %v1435_v9  ;;  %v4322_v32 = vld [vmem:[#allocation29_spill] sm:$0xff] }
 0x189   :  { %v2796_v3 = vpack.c.bf16 %v2235_v54, %v2235_v54  ;;  %v2233_v30 = vsel %vm2133_vm7, %v2083_v33, %v2183_v51  ;;  %v2086_v48 = vadd.f32 %v3878_v37, %v2029_v22  ;;  %v1980_v36 = vmax.f32 %v4314_v38, %v1835_v44  ;;  %v3018_v23 = vpop.f32.mrf.mxu0  ;;  %v3118_v52 = vpop.f32.mrf.mxu1  ;;  %v4323_v44 = vld [vmem:[#allocation42_spill] sm:$0xff] }
 0x18a   :  { %v2794_v12 = vpack.c.bf16 %v2233_v30, %v2233_v30  ;;  %vm2138_vm8 = vcmp.gt.f32.partialorder %v2088_v46, 0.0  ;;  %v2188_v1 = vmul.f32 0.01, %v2088_v46  ;;  %v2032_v42 = vmax.f32 %v1932_v20, %v1982_v60  ;;  %v4325_v30 = vld [vmem:[#allocation32_spill] sm:$0xff] }
 0x18b   :  { %2486 = vst.msk [vmem:[%s4238_s3 + $0x84] sm:$0xf] %vm2452_vm4, %v2796_v3  ;;  %vm2136_vm9 = vcmp.gt.f32.partialorder %v2086_v48, 0.0  ;;  %v2186_v49 = vmul.f32 0.01, %v2086_v48  ;;  %v2030_v24 = vmax.f32 %v1930_v11, %v1980_v36  ;;  %v1935_v39 = vmax.f32 %v4315_v13, %v3018_v23  ;;  %v1448_v2 = vpop.f32.mrf.mxu0  ;;  %v1848_v26 = vpop.f32.mrf.mxu1  ;;  %v4324_v11 = vld [vmem:[#allocation43_spill] sm:$0xff] }
 0x18c   :  { %2484 = vst.msk [vmem:[%s4238_s3 + $0x7c] sm:$0xf] %vm2452_vm4, %v2794_v12  ;;  %v2238_v14 = vsel %vm2138_vm8, %v2088_v46, %v2188_v1  ;;  %v2089_v4 = vadd.f32 %v3878_v37, %v2032_v42  ;;  %v1985_v43 = vmax.f32 %v4316_v57, %v3118_v52  ;;  %v1933_v25 = vmax.f32 %v4317_v55, %v1448_v2  ;;  %v4326_v52 = vld [vmem:[#allocation33_spill] sm:$0xff] }
 0x18d   :  { %v2799_v15 = vpack.c.bf16 %v2238_v14, %v2238_v14  ;;  %v2236_v27 = vsel %vm2136_vm9, %v2086_v48, %v2186_v49  ;;  %v2087_v58 = vadd.f32 %v3878_v37, %v2030_v24  ;;  %v1983_v56 = vmax.f32 %v4318_v50, %v1848_v26  ;;  %v3019_v63 = vpop.f32.mrf.mxu0  ;;  %v3119_v7 = vpop.f32.mrf.mxu1  ;;  %v4327_v26 = vld [vmem:[#allocation46_spill] sm:$0xff] }
 0x18e   :  { %v2797_v28 = vpack.c.bf16 %v2236_v27, %v2236_v27  ;;  %vm2139_vm10 = vcmp.gt.f32.partialorder %v2089_v4, 0.0  ;;  %v2189_v17 = vmul.f32 0.01, %v2089_v4  ;;  %v2035_v16 = vmax.f32 %v1935_v39, %v1985_v43  ;;  %v4329_v27 = vld [vmem:[#allocation36_spill] sm:$0xff] }
 0x18f   :  { %2489 = vst.msk [vmem:[%s4238_s3 + $0x90] sm:$0xf] %vm2452_vm4, %v2799_v15  ;;  %vm2137_vm11 = vcmp.gt.f32.partialorder %v2087_v58, 0.0  ;;  %v2187_v5 = vmul.f32 0.01, %v2087_v58  ;;  %v2033_v0 = vmax.f32 %v1933_v25, %v1983_v56  ;;  %v1936_v29 = vmax.f32 %v4319_v18, %v3019_v63  ;;  %v1451_v40 = vpop.f32.mrf.mxu0  ;;  %v1851_v6 = vpop.f32.mrf.mxu1  ;;  %v4328_v25 = vld [vmem:[#allocation47_spill] sm:$0xff] }
 0x190   :  { %2487 = vst.msk [vmem:[%s4238_s3 + $0x88] sm:$0xf] %vm2452_vm4, %v2797_v28  ;;  %v2239_v47 = vsel %vm2139_vm10, %v2089_v4, %v2189_v17  ;;  %v2092_v34 = vadd.f32 %v3878_v37, %v2035_v16  ;;  %v1986_v31 = vmax.f32 %v4320_v45, %v3119_v7  ;;  %v1934_v33 = vmax.f32 %v4321_v8, %v1451_v40  ;;  %v4330_v7 = vld [vmem:[#allocation37_spill] sm:$0xff] }
 0x191   :  { %v2800_v61 = vpack.c.bf16 %v2239_v47, %v2239_v47  ;;  %v2237_v19 = vsel %vm2137_vm11, %v2087_v58, %v2187_v5  ;;  %v2090_v62 = vadd.f32 %v3878_v37, %v2033_v0  ;;  %v1984_v21 = vmax.f32 %v4322_v32, %v1851_v6  ;;  %v3022_v41 = vpop.f32.mrf.mxu0  ;;  %v3122_v53 = vpop.f32.mrf.mxu1  ;;  %v4331_v6 = vld [vmem:[#allocation48_spill] sm:$0xff] }
 0x192   :  { %v2798_v51 = vpack.c.bf16 %v2237_v19, %v2237_v19  ;;  %vm2142_vm12 = vcmp.gt.f32.partialorder %v2092_v34, 0.0  ;;  %v2192_v22 = vmul.f32 0.01, %v2092_v34  ;;  %v2036_v59 = vmax.f32 %v1936_v29, %v1986_v31  ;;  %v4333_v19 = vld [vmem:[#allocation40_spill] sm:$0xff] }
 0x193   :  { %2490 = vst.msk [vmem:[%s4238_s3 + $0x94] sm:$0xf] %vm2452_vm4, %v2800_v61  ;;  %vm2140_vm13 = vcmp.gt.f32.partialorder %v2090_v62, 0.0  ;;  %v2190_v20 = vmul.f32 0.01, %v2090_v62  ;;  %v2034_v9 = vmax.f32 %v1934_v33, %v1984_v21  ;;  %v1939_v54 = vmax.f32 %v4323_v44, %v3022_v41  ;;  %v1464_v46 = vpop.f32.mrf.mxu0  ;;  %v1864_v10 = vpop.f32.mrf.mxu1  ;;  %v4332_v33 = vld [vmem:[#allocation49_spill] sm:$0xff] }
 0x194   :  { %2488 = vst.msk [vmem:[%s4238_s3 + $0x8c] sm:$0xf] %vm2452_vm4, %v2798_v51  ;;  %v2242_v60 = vsel %vm2142_vm12, %v2092_v34, %v2192_v22  ;;  %v2093_v35 = vadd.f32 %v3878_v37, %v2036_v59  ;;  %v1989_v3 = vmax.f32 %v4324_v11, %v3122_v53  ;;  %v1937_v48 = vmax.f32 %v4325_v30, %v1464_v46  ;;  %v4334_v53 = vld [vmem:[#allocation41_spill] sm:$0xff] }
 0x195   :  { %v2803_v38 = vpack.c.bf16 %v2242_v60, %v2242_v60  ;;  %v2240_v36 = vsel %vm2140_vm13, %v2090_v62, %v2190_v20  ;;  %v2091_v23 = vadd.f32 %v3878_v37, %v2034_v9  ;;  %v1987_v12 = vmax.f32 %v4326_v52, %v1864_v10  ;;  %v3023_v1 = vpop.f32.mrf.mxu0  ;;  %v3123_v42 = vpop.f32.mrf.mxu1  ;;  %v4335_v10 = vld [vmem:[#allocation50_spill] sm:$0xff] }
 0x196   :  { %v2801_v49 = vpack.c.bf16 %v2240_v36, %v2240_v36  ;;  %vm2143_vm14 = vcmp.gt.f32.partialorder %v2093_v35, 0.0  ;;  %v2193_v24 = vmul.f32 0.01, %v2093_v35  ;;  %v2039_v13 = vmax.f32 %v1939_v54, %v1989_v3  ;;  %v3244_v3 = vld [vmem:[%s4237_s2] ss:$0 sm:$0xff]  ;;  %v4337_v36 = vld [vmem:[#allocation44_spill] sm:$0xff] }
 0x197   :  { %2493 = vst.msk [vmem:[%s4238_s3 + $0xa0] sm:$0xf] %vm2452_vm4, %v2803_v38  ;;  %vm2141_vm15 = vcmp.gt.f32.partialorder %v2091_v23, 0.0  ;;  %v2191_v39 = vmul.f32 0.01, %v2091_v23  ;;  %v2037_v2 = vmax.f32 %v1937_v48, %v1987_v12  ;;  %v1940_v14 = vmax.f32 %v4327_v26, %v3023_v1  ;;  %v1467_v4 = vpop.f32.mrf.mxu0  ;;  %v1867_v57 = vpop.f32.mrf.mxu1  ;;  %v4336_v48 = vld [vmem:[#allocation51_spill] sm:$0xff] }
 0x198   :  { %2491 = vst.msk [vmem:[%s4238_s3 + $0x98] sm:$0xf] %vm2452_vm4, %v2801_v49  ;;  %v2243_v43 = vsel %vm2143_vm14, %v2093_v35, %v2193_v24  ;;  %v2096_v55 = vadd.f32 %v3878_v37, %v2039_v13  ;;  %v1990_v15 = vmax.f32 %v4328_v25, %v3123_v42  ;;  %v1938_v58 = vmax.f32 %v4329_v27, %v1467_v4  ;;  %v4338_v42 = vld [vmem:[#allocation45_spill] sm:$0xff] }
 0x199   :  { %v2804_v50 = vpack.c.bf16 %v2243_v43, %v2243_v43  ;;  %v2241_v56 = vsel %vm2141_vm15, %v2091_v23, %v2191_v39  ;;  %v2094_v63 = vadd.f32 %v3878_v37, %v2037_v2  ;;  %v1988_v28 = vmax.f32 %v4330_v7, %v1867_v57  ;;  %v3026_v17 = vpop.f32.mrf.mxu0  ;;  %v3126_v16 = vpop.f32.mrf.mxu1 }
 0x19a   :  { %v2802_v5 = vpack.c.bf16 %v2241_v56, %v2241_v56  ;;  %vm2146_vm0 = vcmp.gt.f32.partialorder %v2096_v55, 0.0  ;;  %v2196_v0 = vmul.f32 0.01, %v2096_v55  ;;  %v2040_v18 = vmax.f32 %v1940_v14, %v1990_v15 }
 0x19b   :  { %2494 = vst.msk [vmem:[%s4238_s3 + $0xa4] sm:$0xf] %vm2452_vm4, %v2804_v50  ;;  %vm2144_vm1 = vcmp.gt.f32.partialorder %v2094_v63, 0.0  ;;  %v2194_v29 = vmul.f32 0.01, %v2094_v63  ;;  %v2038_v40 = vmax.f32 %v1938_v58, %v1988_v28  ;;  %v1943_v47 = vmax.f32 %v4331_v6, %v3026_v17  ;;  %v1480_v34 = vpop.f32.mrf.mxu0  ;;  %v1880_v45 = vpop.f32.mrf.mxu1 }
 0x19c   :  { %2492 = vst.msk [vmem:[%s4238_s3 + $0x9c] sm:$0xf] %vm2452_vm4, %v2802_v5  ;;  %v2246_v31 = vsel %vm2146_vm0, %v2096_v55, %v2196_v0  ;;  %v2097_v8 = vadd.f32 %v3878_v37, %v2040_v18  ;;  %v1993_v61 = vmax.f32 %v4332_v33, %v3126_v16  ;;  %v1941_v62 = vmax.f32 %v4333_v19, %v1480_v34 }
 0x19d   :  { %v2807_v32 = vpack.c.bf16 %v2246_v31, %v2246_v31  ;;  %v2244_v21 = vsel %vm2144_vm1, %v2094_v63, %v2194_v29  ;;  %v2095_v41 = vadd.f32 %v3878_v37, %v2038_v40  ;;  %v1991_v51 = vmax.f32 %v4334_v53, %v1880_v45  ;;  %v3027_v22 = vpop.f32.mrf.mxu0  ;;  %v3127_v59 = vpop.f32.mrf.mxu1 }
 0x19e   :  { %v2805_v20 = vpack.c.bf16 %v2244_v21, %v2244_v21  ;;  %vm2147_vm2 = vcmp.gt.f32.partialorder %v2097_v8, 0.0  ;;  %v2197_v9 = vmul.f32 0.01, %v2097_v8  ;;  %v2043_v44 = vmax.f32 %v1943_v47, %v1993_v61 }
 0x19f   :  { %2497 = vst.msk [vmem:[%s4238_s3 + $0xb0] sm:$0xf] %vm2452_vm4, %v2807_v32  ;;  %vm2145_vm3 = vcmp.gt.f32.partialorder %v2095_v41, 0.0  ;;  %v2195_v54 = vmul.f32 0.01, %v2095_v41  ;;  %v2041_v46 = vmax.f32 %v1941_v62, %v1991_v51  ;;  %v1944_v60 = vmax.f32 %v4335_v10, %v3027_v22  ;;  %v1483_v35 = vpop.f32.mrf.mxu0  ;;  %v1883_v37 = vpop.f32.mrf.mxu1 }
 0x1a0   :  { %2495 = vst.msk [vmem:[%s4238_s3 + $0xa8] sm:$0xf] %vm2452_vm4, %v2805_v20  ;;  %v2247_v11 = vsel %vm2147_vm2, %v2097_v8, %v2197_v9  ;;  %v2100_v30 = vadd.f32 %v3244_v3, %v2043_v44  ;;  %v1994_v38 = vmax.f32 %v4336_v48, %v3127_v59  ;;  %v1942_v23 = vmax.f32 %v4337_v36, %v1483_v35 }
 0x1a1   :  { %v2808_v52 = vpack.c.bf16 %v2247_v11, %v2247_v11  ;;  %v2245_v12 = vsel %vm2145_vm3, %v2095_v41, %v2195_v54  ;;  %v2098_v1 = vadd.f32 %v3244_v3, %v2041_v46  ;;  %v1992_v49 = vmax.f32 %v4338_v42, %v1883_v37 }
 0x1a2   :  { %v2806_v24 = vpack.c.bf16 %v2245_v12, %v2245_v12  ;;  %vm2150_vm5 = vcmp.gt.f32.partialorder %v2100_v30, 0.0  ;;  %v2200_v13 = vmul.f32 0.01, %v2100_v30  ;;  %v2044_v39 = vmax.f32 %v1944_v60, %v1994_v38 }
 0x1a3   :  { %2498 = vst.msk [vmem:[%s4238_s3 + $0xb4] sm:$0xf] %vm2452_vm4, %v2808_v52  ;;  %vm2148_vm6 = vcmp.gt.f32.partialorder %v2098_v1, 0.0  ;;  %v2198_v2 = vmul.f32 0.01, %v2098_v1  ;;  %v2042_v26 = vmax.f32 %v1942_v23, %v1992_v49 }
 0x1a4   :  { %2496 = vst.msk [vmem:[%s4238_s3 + $0xac] sm:$0xf] %vm2452_vm4, %v2806_v24  ;;  %v2250_v14 = vsel %vm2150_vm5, %v2100_v30, %v2200_v13  ;;  %v2101_v4 = vadd.f32 %v3244_v3, %v2044_v39 }
 0x1a5   :  { %v2811_v57 = vpack.c.bf16 %v2250_v14, %v2250_v14  ;;  %v2248_v43 = vsel %vm2148_vm6, %v2098_v1, %v2198_v2  ;;  %v2099_v55 = vadd.f32 %v3244_v3, %v2042_v26 }
 0x1a6   :  { %v2809_v25 = vpack.c.bf16 %v2248_v43, %v2248_v43  ;;  %vm2151_vm7 = vcmp.gt.f32.partialorder %v2101_v4, 0.0  ;;  %v2201_v15 = vmul.f32 0.01, %v2101_v4 }
 0x1a7   :  { %2501 = vst.msk [vmem:[%s4238_s3 + $0xc0] sm:$0xf] %vm2452_vm4, %v2811_v57  ;;  %vm2149_vm8 = vcmp.gt.f32.partialorder %v2099_v55, 0.0  ;;  %v2199_v27 = vmul.f32 0.01, %v2099_v55 }
 0x1a8   :  { %2499 = vst.msk [vmem:[%s4238_s3 + $0xb8] sm:$0xf] %vm2452_vm4, %v2809_v25  ;;  %v2251_v58 = vsel %vm2151_vm7, %v2101_v4, %v2201_v15 }
 0x1a9   :  { %v2812_v50 = vpack.c.bf16 %v2251_v58, %v2251_v58  ;;  %v2249_v56 = vsel %vm2149_vm8, %v2099_v55, %v2199_v27 }
 0x1aa   :  { %v2810_v63 = vpack.c.bf16 %v2249_v56, %v2249_v56 }
 0x1ab   :  { %2502 = vst.msk [vmem:[%s4238_s3 + $0xc4] sm:$0xf] %vm2452_vm4, %v2812_v50 }
 0x1ac   :  { %2500 = vst.msk [vmem:[%s4238_s3 + $0xbc] sm:$0xf] %vm2452_vm4, %v2810_v63 }

// kernel: cifar_cnn_forward.5
= control target key start
LH: loop header
LB: loop body
LE: loop exit
PB: predicated region body
PF: predicated region fallthrough
CT: control target
= control target key end

     0   :  { %v1546_v0 = vmov 0   ;;  %vm675_vm0 = vcmask 130048   ;;  %vm1239_vm2 = vcmask 257024   ;;  %s2135_s1 = inlined_call_operand.vmem [shape: bf16[400,32], index: 1, kind: input, shape index: {}]   ;;  %s2136_s0 = inlined_call_operand.vmem [shape: bf16[4,80,400], index: 0, kind: input, shape index: {}]   ;;  %s2137_s2 = inlined_call_operand.vmem [shape: f32[1,32], index: 2, kind: input, shape index: {}]   ;;  %s2138_s3 = inlined_call_operand.vmem [shape: bf16[80,32], index: 3, kind: output, shape index: {}]  }
   0x1   :  { %736 = vmatprep.subr.bf16.mxu0 %v1546_v0  ;;  %v1401_v1 = vld [vmem:[%s2135_s1 + $0x38] sm:$0xff]   ;;  %929 = vmatprep.subr.bf16.mxu1 %v1546_v0  ;;  %v1402_v2 = vld [vmem:[%s2135_s1 + $0x30] sm:$0xff]   ;;  %v1403_v3 = vld [vmem:[%s2135_s1 + $0x28] sm:$0xff]  }
   0x2   :  { %737 = vmatpush1.bf16.msra.mxu0 %v1401_v1  ;;  %v1407_v4 = vld [vmem:[%s2135_s1 + $0xb8] sm:$0xff]   ;;  %v1409_v5 = vld [vmem:[%s2135_s1 + $0xb0] sm:$0xff]   ;;  %v1404_v6 = vld [vmem:[%s2135_s1 + $0x20] sm:$0xff]  }
   0x3   :  { %738 = vmatprep.subr.bf16.mxu0 %v1546_v0  ;;  %930 = vmatpush1.bf16.msra.mxu1 %v1407_v4  ;;  %v1411_v7 = vld [vmem:[%s2135_s1 + $0xa8] sm:$0xff]   ;;  %v1405_v8 = vld [vmem:[%s2135_s1 + $0x18] sm:$0xff]   ;;  %v1413_v9 = vld [vmem:[%s2135_s1 + $0xa0] sm:$0xff]  }
   0x4   :  { %931 = vmatprep.subr.bf16.mxu1 %v1546_v0  ;;  %v1406_v10 = vld [vmem:[%s2135_s1 + $0x10] sm:$0xff]   ;;  %v1415_v11 = vld [vmem:[%s2135_s1 + $0x98] sm:$0xff]   ;;  %v1408_v12 = vld [vmem:[%s2135_s1 + $0x8] sm:$0xff]  }
   0x5   :  { %v1417_v13 = vld [vmem:[%s2135_s1 + $0x90] sm:$0xff]   ;;  %v1427_v14 = vld [vmem:[%s2136_s0 + $0xc] ss:$16 sps:$4 sm:$0xff]   ;;  %v1410_v15 = vld [vmem:[%s2135_s1] sm:$0xff]  }
   0x6   :  { %739 = vmatpush1.bf16.msra.mxu0 %v1402_v2  ;;  %1359 = vmatprep.mubr.msk.bf16.mxu1 %vm675_vm0, %v1427_v14  ;;  %v1431_v16 = vld [vmem:[%s2136_s0 + $0x4] ss:$16 sps:$4 sm:$0xff]   ;;  %v1419_v17 = vld [vmem:[%s2135_s1 + $0x88] sm:$0xff]   ;;  %v1412_v18 = vld [vmem:[%s2135_s1 + $0x78] sm:$0xff]  }
   0x7   :  { %740 = vmatprep.subr.bf16.mxu0 %v1546_v0  ;;  %932 = vmatpush1.bf16.msra.mxu1 %v1409_v5  ;;  %v1421_v19 = vld [vmem:[%s2135_s1 + $0x80] sm:$0xff]   ;;  %v1414_v20 = vld [vmem:[%s2135_s1 + $0x70] sm:$0xff]   ;;  %v1416_v22 = vld [vmem:[%s2135_s1 + $0x68] sm:$0xff]  }
   0x8   :  { %933 = vmatprep.subr.bf16.mxu1 %v1546_v0  ;;  %768 = vmatprep.mubr.bf16.mxu0 %v1431_v16  ;;  %v1423_v21 = vld [vmem:[%s2135_s1 + $0xc0] sm:$0xff]   ;;  %v1425_v23 = vld [vmem:[%s2136_s0 + $0x8] ss:$16 sps:$4 sm:$0xff]   ;;  %v1432_v24 = vld [vmem:[%s2136_s0 + $0x2c] ss:$16 sps:$4 sm:$0xff]  }
   0x9   :  { %v1418_v25 = vld [vmem:[%s2135_s1 + $0x60] sm:$0xff]   ;;  %v1420_v26 = vld [vmem:[%s2135_s1 + $0x58] sm:$0xff]   ;;  %v1422_v29 = vld [vmem:[%s2135_s1 + $0x50] sm:$0xff]  }
   0xa   :  { %741 = vmatpush1.bf16.msra.mxu0 %v1403_v3  ;;  %v1434_v27 = vld [vmem:[%s2136_s0 + $0x28] ss:$16 sps:$4 sm:$0xff]   ;;  %v1438_v28 = vld [vmem:[%s2136_s0 + $0x4c] ss:$16 sps:$4 sm:$0xff]   ;;  %v1428_v33 = vld [vmem:[%s2135_s1 + $0x40] sm:$0xff]  }
   0xb   :  { %742 = vmatprep.subr.bf16.mxu0 %v1546_v0  ;;  %934 = vmatpush1.bf16.msra.mxu1 %v1411_v7  ;;  %v1424_v30 = vld [vmem:[%s2135_s1 + $0x48] sm:$0xff]   ;;  %v1429_v34 = vld [vmem:[%s2136_s0] ss:$16 sps:$4 sm:$0xff]   ;;  %v1435_v35 = vld [vmem:[%s2136_s0 + $0x24] ss:$16 sps:$4 sm:$0xff]  }
   0xc   :  { %935 = vmatprep.subr.bf16.mxu1 %v1546_v0  ;;  %v1440_v31 = vld [vmem:[%s2136_s0 + $0x48] ss:$16 sps:$4 sm:$0xff]   ;;  %v1444_v32 = vld [vmem:[%s2136_s0 + $0x6c] ss:$16 sps:$4 sm:$0xff]   ;;  %v1437_v38 = vld [vmem:[%s2136_s0 + $0x20] ss:$16 sps:$4 sm:$0xff]  }
   0xd   :  { %v1446_v36 = vld [vmem:[%s2136_s0 + $0x68] ss:$16 sps:$4 sm:$0xff]   ;;  %v1450_v37 = vld [vmem:[%s2136_s0 + $0x8c] ss:$16 sps:$4 sm:$0xff]   ;;  %v1441_v39 = vld [vmem:[%s2136_s0 + $0x44] ss:$16 sps:$4 sm:$0xff]  }
   0xe   :  { %743 = vmatpush1.bf16.msra.mxu0 %v1404_v6  ;;  %v1452_v40 = vld [vmem:[%s2136_s0 + $0x88] ss:$16 sps:$4 sm:$0xff]   ;;  %v1456_v41 = vld [vmem:[%s2136_s0 + $0xac] ss:$16 sps:$4 sm:$0xff]   ;;  %v1443_v42 = vld [vmem:[%s2136_s0 + $0x40] ss:$16 sps:$4 sm:$0xff]  }
   0xf   :  { %744 = vmatprep.subr.bf16.mxu0 %v1546_v0  ;;  %936 = vmatpush1.bf16.msra.mxu1 %v1413_v9  ;;  %v1447_v43 = vld [vmem:[%s2136_s0 + $0x64] ss:$16 sps:$4 sm:$0xff]   ;;  %v1458_v44 = vld [vmem:[%s2136_s0 + $0xa8] ss:$16 sps:$4 sm:$0xff]   ;;  %v1462_v45 = vld [vmem:[%s2136_s0 + $0xcc] ss:$16 sps:$4 sm:$0xff]  }
  0x10   :  { %937 = vmatprep.subr.bf16.mxu1 %v1546_v0  ;;  %v1449_v46 = vld [vmem:[%s2136_s0 + $0x60] ss:$16 sps:$4 sm:$0xff]   ;;  %v1453_v47 = vld [vmem:[%s2136_s0 + $0x84] ss:$16 sps:$4 sm:$0xff]   ;;  %v1464_v48 = vld [vmem:[%s2136_s0 + $0xc8] ss:$16 sps:$4 sm:$0xff]  }
  0x11   :  { %v1468_v49 = vld [vmem:[%s2136_s0 + $0xec] ss:$16 sps:$4 sm:$0xff]   ;;  %v1455_v50 = vld [vmem:[%s2136_s0 + $0x80] ss:$16 sps:$4 sm:$0xff]   ;;  %v1459_v51 = vld [vmem:[%s2136_s0 + $0xa4] ss:$16 sps:$4 sm:$0xff]  }
  0x12   :  { %745 = vmatpush1.bf16.msra.mxu0 %v1405_v8  ;;  %v1470_v52 = vld [vmem:[%s2136_s0 + $0xe8] ss:$16 sps:$4 sm:$0xff]   ;;  %v1474_v53 = vld [vmem:[%s2136_s0 + $0x10c] ss:$16 sps:$4 sm:$0xff]   ;;  %v1461_v54 = vld [vmem:[%s2136_s0 + $0xa0] ss:$16 sps:$4 sm:$0xff]  }
  0x13   :  { %746 = vmatprep.subr.bf16.mxu0 %v1546_v0  ;;  %938 = vmatpush1.bf16.msra.mxu1 %v1415_v11  ;;  %v1465_v55 = vld [vmem:[%s2136_s0 + $0xc4] ss:$16 sps:$4 sm:$0xff]   ;;  %v1476_v56 = vld [vmem:[%s2136_s0 + $0x108] ss:$16 sps:$4 sm:$0xff]   ;;  %v1480_v57 = vld [vmem:[%s2136_s0 + $0x12c] ss:$16 sps:$4 sm:$0xff]  }
  0x14   :  { %939 = vmatprep.subr.bf16.mxu1 %v1546_v0  ;;  %v1467_v58 = vld [vmem:[%s2136_s0 + $0xc0] ss:$16 sps:$4 sm:$0xff]   ;;  %v1471_v59 = vld [vmem:[%s2136_s0 + $0xe4] ss:$16 sps:$4 sm:$0xff]   ;;  %v1482_v60 = vld [vmem:[%s2136_s0 + $0x128] ss:$16 sps:$4 sm:$0xff]  }
  0x15   :  { %v1486_v61 = vld [vmem:[%s2136_s0 + $0x14c] ss:$16 sps:$4 sm:$0xff]   ;;  %v1473_v62 = vld [vmem:[%s2136_s0 + $0xe0] ss:$16 sps:$4 sm:$0xff]   ;;  %v1477_v63 = vld [vmem:[%s2136_s0 + $0x104] ss:$16 sps:$4 sm:$0xff]  }
  0x16   :  { %747 = vmatpush1.bf16.msra.mxu0 %v1406_v10  ;;  %v1492_v1 = vld [vmem:[%s2136_s0 + $0x16c] ss:$16 sps:$4 sm:$0xff]   ;;  %v1479_v2 = vld [vmem:[%s2136_s0 + $0x100] ss:$16 sps:$4 sm:$0xff]   ;;  %v1483_v3 = vld [vmem:[%s2136_s0 + $0x124] ss:$16 sps:$4 sm:$0xff]  }
  0x17   :  { %748 = vmatprep.subr.bf16.mxu0 %v1546_v0  ;;  %940 = vmatpush1.bf16.msra.mxu1 %v1417_v13  ;;  %v1494_v4 = vld [vmem:[%s2136_s0 + $0x168] ss:$16 sps:$4 sm:$0xff]   ;;  %v1498_v5 = vld [vmem:[%s2136_s0 + $0x18c] ss:$16 sps:$4 sm:$0xff]   ;;  %v1485_v6 = vld [vmem:[%s2136_s0 + $0x120] ss:$16 sps:$4 sm:$0xff]  }
  0x18   :  { %941 = vmatprep.subr.bf16.mxu1 %v1546_v0  ;;  %v1489_v7 = vld [vmem:[%s2136_s0 + $0x144] ss:$16 sps:$4 sm:$0xff]   ;;  %v1500_v8 = vld [vmem:[%s2136_s0 + $0x188] ss:$16 sps:$4 sm:$0xff]   ;;  %v1504_v9 = vld [vmem:[%s2136_s0 + $0x1ac] ss:$16 sps:$4 sm:$0xff]  }
  0x19   :  { %v1491_v10 = vld [vmem:[%s2136_s0 + $0x140] ss:$16 sps:$4 sm:$0xff]   ;;  %v1495_v11 = vld [vmem:[%s2136_s0 + $0x164] ss:$16 sps:$4 sm:$0xff]   ;;  %v1510_v13 = vld [vmem:[%s2136_s0 + $0x1cc] ss:$16 sps:$4 sm:$0xff]  }
  0x1a   :  { %749 = vmatpush1.bf16.msra.mxu0 %v1408_v12  ;;  %v1506_v12 = vld [vmem:[%s2136_s0 + $0x1a8] ss:$16 sps:$4 sm:$0xff]   ;;  %v1497_v14 = vld [vmem:[%s2136_s0 + $0x160] ss:$16 sps:$4 sm:$0xff]  }
  0x1b   :  { %750 = vmatprep.subr.bf16.mxu0 %v1546_v0  ;;  %942 = vmatpush1.bf16.msra.mxu1 %v1419_v17  ;;  %v1512_v16 = vld [vmem:[%s2136_s0 + $0x1c8] ss:$16 sps:$4 sm:$0xff]   ;;  %v1516_v17 = vld [vmem:[%s2136_s0 + $0x1ec] ss:$16 sps:$4 sm:$0xff]  }
  0x1c   :  { %943 = vmatprep.subr.bf16.mxu1 %v1546_v0 }
  0x1e   :  { %751 = vmatpush1.bf16.msra.mxu0 %v1410_v15  ;;  %v1501_v15 = vld [vmem:[%s2136_s0 + $0x184] ss:$16 sps:$4 sm:$0xff]  }
  0x1f   :  { %752 = vmatprep.subr.bf16.mxu0 %v1546_v0  ;;  %944 = vmatpush1.bf16.msra.mxu1 %v1421_v19  ;;  %v1507_v19 = vld [vmem:[%s2136_s0 + $0x1a4] ss:$16 sps:$4 sm:$0xff]  }
  0x20   :  { %959 = vmatprep.subr.bf16.mxu1 %v1546_v0 }
  0x22   :  { %753 = vmatpush2.bf16.msra.mxu0 %v1412_v18  ;;  %v1503_v18 = vld [vmem:[%s2136_s0 + $0x180] ss:$16 sps:$4 sm:$0xff]  }
  0x23   :  { %754 = vmatprep.subr.bf16.mxu0 %v1546_v0  ;;  %960 = vmatpush2.bf16.msra.mxu1 %v1423_v21  ;;  %v1522_v21 = vld [vmem:[%s2136_s0 + $0x20c] ss:$16 sps:$4 sm:$0xff]  }
  0x26   :  { %755 = vmatpush2.bf16.msra.mxu0 %v1414_v20  ;;  %962 = vmatmul.mubr.bf16.vlgmr.msra.gmra.mxu1 %v1425_v23  ;;  %v1518_v20 = vld [vmem:[%s2136_s0 + $0x1e8] ss:$16 sps:$4 sm:$0xff]   ;;  %v1513_v23 = vld [vmem:[%s2136_s0 + $0x1c4] ss:$16 sps:$4 sm:$0xff]  }
  0x27   :  { %756 = vmatprep.subr.bf16.mxu0 %v1546_v0  ;;  %1360 = vmatprep.mubr.msk.bf16.mxu1 %vm675_vm0, %v1432_v24  ;;  %v1524_v24 = vld [vmem:[%s2136_s0 + $0x208] ss:$16 sps:$4 sm:$0xff]  }
  0x2a   :  { %757 = vmatpush2.bf16.msra.mxu0 %v1416_v22  ;;  %v1509_v22 = vld [vmem:[%s2136_s0 + $0x1a0] ss:$16 sps:$4 sm:$0xff]  }
  0x2b   :  { %758 = vmatprep.subr.bf16.mxu0 %v1546_v0 }
  0x2e   :  { %759 = vmatpush2.bf16.msra.mxu0 %v1418_v25  ;;  %970 = vmatmul.mubr.bf16.gmra.mxu1 %v1434_v27  ;;  %v1528_v25 = vld [vmem:[%s2136_s0 + $0x22c] ss:$16 sps:$4 sm:$0xff]   ;;  %v1519_v27 = vld [vmem:[%s2136_s0 + $0x1e4] ss:$16 sps:$4 sm:$0xff]  }
  0x2f   :  { %760 = vmatprep.subr.bf16.mxu0 %v1546_v0  ;;  %1361 = vmatprep.mubr.msk.bf16.mxu1 %vm675_vm0, %v1438_v28  ;;  %v1530_v28 = vld [vmem:[%s2136_s0 + $0x228] ss:$16 sps:$4 sm:$0xff]  }
  0x32   :  { %761 = vmatpush2.bf16.msra.mxu0 %v1420_v26  ;;  %v1515_v26 = vld [vmem:[%s2136_s0 + $0x1c0] ss:$16 sps:$4 sm:$0xff]  }
  0x33   :  { %762 = vmatprep.subr.bf16.mxu0 %v1546_v0 }
  0x36   :  { %763 = vmatpush2.bf16.msra.mxu0 %v1422_v29  ;;  %978 = vmatmul.mubr.bf16.gmra.mxu1 %v1440_v31  ;;  %v1534_v29 = vld [vmem:[%s2136_s0 + $0x24c] ss:$16 sps:$4 sm:$0xff]   ;;  %v1525_v31 = vld [vmem:[%s2136_s0 + $0x204] ss:$16 sps:$4 sm:$0xff]  }
  0x37   :  { %764 = vmatprep.subr.bf16.mxu0 %v1546_v0  ;;  %1362 = vmatprep.mubr.msk.bf16.mxu1 %vm675_vm0, %v1444_v32  ;;  %v1536_v32 = vld [vmem:[%s2136_s0 + $0x248] ss:$16 sps:$4 sm:$0xff]  }
  0x3a   :  { %765 = vmatpush2.bf16.msra.mxu0 %v1424_v30  ;;  %v1521_v30 = vld [vmem:[%s2136_s0 + $0x1e0] ss:$16 sps:$4 sm:$0xff]  }
  0x3b   :  { %766 = vmatprep.subr.bf16.mxu0 %v1546_v0  ;;  %v1488_v0 = vld [vmem:[%s2136_s0 + $0x148] ss:$16 sps:$4 sm:$0xff]  }
  0x3e   :  { %767 = vmatpush2.bf16.msra.mxu0 %v1428_v33  ;;  %986 = vmatmul.mubr.bf16.gmra.mxu1 %v1446_v36  ;;  %v1540_v33 = vld [vmem:[%s2136_s0 + $0x26c] ss:$16 sps:$4 sm:$0xff]   ;;  %v1542_v36 = vld [vmem:[%s2136_s0 + $0x268] ss:$16 sps:$4 sm:$0xff]  }
  0x3f   :  { %1363 = vmatprep.mubr.msk.bf16.mxu1 %vm675_vm0, %v1450_v37  ;;  %v1533_v37 = vld [vmem:[%s2136_s0 + $0x220] ss:$16 sps:$4 sm:$0xff]  }
  0x41   :  { %769 = vmatmul.mubr.bf16.vlgmr.msra.gmra.mxu0 %v1429_v34  ;;  %v1527_v34 = vld [vmem:[%s2136_s0 + $0x200] ss:$16 sps:$4 sm:$0xff]  }
  0x42   :  { %776 = vmatprep.mubr.bf16.mxu0 %v1435_v35  ;;  %v1531_v35 = vld [vmem:[%s2136_s0 + $0x224] ss:$16 sps:$4 sm:$0xff]  }
  0x46   :  { %994 = vmatmul.mubr.bf16.gmra.mxu1 %v1452_v40  ;;  %v1543_v40 = vld [vmem:[%s2136_s0 + $0x264] ss:$16 sps:$4 sm:$0xff]  }
  0x47   :  { %1364 = vmatprep.mubr.msk.bf16.mxu1 %vm675_vm0, %v1456_v41  ;;  %v1545_v41 = vld [vmem:[%s2136_s0 + $0x260] ss:$16 sps:$4 sm:$0xff]  }
  0x49   :  { %777 = vmatmul.mubr.bf16.gmra.mxu0 %v1437_v38  ;;  %v1537_v38 = vld [vmem:[%s2136_s0 + $0x244] ss:$16 sps:$4 sm:$0xff]  }
  0x4a   :  { %784 = vmatprep.mubr.bf16.mxu0 %v1441_v39  ;;  %v1539_v39 = vld [vmem:[%s2136_s0 + $0x240] ss:$16 sps:$4 sm:$0xff]  }
  0x4e   :  { %1002 = vmatmul.mubr.bf16.gmra.mxu1 %v1458_v44 }
  0x4f   :  { %1365 = vmatprep.mubr.msk.bf16.mxu1 %vm675_vm0, %v1462_v45 }
  0x51   :  { %785 = vmatmul.mubr.bf16.gmra.mxu0 %v1443_v42 }
  0x52   :  { %792 = vmatprep.mubr.bf16.mxu0 %v1447_v43 }
  0x56   :  { %1010 = vmatmul.mubr.bf16.gmra.mxu1 %v1464_v48 }
  0x57   :  { %1366 = vmatprep.mubr.msk.bf16.mxu1 %vm675_vm0, %v1468_v49 }
  0x59   :  { %793 = vmatmul.mubr.bf16.gmra.mxu0 %v1449_v46 }
  0x5a   :  { %800 = vmatprep.mubr.bf16.mxu0 %v1453_v47 }
  0x5e   :  { %1018 = vmatmul.mubr.bf16.gmra.mxu1 %v1470_v52 }
  0x5f   :  { %1367 = vmatprep.mubr.msk.bf16.mxu1 %vm675_vm0, %v1474_v53 }
  0x61   :  { %801 = vmatmul.mubr.bf16.gmra.mxu0 %v1455_v50 }
  0x62   :  { %808 = vmatprep.mubr.bf16.mxu0 %v1459_v51 }
  0x66   :  { %1026 = vmatmul.mubr.bf16.gmra.mxu1 %v1476_v56 }
  0x67   :  { %1368 = vmatprep.mubr.msk.bf16.mxu1 %vm675_vm0, %v1480_v57 }
  0x69   :  { %809 = vmatmul.mubr.bf16.gmra.mxu0 %v1461_v54 }
  0x6a   :  { %816 = vmatprep.mubr.bf16.mxu0 %v1465_v55 }
  0x6e   :  { %1034 = vmatmul.mubr.bf16.gmra.mxu1 %v1482_v60 }
  0x6f   :  { %1369 = vmatprep.mubr.msk.bf16.mxu1 %vm675_vm0, %v1486_v61 }
  0x71   :  { %817 = vmatmul.mubr.bf16.gmra.mxu0 %v1467_v58 }
  0x72   :  { %824 = vmatprep.mubr.bf16.mxu0 %v1471_v59 }
  0x76   :  { %1042 = vmatmul.mubr.bf16.gmra.mxu1 %v1488_v0 }
  0x77   :  { %1370 = vmatprep.mubr.msk.bf16.mxu1 %vm675_vm0, %v1492_v1 }
  0x79   :  { %825 = vmatmul.mubr.bf16.gmra.mxu0 %v1473_v62 }
  0x7a   :  { %832 = vmatprep.mubr.bf16.mxu0 %v1477_v63 }
  0x7e   :  { %1050 = vmatmul.mubr.bf16.gmra.mxu1 %v1494_v4 }
  0x7f   :  { %1371 = vmatprep.mubr.msk.bf16.mxu1 %vm675_vm0, %v1498_v5 }
  0x81   :  { %833 = vmatmul.mubr.bf16.gmra.mxu0 %v1479_v2 }
  0x82   :  { %840 = vmatprep.mubr.bf16.mxu0 %v1483_v3 }
  0x86   :  { %1058 = vmatmul.mubr.bf16.gmra.mxu1 %v1500_v8 }
  0x87   :  { %1372 = vmatprep.mubr.msk.bf16.mxu1 %vm675_vm0, %v1504_v9 }
  0x89   :  { %841 = vmatmul.mubr.bf16.gmra.mxu0 %v1485_v6 }
  0x8a   :  { %848 = vmatprep.mubr.bf16.mxu0 %v1489_v7 }
  0x8e   :  { %1066 = vmatmul.mubr.bf16.gmra.mxu1 %v1506_v12 }
  0x8f   :  { %1373 = vmatprep.mubr.msk.bf16.mxu1 %vm675_vm0, %v1510_v13 }
  0x91   :  { %849 = vmatmul.mubr.bf16.gmra.mxu0 %v1491_v10 }
  0x92   :  { %856 = vmatprep.mubr.bf16.mxu0 %v1495_v11 }
  0x96   :  { %1074 = vmatmul.mubr.bf16.gmra.mxu1 %v1512_v16 }
  0x97   :  { %1374 = vmatprep.mubr.msk.bf16.mxu1 %vm675_vm0, %v1516_v17 }
  0x99   :  { %857 = vmatmul.mubr.bf16.gmra.mxu0 %v1497_v14 }
  0x9a   :  { %864 = vmatprep.mubr.bf16.mxu0 %v1501_v15 }
  0x9e   :  { %1082 = vmatmul.mubr.bf16.gmra.mxu1 %v1518_v20 }
  0x9f   :  { %1375 = vmatprep.mubr.msk.bf16.mxu1 %vm675_vm0, %v1522_v21 }
  0xa1   :  { %865 = vmatmul.mubr.bf16.gmra.mxu0 %v1503_v18 }
  0xa2   :  { %872 = vmatprep.mubr.bf16.mxu0 %v1507_v19 }
  0xa6   :  { %1090 = vmatmul.mubr.bf16.gmra.mxu1 %v1524_v24 }
  0xa7   :  { %1376 = vmatprep.mubr.msk.bf16.mxu1 %vm675_vm0, %v1528_v25 }
  0xa9   :  { %873 = vmatmul.mubr.bf16.gmra.mxu0 %v1509_v22 }
  0xaa   :  { %880 = vmatprep.mubr.bf16.mxu0 %v1513_v23 }
  0xae   :  { %1098 = vmatmul.mubr.bf16.gmra.mxu1 %v1530_v28 }
  0xaf   :  { %1377 = vmatprep.mubr.msk.bf16.mxu1 %vm675_vm0, %v1534_v29 }
  0xb1   :  { %881 = vmatmul.mubr.bf16.gmra.mxu0 %v1515_v26 }
  0xb2   :  { %888 = vmatprep.mubr.bf16.mxu0 %v1519_v27 }
  0xb6   :  { %1106 = vmatmul.mubr.bf16.gmra.mxu1 %v1536_v32 }
  0xb7   :  { %1378 = vmatprep.mubr.msk.bf16.mxu1 %vm675_vm0, %v1540_v33 }
  0xb9   :  { %889 = vmatmul.mubr.bf16.gmra.mxu0 %v1521_v30 }
  0xba   :  { %896 = vmatprep.mubr.bf16.mxu0 %v1525_v31 }
  0xbe   :  { %1114 = vmatmul.mubr.bf16.gmra.mxu1 %v1542_v36 }
  0xc1   :  { %897 = vmatmul.mubr.bf16.gmra.mxu0 %v1527_v34 }
  0xc2   :  { %904 = vmatprep.mubr.bf16.mxu0 %v1531_v35 }
  0xc9   :  { %905 = vmatmul.mubr.bf16.gmra.mxu0 %v1533_v37 }
  0xca   :  { %912 = vmatprep.mubr.bf16.mxu0 %v1537_v38 }
  0xd1   :  { %913 = vmatmul.mubr.bf16.gmra.mxu0 %v1539_v39 }
  0xd2   :  { %920 = vmatprep.mubr.bf16.mxu0 %v1543_v40 }
  0xd9   :  { %921 = vmatmul.mubr.bf16.gmra.mxu0 %v1545_v41 }
  0xe6   :  { %v963_v42 = vpop.f32.mrf.mxu1 }
  0xe8   :  { %v965_v43 = vpop.f32.mrf.mxu1 }
  0xea   :  { %v966_v44 = vpop.f32.mrf.mxu1 }
  0xec   :  { %v968_v45 = vpop.f32.mrf.mxu1 }
  0xee   :  { %v971_v46 = vpop.f32.mrf.mxu1 }
  0xf0   :  { %v973_v47 = vpop.f32.mrf.mxu1 }
  0xf2   :  { %v974_v48 = vpop.f32.mrf.mxu1 }
  0xf4   :  { %v976_v49 = vpop.f32.mrf.mxu1 }
  0xf6   :  { %v979_v50 = vpop.f32.mrf.mxu1 }
  0xf8   :  { %v981_v51 = vpop.f32.mrf.mxu1 }
  0xfa   :  { %v982_v52 = vpop.f32.mrf.mxu1 }
  0xfc   :  { %v984_v54 = vpop.f32.mrf.mxu1 }
  0xfe   :  { %v987_v57 = vpop.f32.mrf.mxu1 }
 0x100   :  { %v989_v59 = vpop.f32.mrf.mxu1 }
 0x101   :  { %v770_v53 = vpop.f32.mrf.mxu0 }
 0x102   :  { %v1927_v55 = vadd.f32 %v963_v42, %v770_v53  ;;  %v990_v62 = vpop.f32.mrf.mxu1 }
 0x103   :  { %v772_v56 = vpop.f32.mrf.mxu0 }
 0x104   :  { %v992_v0 = vpop.f32.mrf.mxu1 }
 0x105   :  { %v773_v58 = vpop.f32.mrf.mxu0 }
 0x106   :  { %v1929_v60 = vadd.f32 %v966_v44, %v773_v58  ;;  %v995_v3 = vpop.f32.mrf.mxu1 }
 0x107   :  { %v775_v61 = vpop.f32.mrf.mxu0 }
 0x108   :  { %v997_v5 = vpop.f32.mrf.mxu1 }
 0x109   :  { %v778_v63 = vpop.f32.mrf.mxu0 }
 0x10a   :  { %v1931_v1 = vadd.f32 %v971_v46, %v778_v63  ;;  %v998_v8 = vpop.f32.mrf.mxu1 }
 0x10b   :  { %v780_v2 = vpop.f32.mrf.mxu0 }
 0x10c   :  { %v1000_v10 = vpop.f32.mrf.mxu1 }
 0x10d   :  { %v781_v4 = vpop.f32.mrf.mxu0 }
 0x10e   :  { %v1933_v6 = vadd.f32 %v974_v48, %v781_v4  ;;  %v1003_v13 = vpop.f32.mrf.mxu1 }
 0x10f   :  { %v783_v7 = vpop.f32.mrf.mxu0 }
 0x110   :  { %v1005_v15 = vpop.f32.mrf.mxu1 }
 0x111   :  { %v786_v9 = vpop.f32.mrf.mxu0 }
 0x112   :  { %v1935_v11 = vadd.f32 %v979_v50, %v786_v9  ;;  %v1006_v18 = vpop.f32.mrf.mxu1 }
 0x113   :  { %v788_v12 = vpop.f32.mrf.mxu0 }
 0x114   :  { %v1008_v20 = vpop.f32.mrf.mxu1 }
 0x115   :  { %v789_v14 = vpop.f32.mrf.mxu0 }
 0x116   :  { %v1937_v16 = vadd.f32 %v982_v52, %v789_v14  ;;  %v1011_v23 = vpop.f32.mrf.mxu1 }
 0x117   :  { %v791_v17 = vpop.f32.mrf.mxu0 }
 0x118   :  { %v1013_v25 = vpop.f32.mrf.mxu1 }
 0x119   :  { %v794_v19 = vpop.f32.mrf.mxu0 }
 0x11a   :  { %v1939_v21 = vadd.f32 %v987_v57, %v794_v19  ;;  %v1014_v28 = vpop.f32.mrf.mxu1 }
 0x11b   :  { %v796_v22 = vpop.f32.mrf.mxu0 }
 0x11c   :  { %v1016_v30 = vpop.f32.mrf.mxu1 }
 0x11d   :  { %v797_v24 = vpop.f32.mrf.mxu0 }
 0x11e   :  { %v1941_v26 = vadd.f32 %v990_v62, %v797_v24  ;;  %v1019_v33 = vpop.f32.mrf.mxu1 }
 0x11f   :  { %v799_v27 = vpop.f32.mrf.mxu0 }
 0x120   :  { %v1021_v35 = vpop.f32.mrf.mxu1 }
 0x121   :  { %v802_v29 = vpop.f32.mrf.mxu0 }
 0x122   :  { %v1943_v31 = vadd.f32 %v995_v3, %v802_v29  ;;  %v1022_v38 = vpop.f32.mrf.mxu1 }
 0x123   :  { %v804_v32 = vpop.f32.mrf.mxu0 }
 0x124   :  { %v1024_v40 = vpop.f32.mrf.mxu1 }
 0x125   :  { %v805_v34 = vpop.f32.mrf.mxu0 }
 0x126   :  { %v1945_v36 = vadd.f32 %v998_v8, %v805_v34  ;;  %v1027_v43 = vpop.f32.mrf.mxu1 }
 0x127   :  { %v807_v37 = vpop.f32.mrf.mxu0 }
 0x128   :  { %v1029_v46 = vpop.f32.mrf.mxu1 }
 0x129   :  { %v810_v39 = vpop.f32.mrf.mxu0 }
 0x12a   :  { %v1947_v41 = vadd.f32 %v1003_v13, %v810_v39  ;;  %v1030_v49 = vpop.f32.mrf.mxu1 }
 0x12b   :  { %v812_v42 = vpop.f32.mrf.mxu0 }
 0x12c   :  { %v1122_v44 = vmax.f32 %v1927_v55, %v1947_v41  ;;  %v1032_v52 = vpop.f32.mrf.mxu1 }
 0x12d   :  { %v813_v45 = vpop.f32.mrf.mxu0 }
 0x12e   :  { %v1951_v47 = vadd.f32 %v1006_v18, %v813_v45  ;;  %v1035_v56 = vpop.f32.mrf.mxu1 }
 0x12f   :  { %v815_v48 = vpop.f32.mrf.mxu0 }
 0x130   :  { %v1123_v50 = vmax.f32 %v1929_v60, %v1951_v47  ;;  %v1037_v59 = vpop.f32.mrf.mxu1 }
 0x131   :  { %v818_v51 = vpop.f32.mrf.mxu0 }
 0x132   :  { %v1955_v53 = vadd.f32 %v1011_v23, %v818_v51  ;;  %v1038_v63 = vpop.f32.mrf.mxu1 }
 0x133   :  { %v820_v54 = vpop.f32.mrf.mxu0 }
 0x134   :  { %v1124_v57 = vmax.f32 %v1931_v1, %v1955_v53  ;;  %v1040_v3 = vpop.f32.mrf.mxu1 }
 0x135   :  { %v821_v58 = vpop.f32.mrf.mxu0 }
 0x136   :  { %v1959_v61 = vadd.f32 %v1014_v28, %v821_v58  ;;  %v1965_v7 = vpop.f32.mrf.mxu1 }
 0x137   :  { %v823_v62 = vpop.f32.mrf.mxu0 }
 0x138   :  { %v1125_v0 = vmax.f32 %v1933_v6, %v1959_v61  ;;  %v1045_v10 = vpop.f32.mrf.mxu1 }
 0x139   :  { %v826_v2 = vpop.f32.mrf.mxu0 }
 0x13a   :  { %v1963_v4 = vadd.f32 %v1019_v33, %v826_v2  ;;  %v1971_v14 = vpop.f32.mrf.mxu1 }
 0x13b   :  { %v828_v5 = vpop.f32.mrf.mxu0 }
 0x13c   :  { %v1126_v8 = vmax.f32 %v1935_v11, %v1963_v4  ;;  %v1048_v18 = vpop.f32.mrf.mxu1 }
 0x13d   :  { %v829_v9 = vpop.f32.mrf.mxu0 }
 0x13e   :  { %v1969_v12 = vadd.f32 %v1022_v38, %v829_v9  ;;  %v1977_v22 = vpop.f32.mrf.mxu1 }
 0x13f   :  { %v831_v13 = vpop.f32.mrf.mxu0 }
 0x140   :  { %v1053_v25 = vpop.f32.mrf.mxu1  ;;  %v2139_v4 = vmax.f32 %v1937_v16, %v1969_v12 }
 0x141   :  { %v834_v17 = vpop.f32.mrf.mxu0 }
 0x142   :  { %v1975_v19 = vadd.f32 %v1027_v43, %v834_v17  ;;  %v1983_v29 = vpop.f32.mrf.mxu1 }
 0x143   :  { %v836_v20 = vpop.f32.mrf.mxu0 }
 0x144   :  { %v1056_v33 = vpop.f32.mrf.mxu1  ;;  %v2140_v12 = vmax.f32 %v1939_v21, %v1975_v19 }
 0x145   :  { %v837_v24 = vpop.f32.mrf.mxu0 }
 0x146   :  { %v1981_v27 = vadd.f32 %v1030_v49, %v837_v24  ;;  %v1989_v37 = vpop.f32.mrf.mxu1 }
 0x147   :  { %v839_v28 = vpop.f32.mrf.mxu0 }
 0x148   :  { %v1061_v40 = vpop.f32.mrf.mxu1  ;;  %v2141_v19 = vmax.f32 %v1941_v26, %v1981_v27 }
 0x149   :  { %v842_v32 = vpop.f32.mrf.mxu0 }
 0x14a   :  { %v1987_v34 = vadd.f32 %v1035_v56, %v842_v32  ;;  %v1995_v45 = vpop.f32.mrf.mxu1 }
 0x14b   :  { %v844_v35 = vpop.f32.mrf.mxu0 }
 0x14c   :  { %v1064_v49 = vpop.f32.mrf.mxu1  ;;  %v2142_v27 = vmax.f32 %v1943_v31, %v1987_v34 }
 0x14d   :  { %v845_v39 = vpop.f32.mrf.mxu0 }
 0x14e   :  { %v1993_v42 = vadd.f32 %v1038_v63, %v845_v39  ;;  %v1999_v52 = vpop.f32.mrf.mxu1 }
 0x14f   :  { %v847_v43 = vpop.f32.mrf.mxu0 }
 0x150   :  { %v1069_v56 = vpop.f32.mrf.mxu1 }
 0x151   :  { %v850_v48 = vpop.f32.mrf.mxu0 }
 0x152   :  { %v2001_v59 = vpop.f32.mrf.mxu1 }
 0x153   :  { %v852_v51 = vpop.f32.mrf.mxu0 }
 0x154   :  { %v1072_v2 = vpop.f32.mrf.mxu1 }
 0x155   :  { %v853_v54 = vpop.f32.mrf.mxu0 }
 0x156   :  { %v2003_v3 = vpop.f32.mrf.mxu1 }
 0x157   :  { %v855_v58 = vpop.f32.mrf.mxu0 }
 0x158   :  { %v1077_v9 = vpop.f32.mrf.mxu1 }
 0x159   :  { %v858_v62 = vpop.f32.mrf.mxu0 }
 0x15a   :  { %v2005_v13 = vpop.f32.mrf.mxu1 }
 0x15b   :  { %v860_v63 = vpop.f32.mrf.mxu0 }
 0x15c   :  { %v1080_v18 = vpop.f32.mrf.mxu1 }
 0x15d   :  { %v861_v5 = vpop.f32.mrf.mxu0 }
 0x15e   :  { %v1083_v24 = vpop.f32.mrf.mxu1 }
 0x15f   :  { %v863_v10 = vpop.f32.mrf.mxu0 }
 0x160   :  { %v1085_v28 = vpop.f32.mrf.mxu1 }
 0x161   :  { %v2007_v17 = vpop.f32.mrf.mxu0 }
 0x162   :  { %v1086_v33 = vpop.f32.mrf.mxu1 }
 0x163   :  { %v868_v20 = vpop.f32.mrf.mxu0 }
 0x164   :  { %v1088_v39 = vpop.f32.mrf.mxu1 }
 0x165   :  { %v2009_v25 = vpop.f32.mrf.mxu0 }
 0x166   :  { %v1091_v43 = vpop.f32.mrf.mxu1 }
 0x167   :  { %v871_v32 = vpop.f32.mrf.mxu0 }
 0x168   :  { %v1093_v51 = vpop.f32.mrf.mxu1 }
 0x169   :  { %v2011_v35 = vpop.f32.mrf.mxu0 }
 0x16a   :  { %v1094_v58 = vpop.f32.mrf.mxu1 }
 0x16b   :  { %v876_v40 = vpop.f32.mrf.mxu0 }
 0x16c   :  { %v1096_v63 = vpop.f32.mrf.mxu1  ;;  %v1044_v40 = vadd.f32 %v1965_v7, %v850_v48  ;;  %v1052_v48 = vadd.f32 %v1977_v22, %v858_v62 }
 0x16d   :  { %v2013_v49 = vpop.f32.mrf.mxu0  ;;  %v2027_v63 = vld [vmem:[%s2137_s2] ss:$0 sm:$0xff] }
 0x16e   :  { %v1099_v10 = vpop.f32.mrf.mxu1 }
 0x16f   :  { %v879_v56 = vpop.f32.mrf.mxu0 }
 0x170   :  { %v1101_v20 = vpop.f32.mrf.mxu1 }
 0x171   :  { %v2015_v2 = vpop.f32.mrf.mxu0  ;;  %v1047_v20 = vadd.f32 %v1971_v14, %v853_v54 }
 0x172   :  { %v2019_v32 = vpop.f32.mrf.mxu1 }
 0x173   :  { %v884_v9 = vpop.f32.mrf.mxu0 }
 0x174   :  { %v1104_v39 = vpop.f32.mrf.mxu1 }
 0x175   :  { %v2017_v18 = vpop.f32.mrf.mxu0 }
 0x176   :  { %v2022_v51 = vpop.f32.mrf.mxu1 }
 0x177   :  { %v887_v28 = vpop.f32.mrf.mxu0 }
 0x178   :  { %v1109_v23 = vpop.f32.mrf.mxu1 }
 0x179   :  { %v890_v46 = vpop.f32.mrf.mxu0 }
 0x17a   :  { %v1084_v38 = vadd.f32 %v1083_v24, %v890_v46  ;;  %v2033_v46 = vpop.f32.mrf.mxu1 }
 0x17b   :  { %v892_v30 = vpop.f32.mrf.mxu0 }
 0x17c   :  { %v1132_v56 = vmax.f32 %v1044_v40, %v1084_v38  ;;  %v1112_v40 = vpop.f32.mrf.mxu1 }
 0x17d   :  { %v893_v9 = vpop.f32.mrf.mxu0 }
 0x17e   :  { %v1142_v28 = vmax.f32 %v1122_v44, %v1132_v56  ;;  %v1087_v39 = vadd.f32 %v1086_v33, %v893_v9  ;;  %v2040_v41 = vpop.f32.mrf.mxu1  ;;  %v1055_v56 = vadd.f32 %v1983_v29, %v861_v5 }
 0x17f   :  { %v895_v7 = vpop.f32.mrf.mxu0 }
 0x180   :  { %v1159_v30 = vadd.f32 %v2027_v63, %v1142_v28  ;;  %v1133_v38 = vmax.f32 %v1047_v20, %v1087_v39  ;;  %v1117_v9 = vpop.f32.mrf.mxu1  ;;  %v1060_v28 = vadd.f32 %v1989_v37, %v2007_v17  ;;  %v1063_v17 = vadd.f32 %v1995_v45, %v2009_v25 }
 0x181   :  { %v898_v24 = vpop.f32.mrf.mxu0  ;;  %v1068_v25 = vadd.f32 %v1999_v52, %v2011_v35  ;;  %v1071_v35 = vadd.f32 %v2001_v59, %v2013_v49  ;;  %v1076_v49 = vadd.f32 %v2003_v3, %v2015_v2  ;;  %v1079_v2 = vadd.f32 %v2005_v13, %v2017_v18 }
 0x182   :  { %vm1169_vm1 = vcmp.gt.f32.partialorder %v1159_v30, 0.0  ;;  %v1179_v15 = vmul.f32 0.01, %v1159_v30  ;;  %v1143_v14 = vmax.f32 %v1123_v50, %v1133_v38  ;;  %v1092_v23 = vadd.f32 %v1091_v43, %v898_v24 }
 0x183   :  { %v900_v55 = vpop.f32.mrf.mxu0 }
 0x184   :  { %v1189_v44 = vsel %vm1169_vm1, %v1159_v30, %v1179_v15  ;;  %v1160_v54 = vadd.f32 %v2027_v63, %v1143_v14  ;;  %v1134_v33 = vmax.f32 %v1052_v48, %v1092_v23  ;;  %v2051_v15 = vpop.f32.mrf.mxu1 }
 0x185   :  { %v1390_v22 = vpack.c.bf16 %v1189_v44, %v1189_v44  ;;  %v901_v62 = vpop.f32.mrf.mxu0 }
 0x186   :  { %vm1170_vm3 = vcmp.gt.f32.partialorder %v1160_v54, 0.0  ;;  %v1180_v20 = vmul.f32 0.01, %v1160_v54  ;;  %v1144_v60 = vmax.f32 %v1124_v57, %v1134_v33  ;;  %v1095_v47 = vadd.f32 %v1094_v58, %v901_v62  ;;  %v1120_v1 = vpop.f32.mrf.mxu1 }
 0x187   :  { %1240 = vst.msk [vmem:[%s2138_s3] sm:$0xf] %vm1239_vm2, %v1390_v22  ;;  %v903_v50 = vpop.f32.mrf.mxu0 }
 0x188   :  { %v1190_v43 = vsel %vm1170_vm3, %v1160_v54, %v1180_v20  ;;  %v1161_v29 = vadd.f32 %v2027_v63, %v1144_v60  ;;  %v1135_v5 = vmax.f32 %v1055_v56, %v1095_v47 }
 0x189   :  { %v1391_v39 = vpack.c.bf16 %v1190_v43, %v1190_v43  ;;  %v906_v7 = vpop.f32.mrf.mxu0 }
 0x18a   :  { %vm1171_vm4 = vcmp.gt.f32.partialorder %v1161_v29, 0.0  ;;  %v1181_v53 = vmul.f32 0.01, %v1161_v29  ;;  %v1145_v57 = vmax.f32 %v1125_v0, %v1135_v5  ;;  %v1100_v58 = vadd.f32 %v1099_v10, %v906_v7 }
 0x18b   :  { %1241 = vst.msk [vmem:[%s2138_s3 + $0x4] sm:$0xf] %vm1239_vm2, %v1391_v39  ;;  %v908_v30 = vpop.f32.mrf.mxu0 }
 0x18c   :  { %v1191_v38 = vsel %vm1171_vm4, %v1161_v29, %v1181_v53  ;;  %v1162_v48 = vadd.f32 %v2027_v63, %v1145_v57  ;;  %v1136_v37 = vmax.f32 %v1060_v28, %v1100_v58 }
 0x18d   :  { %v1392_v24 = vpack.c.bf16 %v1191_v38, %v1191_v38  ;;  %v909_v40 = vpop.f32.mrf.mxu0 }
 0x18e   :  { %vm1172_vm5 = vcmp.gt.f32.partialorder %v1162_v48, 0.0  ;;  %v1182_v14 = vmul.f32 0.01, %v1162_v48  ;;  %v1146_v6 = vmax.f32 %v1126_v8, %v1136_v37  ;;  %v1103_v61 = vadd.f32 %v2019_v32, %v909_v40 }
 0x18f   :  { %1242 = vst.msk [vmem:[%s2138_s3 + $0x8] sm:$0xf] %vm1239_vm2, %v1392_v24  ;;  %v911_v0 = vpop.f32.mrf.mxu0 }
 0x190   :  { %v1192_v10 = vsel %vm1172_vm5, %v1162_v48, %v1182_v14  ;;  %v1163_v23 = vadd.f32 %v2027_v63, %v1146_v6  ;;  %v1137_v45 = vmax.f32 %v1063_v17, %v1103_v61  ;;  %v2143_v48 = vmax.f32 %v1945_v36, %v1993_v42 }
 0x191   :  { %v1393_v55 = vpack.c.bf16 %v1192_v10, %v1192_v10  ;;  %v914_v44 = vpop.f32.mrf.mxu0 }
 0x192   :  { %vm1173_vm6 = vcmp.gt.f32.partialorder %v1163_v23, 0.0  ;;  %v1183_v11 = vmul.f32 0.01, %v1163_v23  ;;  %v1147_v8 = vmax.f32 %v2139_v4, %v1137_v45  ;;  %v1108_v32 = vadd.f32 %v2022_v51, %v914_v44 }
 0x193   :  { %1243 = vst.msk [vmem:[%s2138_s3 + $0xc] sm:$0xf] %vm1239_vm2, %v1393_v55  ;;  %v916_v54 = vpop.f32.mrf.mxu0 }
 0x194   :  { %v1193_v33 = vsel %vm1173_vm6, %v1163_v23, %v1183_v11  ;;  %v1164_v56 = vadd.f32 %v2027_v63, %v1147_v8  ;;  %v1138_v52 = vmax.f32 %v1068_v25, %v1108_v32 }
 0x195   :  { %v1394_v22 = vpack.c.bf16 %v1193_v33, %v1193_v33  ;;  %v917_v62 = vpop.f32.mrf.mxu0 }
 0x196   :  { %vm1174_vm7 = vcmp.gt.f32.partialorder %v1164_v56, 0.0  ;;  %v1184_v16 = vmul.f32 0.01, %v1164_v56  ;;  %v1148_v51 = vmax.f32 %v2140_v12, %v1138_v52  ;;  %v1111_v9 = vadd.f32 %v2033_v46, %v917_v62 }
 0x197   :  { %1244 = vst.msk [vmem:[%s2138_s3 + $0x10] sm:$0xf] %vm1239_vm2, %v1394_v22  ;;  %v919_v20 = vpop.f32.mrf.mxu0 }
 0x198   :  { %v1194_v60 = vsel %vm1174_vm7, %v1164_v56, %v1184_v16  ;;  %v1165_v47 = vadd.f32 %v2027_v63, %v1148_v51  ;;  %v1139_v59 = vmax.f32 %v1071_v35, %v1111_v9 }
 0x199   :  { %v1395_v50 = vpack.c.bf16 %v1194_v60, %v1194_v60  ;;  %v922_v43 = vpop.f32.mrf.mxu0 }
 0x19a   :  { %vm1175_vm8 = vcmp.gt.f32.partialorder %v1165_v47, 0.0  ;;  %v1185_v21 = vmul.f32 0.01, %v1165_v47  ;;  %v1149_v46 = vmax.f32 %v2141_v19, %v1139_v59  ;;  %v1116_v29 = vadd.f32 %v2040_v41, %v922_v43 }
 0x19b   :  { %1245 = vst.msk [vmem:[%s2138_s3 + $0x14] sm:$0xf] %vm1239_vm2, %v1395_v50  ;;  %v924_v5 = vpop.f32.mrf.mxu0 }
 0x19c   :  { %v1195_v28 = vsel %vm1175_vm8, %v1165_v47, %v1185_v21  ;;  %v1166_v39 = vadd.f32 %v2027_v63, %v1149_v46  ;;  %v1140_v3 = vmax.f32 %v1076_v49, %v1116_v29 }
 0x19d   :  { %v1396_v7 = vpack.c.bf16 %v1195_v28, %v1195_v28  ;;  %v925_v1 = vpop.f32.mrf.mxu0 }
 0x19e   :  { %vm1176_vm9 = vcmp.gt.f32.partialorder %v1166_v39, 0.0  ;;  %v1186_v26 = vmul.f32 0.01, %v1166_v39  ;;  %v1150_v41 = vmax.f32 %v2142_v27, %v1140_v3  ;;  %v1119_v53 = vadd.f32 %v2051_v15, %v925_v1 }
 0x19f   :  { %1246 = vst.msk [vmem:[%s2138_s3 + $0x18] sm:$0xf] %vm1239_vm2, %v1396_v7  ;;  %v927_v57 = vpop.f32.mrf.mxu0 }
 0x1a0   :  { %v1196_v58 = vsel %vm1176_vm9, %v1166_v39, %v1186_v26  ;;  %v1167_v30 = vadd.f32 %v2027_v63, %v1150_v41  ;;  %v1141_v13 = vmax.f32 %v1079_v2, %v1119_v53 }
 0x1a1   :  { %v1397_v18 = vpack.c.bf16 %v1196_v58, %v1196_v58 }
 0x1a2   :  { %vm1177_vm10 = vcmp.gt.f32.partialorder %v1167_v30, 0.0  ;;  %v1187_v38 = vmul.f32 0.01, %v1167_v30  ;;  %v1151_v31 = vmax.f32 %v2143_v48, %v1141_v13 }
 0x1a3   :  { %1247 = vst.msk [vmem:[%s2138_s3 + $0x1c] sm:$0xf] %vm1239_vm2, %v1397_v18 }
 0x1a4   :  { %v1197_v34 = vsel %vm1177_vm10, %v1167_v30, %v1187_v38  ;;  %v1168_v15 = vadd.f32 %v2027_v63, %v1151_v31 }
 0x1a5   :  { %v1398_v37 = vpack.c.bf16 %v1197_v34, %v1197_v34 }
 0x1a6   :  { %vm1178_vm11 = vcmp.gt.f32.partialorder %v1168_v15, 0.0  ;;  %v1188_v17 = vmul.f32 0.01, %v1168_v15 }
 0x1a7   :  { %1248 = vst.msk [vmem:[%s2138_s3 + $0x20] sm:$0xf] %vm1239_vm2, %v1398_v37 }
 0x1a8   :  { %v1198_v24 = vsel %vm1178_vm11, %v1168_v15, %v1188_v17 }
 0x1a9   :  { %v1399_v40 = vpack.c.bf16 %v1198_v24, %v1198_v24 }
 0x1ab   :  { %1249 = vst.msk [vmem:[%s2138_s3 + $0x24] sm:$0xf] %vm1239_vm2, %v1399_v40 }

// kernel: cifar_cnn_forward.6
= control target key start
LH: loop header
LB: loop body
LE: loop exit
PB: predicated region body
PF: predicated region fallthrough
CT: control target
= control target key end

     0   :  { %vm311_vm0 = vcmask 261120   ;;  %vm581_vm2 = vcmask 519168   ;;  %s982_s1 = inlined_call_operand.vmem [shape: bf16[288,64], index: 1, kind: input, shape index: {}]   ;;  %s983_s0 = inlined_call_operand.vmem [shape: bf16[4,32,288], index: 0, kind: input, shape index: {}]   ;;  %s984_s2 = inlined_call_operand.vmem [shape: f32[1,64], index: 2, kind: input, shape index: {}]   ;;  %s985_s3 = inlined_call_operand.vmem [shape: bf16[32,64], index: 3, kind: output, shape index: {}]  }
   0x1   :  { %v759_v0 = vld [vmem:[%s982_s1 + $0x78] sm:$0xff]   ;;  %v761_v2 = vld [vmem:[%s982_s1 + $0x70] sm:$0xff]   ;;  %v763_v4 = vld [vmem:[%s982_s1 + $0x68] sm:$0xff]  }
   0x2   :  { %v760_v1 = vld [vmem:[%s982_s1 + $0x38] sm:$0xff]   ;;  %649 = vmatprep.subr.bf16.mxu0 %v759_v0  ;;  %743 = vmatprep.subr.bf16.mxu1 %v759_v0  ;;  %v762_v3 = vld [vmem:[%s982_s1 + $0x30] sm:$0xff]   ;;  %v764_v5 = vld [vmem:[%s982_s1 + $0x28] sm:$0xff]  }
   0x3   :  { %650 = vmatpush3.bf16.msra.mxu0 %v760_v1  ;;  %751 = vmatpush3.bf16.msra.mxu1 %v760_v1  ;;  %v765_v6 = vld [vmem:[%s982_s1 + $0x60] sm:$0xff]   ;;  %v767_v8 = vld [vmem:[%s982_s1 + $0x58] sm:$0xff]   ;;  %v769_v10 = vld [vmem:[%s982_s1 + $0x50] sm:$0xff]  }
   0x4   :  { %651 = vmatprep.subr.bf16.mxu0 %v761_v2  ;;  %744 = vmatprep.subr.bf16.mxu1 %v761_v2  ;;  %v766_v7 = vld [vmem:[%s982_s1 + $0x20] sm:$0xff]   ;;  %v768_v9 = vld [vmem:[%s982_s1 + $0x18] sm:$0xff]   ;;  %v770_v13 = vld [vmem:[%s982_s1 + $0x10] sm:$0xff]  }
   0x5   :  { %v777_v11 = vld [vmem:[%s983_s0 + $0x4] ss:$12 sps:$4 sm:$0xff]   ;;  %v780_v12 = vld [vmem:[%s983_s0 + $0x94] ss:$12 sps:$4 sm:$0xff]   ;;  %v771_v14 = vld [vmem:[%s982_s1 + $0x48] sm:$0xff]  }
   0x6   :  { %368 = vmatprep.mubr.bf16.mxu0 %v777_v11  ;;  %416 = vmatprep.mubr.bf16.mxu1 %v780_v12  ;;  %v772_v15 = vld [vmem:[%s982_s1 + $0x8] sm:$0xff]   ;;  %v773_v16 = vld [vmem:[%s982_s1 + $0x40] sm:$0xff]   ;;  %v778_v20 = vld [vmem:[%s983_s0 + $0x90] ss:$12 sps:$4 sm:$0xff]  }
   0x7   :  { %652 = vmatpush3.bf16.msra.mxu0 %v762_v3  ;;  %752 = vmatpush3.bf16.msra.mxu1 %v762_v3  ;;  %v774_v17 = vld [vmem:[%s982_s1] sm:$0xff]   ;;  %v781_v19 = vld [vmem:[%s982_s1 + $0x88] sm:$0xff]   ;;  %v792_v28 = vld [vmem:[%s983_s0 + $0x30] ss:$12 sps:$4 sm:$0xff]  }
   0x8   :  { %653 = vmatprep.subr.bf16.mxu0 %v763_v4  ;;  %745 = vmatprep.subr.bf16.mxu1 %v763_v4  ;;  %v775_v18 = vld [vmem:[%s983_s0] ss:$12 sps:$4 sm:$0xff]   ;;  %v782_v21 = vld [vmem:[%s983_s0 + $0x1c] ss:$12 sps:$4 sm:$0xff]   ;;  %v786_v24 = vld [vmem:[%s983_s0 + $0x18] ss:$12 sps:$4 sm:$0xff]  }
   0x9   :  { %v784_v22 = vld [vmem:[%s983_s0 + $0xac] ss:$12 sps:$4 sm:$0xff]   ;;  %v788_v23 = vld [vmem:[%s982_s1 + $0x80] sm:$0xff]   ;;  %v787_v25 = vld [vmem:[%s983_s0 + $0xa8] ss:$12 sps:$4 sm:$0xff]  }
   0xa   :  { %v789_v26 = vld [vmem:[%s983_s0 + $0x34] ss:$12 sps:$4 sm:$0xff]   ;;  %v794_v30 = vld [vmem:[%s983_s0 + $0x4c] ss:$12 sps:$4 sm:$0xff]   ;;  %v798_v33 = vld [vmem:[%s983_s0 + $0x50] ss:$12 sps:$4 sm:$0xff]  }
   0xb   :  { %654 = vmatpush3.bf16.msra.mxu0 %v764_v5  ;;  %753 = vmatpush3.bf16.msra.mxu1 %v764_v5  ;;  %v791_v27 = vld [vmem:[%s983_s0 + $0x8] ss:$12 sps:$4 sm:$0xff]   ;;  %v793_v29 = vld [vmem:[%s983_s0 + $0x20] ss:$12 sps:$4 sm:$0xff]   ;;  %v796_v31 = vld [vmem:[%s983_s0 + $0x38] ss:$12 sps:$4 sm:$0xff]  }
   0xc   :  { %655 = vmatprep.subr.bf16.mxu0 %v765_v6  ;;  %746 = vmatprep.subr.bf16.mxu1 %v765_v6  ;;  %v797_v32 = vld [vmem:[%s983_s0 + $0x48] ss:$12 sps:$4 sm:$0xff]   ;;  %v799_v34 = vld [vmem:[%s983_s0 + $0x64] ss:$12 sps:$4 sm:$0xff]   ;;  %v802_v36 = vld [vmem:[%s983_s0 + $0x60] ss:$12 sps:$4 sm:$0xff]  }
   0xd   :  { %v801_v35 = vld [vmem:[%s983_s0 + $0x68] ss:$12 sps:$4 sm:$0xff]   ;;  %v803_v37 = vld [vmem:[%s983_s0 + $0x80] ss:$12 sps:$4 sm:$0xff]   ;;  %v806_v39 = vld [vmem:[%s983_s0 + $0x98] ss:$12 sps:$4 sm:$0xff]  }
   0xe   :  { %v804_v38 = vld [vmem:[%s983_s0 + $0x7c] ss:$12 sps:$4 sm:$0xff]   ;;  %v807_v40 = vld [vmem:[%s983_s0 + $0x78] ss:$12 sps:$4 sm:$0xff]  }
   0xf   :  { %656 = vmatpush3.bf16.msra.mxu0 %v766_v7  ;;  %754 = vmatpush3.bf16.msra.mxu1 %v766_v7  ;;  %v808_v41 = vld [vmem:[%s983_s0 + $0xb0] ss:$12 sps:$4 sm:$0xff]  }
  0x10   :  { %657 = vmatprep.subr.bf16.mxu0 %v767_v8  ;;  %747 = vmatprep.subr.bf16.mxu1 %v767_v8 }
  0x13   :  { %658 = vmatpush3.bf16.msra.mxu0 %v768_v9  ;;  %755 = vmatpush3.bf16.msra.mxu1 %v768_v9 }
  0x14   :  { %659 = vmatprep.subr.bf16.mxu0 %v769_v10  ;;  %748 = vmatprep.subr.bf16.mxu1 %v769_v10 }
  0x17   :  { %660 = vmatpush3.bf16.msra.mxu0 %v770_v13  ;;  %756 = vmatpush3.bf16.msra.mxu1 %v770_v13 }
  0x18   :  { %661 = vmatprep.subr.bf16.mxu0 %v771_v14  ;;  %749 = vmatprep.subr.bf16.mxu1 %v771_v14 }
  0x1b   :  { %662 = vmatpush3.bf16.msra.mxu0 %v772_v15  ;;  %757 = vmatpush3.bf16.msra.mxu1 %v772_v15 }
  0x1c   :  { %663 = vmatprep.subr.bf16.mxu0 %v773_v16  ;;  %750 = vmatprep.subr.bf16.mxu1 %v773_v16 }
  0x1f   :  { %664 = vmatpush3.bf16.msra.mxu0 %v774_v17  ;;  %758 = vmatpush3.bf16.msra.mxu1 %v774_v17 }
  0x20   :  { %723 = vmatprep.subr.bf16.mxu1 %v781_v19 }
  0x22   :  { %369 = vmatmul.mubr.bf16.vlgmr.msra.gmra.mxu0 %v775_v18  ;;  %417 = vmatmul.mubr.bf16.vlgmr.msra.gmra.mxu1 %v778_v20 }
  0x23   :  { %724 = vmatpush3.bf16.msra.mxu1 %v781_v19  ;;  %376 = vmatprep.mubr.bf16.mxu0 %v782_v21 }
  0x24   :  { %424 = vmatprep.mubr.bf16.mxu1 %v784_v22  ;;  %725 = vmatprep.subr.bf16.mxu1 %v788_v23 }
  0x27   :  { %726 = vmatpush3.bf16.msra.mxu1 %v788_v23 }
  0x2a   :  { %377 = vmatmul.mubr.bf16.gmra.mxu0 %v786_v24  ;;  %425 = vmatmul.mubr.bf16.gmra.mxu1 %v787_v25 }
  0x2b   :  { %384 = vmatprep.mubr.bf16.mxu0 %v789_v26  ;;  %727 = vmatprep.mubr.msk.bf16.mxu1 %vm311_vm0, %v791_v27 }
  0x32   :  { %385 = vmatmul.mubr.bf16.gmra.mxu0 %v792_v28  ;;  %728 = vmatmul.mubr.msk.bf16.vlgmr.msra.gmra.mxu1 %vm311_vm0, %v793_v29 }
  0x33   :  { %392 = vmatprep.mubr.bf16.mxu0 %v794_v30  ;;  %731 = vmatprep.mubr.msk.bf16.mxu1 %vm311_vm0, %v796_v31 }
  0x3a   :  { %393 = vmatmul.mubr.bf16.gmra.mxu0 %v797_v32  ;;  %732 = vmatmul.mubr.msk.bf16.gmra.mxu1 %vm311_vm0, %v798_v33 }
  0x3b   :  { %400 = vmatprep.mubr.bf16.mxu0 %v799_v34  ;;  %735 = vmatprep.mubr.msk.bf16.mxu1 %vm311_vm0, %v801_v35 }
  0x42   :  { %401 = vmatmul.mubr.bf16.gmra.mxu0 %v802_v36  ;;  %736 = vmatmul.mubr.msk.bf16.gmra.mxu1 %vm311_vm0, %v803_v37 }
  0x43   :  { %408 = vmatprep.mubr.bf16.mxu0 %v804_v38  ;;  %739 = vmatprep.mubr.msk.bf16.mxu1 %vm311_vm0, %v806_v39 }
  0x4a   :  { %409 = vmatmul.mubr.bf16.gmra.mxu0 %v807_v40  ;;  %740 = vmatmul.mubr.msk.bf16.gmra.mxu1 %vm311_vm0, %v808_v41 }
  0xe2   :  { %v665_v42 = vpop.f32.mrf.mxu0  ;;  %v701_v43 = vpop.f32.mrf.mxu1 }
  0xe4   :  { %v666_v44 = vpop.f32.mrf.mxu0  ;;  %v702_v45 = vpop.f32.mrf.mxu1 }
  0xe5   :  { %v667_v21 = vadd.f32 %v666_v44, %v665_v42  ;;  %v703_v22 = vadd.f32 %v702_v45, %v701_v43 }
  0xe6   :  { %v668_v46 = vpop.f32.mrf.mxu0  ;;  %v704_v47 = vpop.f32.mrf.mxu1 }
  0xe8   :  { %v669_v48 = vpop.f32.mrf.mxu0  ;;  %v705_v49 = vpop.f32.mrf.mxu1 }
  0xe9   :  { %v670_v25 = vadd.f32 %v669_v48, %v668_v46  ;;  %v706_v26 = vadd.f32 %v705_v49, %v704_v47 }
  0xea   :  { %v671_v50 = vpop.f32.mrf.mxu0  ;;  %v707_v51 = vpop.f32.mrf.mxu1 }
  0xec   :  { %v672_v52 = vpop.f32.mrf.mxu0  ;;  %v708_v53 = vpop.f32.mrf.mxu1 }
  0xed   :  { %v673_v27 = vadd.f32 %v672_v52, %v671_v50  ;;  %v709_v29 = vadd.f32 %v708_v53, %v707_v51  ;;  %v640_v53 = vld [vmem:[%s984_s2] ss:$0 sm:$0xff] }
  0xee   :  { %v674_v54 = vpop.f32.mrf.mxu0  ;;  %v710_v55 = vpop.f32.mrf.mxu1 }
  0xf0   :  { %v675_v56 = vpop.f32.mrf.mxu0  ;;  %v711_v57 = vpop.f32.mrf.mxu1 }
  0xf1   :  { %v676_v39 = vadd.f32 %v675_v56, %v674_v54  ;;  %v712_v40 = vadd.f32 %v711_v57, %v710_v55 }
  0xf2   :  { %v677_v58 = vpop.f32.mrf.mxu0  ;;  %v729_v59 = vpop.f32.mrf.mxu1 }
  0xf3   :  { %v476_v41 = vadd.f32 %v729_v59, %v673_v27 }
  0xf4   :  { %v678_v60 = vpop.f32.mrf.mxu0  ;;  %v467_v61 = vpop.f32.mrf.mxu1 }
  0xf5   :  { %v679_v19 = vadd.f32 %v678_v60, %v677_v58  ;;  %v468_v35 = vadd.f32 %v667_v21, %v467_v61 }
  0xf6   :  { %v680_v62 = vpop.f32.mrf.mxu0  ;;  %v730_v63 = vpop.f32.mrf.mxu1 }
  0xf7   :  { %v479_v59 = vadd.f32 %v730_v63, %v676_v39 }
  0xf8   :  { %v681_v0 = vpop.f32.mrf.mxu0  ;;  %v470_v1 = vpop.f32.mrf.mxu1 }
  0xf9   :  { %v682_v42 = vadd.f32 %v681_v0, %v680_v62  ;;  %v471_v61 = vadd.f32 %v670_v25, %v470_v1 }
  0xfa   :  { %v683_v2 = vpop.f32.mrf.mxu0  ;;  %v733_v3 = vpop.f32.mrf.mxu1 }
  0xfc   :  { %v684_v4 = vpop.f32.mrf.mxu0  ;;  %v483_v5 = vpop.f32.mrf.mxu1 }
  0xfd   :  { %v685_v16 = vadd.f32 %v684_v4, %v683_v2  ;;  %v484_v28 = vadd.f32 %v679_v19, %v483_v5 }
  0xfe   :  { %v686_v6 = vpop.f32.mrf.mxu0  ;;  %v734_v7 = vpop.f32.mrf.mxu1 }
  0xff   :  { %v492_v30 = vadd.f32 %v733_v3, %v685_v16  ;;  %v530_v45 = vmax.f32 %v468_v35, %v484_v28 }
 0x100   :  { %v687_v8 = vpop.f32.mrf.mxu0  ;;  %v486_v9 = vpop.f32.mrf.mxu1 }
 0x101   :  { %v688_v31 = vadd.f32 %v687_v8, %v686_v6  ;;  %v532_v49 = vmax.f32 %v476_v41, %v492_v30  ;;  %v487_v51 = vadd.f32 %v682_v42, %v486_v9 }
 0x102   :  { %v689_v10 = vpop.f32.mrf.mxu0  ;;  %v737_v11 = vpop.f32.mrf.mxu1 }
 0x103   :  { %v495_v50 = vadd.f32 %v734_v7, %v688_v31  ;;  %v531_v6 = vmax.f32 %v471_v61, %v487_v51 }
 0x104   :  { %v690_v12 = vpop.f32.mrf.mxu0  ;;  %v499_v13 = vpop.f32.mrf.mxu1 }
 0x105   :  { %v691_v20 = vadd.f32 %v690_v12, %v689_v10  ;;  %v533_v5 = vmax.f32 %v479_v59, %v495_v50 }
 0x106   :  { %v692_v14 = vpop.f32.mrf.mxu0  ;;  %v738_v15 = vpop.f32.mrf.mxu1 }
 0x107   :  { %v500_v36 = vadd.f32 %v691_v20, %v499_v13 }
 0x108   :  { %v693_v17 = vpop.f32.mrf.mxu0  ;;  %v502_v18 = vpop.f32.mrf.mxu1 }
 0x109   :  { %v694_v32 = vadd.f32 %v693_v17, %v692_v14 }
 0x10a   :  { %v695_v23 = vpop.f32.mrf.mxu0  ;;  %v741_v24 = vpop.f32.mrf.mxu1 }
 0x10b   :  { %v524_v46 = vadd.f32 %v741_v24, %v709_v29  ;;  %v503_v52 = vadd.f32 %v694_v32, %v502_v18 }
 0x10c   :  { %v696_v33 = vpop.f32.mrf.mxu0  ;;  %v515_v34 = vpop.f32.mrf.mxu1 }
 0x10d   :  { %v697_v37 = vadd.f32 %v696_v33, %v695_v23  ;;  %v516_v38 = vadd.f32 %v703_v22, %v515_v34 }
 0x10e   :  { %v698_v43 = vpop.f32.mrf.mxu0  ;;  %v742_v44 = vpop.f32.mrf.mxu1 }
 0x10f   :  { %v508_v47 = vadd.f32 %v737_v11, %v697_v37  ;;  %v534_v48 = vmax.f32 %v500_v36, %v516_v38  ;;  %v527_v62 = vadd.f32 %v742_v44, %v712_v40 }
 0x110   :  { %v699_v58 = vpop.f32.mrf.mxu0  ;;  %v518_v60 = vpop.f32.mrf.mxu1 }
 0x111   :  { %v536_v54 = vmax.f32 %v508_v47, %v524_v46  ;;  %v538_v55 = vmax.f32 %v530_v45, %v534_v48  ;;  %v700_v56 = vadd.f32 %v699_v58, %v698_v43  ;;  %v519_v57 = vadd.f32 %v706_v26, %v518_v60 }
 0x113   :  { %v540_v0 = vmax.f32 %v532_v49, %v536_v54  ;;  %v549_v2 = vadd.f32 %v640_v53, %v538_v55  ;;  %v511_v3 = vadd.f32 %v738_v15, %v700_v56  ;;  %v535_v4 = vmax.f32 %v503_v52, %v519_v57 }
 0x115   :  { %v551_v7 = vadd.f32 %v640_v53, %v540_v0  ;;  %vm553_vm1 = vcmp.gt.f32.partialorder %v549_v2, 0.0  ;;  %v557_v8 = vmul.f32 0.01, %v549_v2  ;;  %v537_v9 = vmax.f32 %v511_v3, %v527_v62 }
 0x116   :  { %v539_v10 = vmax.f32 %v531_v6, %v535_v4 }
 0x117   :  { %vm555_vm3 = vcmp.gt.f32.partialorder %v551_v7, 0.0  ;;  %v559_v11 = vmul.f32 0.01, %v551_v7  ;;  %v561_v12 = vsel %vm553_vm1, %v549_v2, %v557_v8  ;;  %v541_v13 = vmax.f32 %v533_v5, %v537_v9 }
 0x118   :  { %v645_v14 = vpack.c.bf16 %v561_v12, %v561_v12  ;;  %v550_v63 = vadd.f32 %v640_v53, %v539_v10 }
 0x119   :  { %v563_v1 = vsel %vm555_vm3, %v551_v7, %v559_v11  ;;  %v552_v16 = vadd.f32 %v640_v53, %v541_v13 }
 0x11a   :  { %v647_v17 = vpack.c.bf16 %v563_v1, %v563_v1  ;;  %582 = vst.msk [vmem:[%s985_s3] sm:$0xf] %vm581_vm2, %v645_v14  ;;  %vm554_vm4 = vcmp.gt.f32.partialorder %v550_v63, 0.0  ;;  %v558_v15 = vmul.f32 0.01, %v550_v63 }
 0x11b   :  { %vm556_vm5 = vcmp.gt.f32.partialorder %v552_v16, 0.0  ;;  %v560_v18 = vmul.f32 0.01, %v552_v16 }
 0x11c   :  { %584 = vst.msk [vmem:[%s985_s3 + $0x8] sm:$0xf] %vm581_vm2, %v647_v17  ;;  %v562_v19 = vsel %vm554_vm4, %v550_v63, %v558_v15 }
 0x11d   :  { %v564_v20 = vsel %vm556_vm5, %v552_v16, %v560_v18  ;;  %v646_v21 = vpack.c.bf16 %v562_v19, %v562_v19 }
 0x11e   :  { %v648_v22 = vpack.c.bf16 %v564_v20, %v564_v20 }
 0x11f   :  { %583 = vst.msk [vmem:[%s985_s3 + $0x4] sm:$0xf] %vm581_vm2, %v646_v21 }
 0x120   :  { %585 = vst.msk [vmem:[%s985_s3 + $0xc] sm:$0xf] %vm581_vm2, %v648_v22 }

// kernel: cifar_cnn_forward.7
= control target key start
LH: loop header
LB: loop body
LE: loop exit
PB: predicated region body
PF: predicated region fallthrough
CT: control target
= control target key end

     0   :  { %v803_v33 = vmov 0.0   ;;  %vm804_vm0 = vmmov 0   ;;  %vm349_vm1 = vcmask 523264   ;;  %vm597_vm4 = vcmask 80896   ;;  %s1005_s1 = inlined_call_operand.vmem [shape: bf16[576,128], index: 1, kind: input, shape index: {}]   ;;  %s1006_s0 = inlined_call_operand.vmem [shape: bf16[16,576], index: 0, kind: input, shape index: {}]   ;;  %s1007_s3 = inlined_call_operand.vmem [shape: bf16[128,10], index: 3, kind: input, shape index: {}]   ;;  %s1008_s2 = inlined_call_operand.vmem [shape: f32[1,128], index: 2, kind: input, shape index: {}]   ;;  %s1009_s5 = inlined_call_operand.vmem [shape: f32[16,128], index: 5, kind: output, shape index: {0}]   ;;  %s1010_s4 = inlined_call_operand.vmem [shape: f32[1,10], index: 4, kind: input, shape index: {}]   ;;  %s1011_s6 = inlined_call_operand.vmem [shape: f32[16,10], index: 6, kind: output, shape index: {1}]  }
   0x1   :  { %v752_v0 = vld [vmem:[%s1005_s1 + $0x78] sm:$0xff]   ;;  %v756_v4 = vld [vmem:[%s1005_s1 + $0x70] sm:$0xff]   ;;  %v760_v8 = vld [vmem:[%s1005_s1 + $0x68] sm:$0xff]  }
   0x2   :  { %v753_v1 = vld [vmem:[%s1005_s1 + $0x38] sm:$0xff]   ;;  %660 = vmatprep.subr.bf16.mxu0 %v752_v0  ;;  %v757_v5 = vld [vmem:[%s1005_s1 + $0x30] sm:$0xff]   ;;  %v761_v9 = vld [vmem:[%s1005_s1 + $0x28] sm:$0xff]  }
   0x3   :  { %v754_v2 = vld [vmem:[%s1005_s1 + $0xf8] sm:$0xff]   ;;  %661 = vmatpush3.bf16.msra.mxu0 %v753_v1  ;;  %v758_v6 = vld [vmem:[%s1005_s1 + $0xf0] sm:$0xff]   ;;  %v762_v10 = vld [vmem:[%s1005_s1 + $0xe8] sm:$0xff]  }
   0x4   :  { %v755_v3 = vld [vmem:[%s1005_s1 + $0xb8] sm:$0xff]   ;;  %682 = vmatprep.subr.bf16.mxu1 %v754_v2  ;;  %662 = vmatprep.subr.bf16.mxu0 %v756_v4  ;;  %v759_v7 = vld [vmem:[%s1005_s1 + $0xb0] sm:$0xff]   ;;  %v763_v11 = vld [vmem:[%s1005_s1 + $0xa8] sm:$0xff]  }
   0x5   :  { %683 = vmatpush3.bf16.msra.mxu1 %v755_v3  ;;  %v764_v12 = vld [vmem:[%s1005_s1 + $0x60] sm:$0xff]   ;;  %v768_v16 = vld [vmem:[%s1005_s1 + $0x58] sm:$0xff]   ;;  %v772_v20 = vld [vmem:[%s1005_s1 + $0x50] sm:$0xff]  }
   0x6   :  { %684 = vmatprep.subr.bf16.mxu1 %v758_v6  ;;  %v765_v13 = vld [vmem:[%s1005_s1 + $0x20] sm:$0xff]   ;;  %v769_v17 = vld [vmem:[%s1005_s1 + $0x18] sm:$0xff]   ;;  %v773_v21 = vld [vmem:[%s1005_s1 + $0x10] sm:$0xff]  }
   0x7   :  { %663 = vmatpush3.bf16.msra.mxu0 %v757_v5  ;;  %v766_v14 = vld [vmem:[%s1005_s1 + $0xe0] sm:$0xff]   ;;  %v770_v18 = vld [vmem:[%s1005_s1 + $0xd8] sm:$0xff]   ;;  %v774_v22 = vld [vmem:[%s1005_s1 + $0xd0] sm:$0xff]  }
   0x8   :  { %664 = vmatprep.subr.bf16.mxu0 %v760_v8  ;;  %v767_v15 = vld [vmem:[%s1005_s1 + $0xa0] sm:$0xff]   ;;  %v771_v19 = vld [vmem:[%s1005_s1 + $0x98] sm:$0xff]   ;;  %v775_v23 = vld [vmem:[%s1005_s1 + $0x90] sm:$0xff]  }
   0x9   :  { %685 = vmatpush3.bf16.msra.mxu1 %v759_v7  ;;  %v776_v24 = vld [vmem:[%s1005_s1 + $0x48] sm:$0xff]   ;;  %v780_v28 = vld [vmem:[%s1005_s1 + $0x40] sm:$0xff]   ;;  %v790_v37 = vld [vmem:[%s1005_s1 + $0x118] sm:$0xff]  }
   0xa   :  { %686 = vmatprep.subr.bf16.mxu1 %v762_v10  ;;  %v777_v25 = vld [vmem:[%s1005_s1 + $0x8] sm:$0xff]   ;;  %v781_v29 = vld [vmem:[%s1005_s1] sm:$0xff]   ;;  %v791_v38 = vld [vmem:[%s1005_s1 + $0x110] sm:$0xff]  }
   0xb   :  { %665 = vmatpush3.bf16.msra.mxu0 %v761_v9  ;;  %v778_v26 = vld [vmem:[%s1005_s1 + $0xc8] sm:$0xff]   ;;  %v782_v30 = vld [vmem:[%s1005_s1 + $0xc0] sm:$0xff]   ;;  %v795_v40 = vld [vmem:[%s1007_s3 + $0x38] sm:$0xff]  }
   0xc   :  { %666 = vmatprep.subr.bf16.mxu0 %v764_v12  ;;  %v779_v27 = vld [vmem:[%s1005_s1 + $0x88] sm:$0xff]   ;;  %v783_v31 = vld [vmem:[%s1006_s0] ss:$20 sps:$4 sm:$0xff]   ;;  %v785_v32 = vld [vmem:[%s1006_s0 + $0x4] ss:$20 sps:$4 sm:$0xff]  }
   0xd   :  { %687 = vmatpush3.bf16.msra.mxu1 %v763_v11  ;;  %v786_v34 = vld [vmem:[%s1005_s1 + $0x80] sm:$0xff]   ;;  %385 = vmatprep.mubr.bf16.mxu0 %v785_v32  ;;  %v787_v35 = vld [vmem:[%s1006_s0 + $0x8] ss:$20 sps:$4 sm:$0xff]   ;;  %v796_v43 = vld [vmem:[%s1007_s3 + $0x30] sm:$0xff]  }
   0xe   :  { %688 = vmatprep.subr.bf16.mxu1 %v766_v14  ;;  %v789_v36 = vld [vmem:[%s1006_s0 + $0xc] ss:$20 sps:$4 sm:$0xff]   ;;  %v794_v42 = vld [vmem:[%s1006_s0 + $0x10] ss:$20 sps:$4 sm:$0xff]   ;;  %v799_v46 = vld [vmem:[%s1007_s3 + $0x18] sm:$0xff]  }
   0xf   :  { %667 = vmatpush3.bf16.msra.mxu0 %v765_v13  ;;  %426 = vmatprep.mubr.bf16.mxu1 %v789_v36  ;;  %v792_v39 = vld [vmem:[%s1005_s1 + $0x108] sm:$0xff]   ;;  %v793_v41 = vld [vmem:[%s1005_s1 + $0x100] sm:$0xff]   ;;  %v800_v47 = vld [vmem:[%s1007_s3 + $0x10] sm:$0xff]  }
  0x10   :  { %668 = vmatprep.subr.bf16.mxu0 %v768_v16  ;;  %v797_v44 = vld [vmem:[%s1007_s3 + $0x28] sm:$0xff]   ;;  %v798_v45 = vld [vmem:[%s1007_s3 + $0x20] sm:$0xff]  }
  0x11   :  { %689 = vmatpush3.bf16.msra.mxu1 %v767_v15  ;;  %v801_v48 = vld [vmem:[%s1007_s3 + $0x8] sm:$0xff]   ;;  %v802_v49 = vld [vmem:[%s1007_s3] sm:$0xff]  }
  0x12   :  { %690 = vmatprep.subr.bf16.mxu1 %v770_v18  ;;  %v608_v56 = vld [vmem:[%s1008_s2] ss:$0 sm:$0xff] }
  0x13   :  { %669 = vmatpush3.bf16.msra.mxu0 %v769_v17  ;;  %v651_v14 = vld [vmem:[%s1010_s4] ss:$0 sm:$0xff] }
  0x14   :  { %670 = vmatprep.subr.bf16.mxu0 %v772_v20 }
  0x15   :  { %691 = vmatpush3.bf16.msra.mxu1 %v771_v19 }
  0x16   :  { %692 = vmatprep.subr.bf16.mxu1 %v774_v22 }
  0x17   :  { %671 = vmatpush3.bf16.msra.mxu0 %v773_v21 }
  0x18   :  { %672 = vmatprep.subr.bf16.mxu0 %v776_v24 }
  0x19   :  { %693 = vmatpush3.bf16.msra.mxu1 %v775_v23 }
  0x1a   :  { %694 = vmatprep.subr.bf16.mxu1 %v778_v26 }
  0x1b   :  { %673 = vmatpush3.bf16.msra.mxu0 %v777_v25 }
  0x1c   :  { %674 = vmatprep.subr.bf16.mxu0 %v780_v28 }
  0x1d   :  { %695 = vmatpush3.bf16.msra.mxu1 %v779_v27 }
  0x1e   :  { %696 = vmatprep.subr.bf16.mxu1 %v782_v30 }
  0x1f   :  { %675 = vmatpush3.bf16.msra.mxu0 %v781_v29 }
  0x20   :  { %718 = vmatprep.subr.bf16.mxu0 %v803_v33 }
  0x21   :  { %697 = vmatpush3.bf16.msra.mxu1 %v786_v34 }
  0x22   :  { %386 = vmatmul.mubr.bf16.vlgmr.msra.gmra.mxu0 %v783_v31  ;;  %730 = vmatprep.subr.bf16.mxu1 %v803_v33 }
  0x23   :  { %726 = vmatprep.mubr.msk.bf16.mxu0 %vm804_vm0, %v803_v33  ;;  %719 = vmatpush3.bf16.msra.mxu0 %v790_v37 }
  0x24   :  { %427 = vmatmul.mubr.bf16.vlgmr.msra.gmra.mxu1 %v787_v35  ;;  %720 = vmatprep.subr.bf16.mxu0 %v803_v33 }
  0x25   :  { %746 = vmatprep.mubr.msk.bf16.mxu1 %vm804_vm0, %v803_v33  ;;  %731 = vmatpush3.bf16.msra.mxu1 %v795_v40 }
  0x26   :  { %732 = vmatprep.subr.bf16.mxu1 %v803_v33 }
  0x27   :  { %721 = vmatpush3.bf16.msra.mxu0 %v791_v38 }
  0x28   :  { %722 = vmatprep.subr.bf16.mxu0 %v803_v33 }
  0x29   :  { %733 = vmatpush3.bf16.msra.mxu1 %v796_v43 }
  0x2a   :  { %734 = vmatprep.subr.bf16.mxu1 %v803_v33 }
  0x2b   :  { %723 = vmatpush3.bf16.msra.mxu0 %v792_v39 }
  0x2c   :  { %724 = vmatprep.subr.bf16.mxu0 %v803_v33 }
  0x2d   :  { %735 = vmatpush3.bf16.msra.mxu1 %v797_v44 }
  0x2e   :  { %736 = vmatprep.subr.bf16.mxu1 %v803_v33 }
  0x2f   :  { %725 = vmatpush3.bf16.msra.mxu0 %v793_v41 }
  0x31   :  { %737 = vmatpush3.bf16.msra.mxu1 %v798_v45 }
  0x32   :  { %727 = vmatmul.mubr.msk.bf16.vlgmr.msra.gmra.mxu0 %vm349_vm1, %v794_v42  ;;  %738 = vmatprep.subr.bf16.mxu1 %v803_v33 }
  0x35   :  { %739 = vmatpush3.bf16.msra.mxu1 %v799_v46 }
  0x36   :  { %740 = vmatprep.subr.bf16.mxu1 %v803_v33 }
  0x39   :  { %741 = vmatpush3.bf16.msra.mxu1 %v800_v47 }
  0x3a   :  { %742 = vmatprep.subr.bf16.mxu1 %v803_v33 }
  0x3d   :  { %743 = vmatpush3.bf16.msra.mxu1 %v801_v48 }
  0x3e   :  { %744 = vmatprep.subr.bf16.mxu1 %v803_v33 }
  0x41   :  { %745 = vmatpush3.bf16.msra.mxu1 %v802_v49 }
  0xe2   :  { %v676_v50 = vpop.f32.mrf.mxu0 }
  0xe4   :  { %v677_v51 = vpop.f32.mrf.mxu0  ;;  %v698_v52 = vpop.f32.mrf.mxu1 }
  0xe5   :  { %v678_v55 = vadd.f32 %v677_v51, %v676_v50 }
  0xe6   :  { %v679_v53 = vpop.f32.mrf.mxu0  ;;  %v699_v54 = vpop.f32.mrf.mxu1 }
  0xe7   :  { %v388_v59 = vadd.f32 %v678_v55, %v608_v56  ;;  %v700_v60 = vadd.f32 %v699_v54, %v698_v52 }
  0xe8   :  { %v680_v57 = vpop.f32.mrf.mxu0  ;;  %v701_v58 = vpop.f32.mrf.mxu1 }
  0xe9   :  { %v681_v61 = vadd.f32 %v680_v57, %v679_v53  ;;  %v429_v1 = vadd.f32 %v700_v60, %v388_v59 }
  0xea   :  { %v702_v62 = vpop.f32.mrf.mxu1 }
  0xeb   :  { %v391_v63 = vadd.f32 %v681_v61, %v608_v56  ;;  %v703_v0 = vadd.f32 %v702_v62, %v701_v58 }
  0xed   :  { %v432_v6 = vadd.f32 %v703_v0, %v391_v63 }
  0xf2   :  { %v469_v2 = vpop.f32.mrf.mxu0 }
  0xf3   :  { %v470_v3 = vadd.f32 %v469_v2, %v429_v1 }
  0xf4   :  { %v728_v4 = vpop.f32.mrf.mxu0 }
  0xf5   :  { %vm476_vm2 = vcmp.gt.f32.partialorder %v470_v3, 0.0  ;;  %v478_v5 = vmul.f32 0.01, %v470_v3 }
  0xf6   :  { %v472_v7 = vpop.f32.mrf.mxu0 }
  0xf7   :  { %v480_v8 = vsel %vm476_vm2, %v470_v3, %v478_v5  ;;  %v473_v9 = vadd.f32 %v472_v7, %v432_v6 }
  0xf8   :  { %482 = vst [vmem:[%s1009_s5] sm:$0xff] %v480_v8  ;;  %v729_v10 = vpop.f32.mrf.mxu0 }
  0xf9   :  { %vm477_vm3 = vcmp.gt.f32.partialorder %v473_v9, 0.0  ;;  %v479_v11 = vmul.f32 0.01, %v473_v9 }
  0xfb   :  { %v481_v12 = vsel %vm477_vm3, %v473_v9, %v479_v11 }
  0xfc   :  { %483 = vst [vmem:[%s1009_s5 + $0x8] sm:$0xff] %v481_v12  ;;  %v484_v13 = vpack.c.bf16 %v481_v12, %v480_v8 }
  0xfe   :  { %747 = vmatmul.mubr.bf16.vlgmr.msra.gmra.mxu1 %v484_v13 }
 0x1be   :  { %v590_v15 = vpop.f32.mrf.mxu1 }
 0x1bf   :  { %v591_v16 = vadd.f32 %v651_v14, %v590_v15 }
 0x1c0   :  { %v748_v17 = vpop.f32.mrf.mxu1 }
 0x1c1   :  { %598 = vst.msk [vmem:[%s1011_s6] sm:$0xff] %vm597_vm4, %v591_v16 }
 0x1c2   :  { %v593_v18 = vpop.f32.mrf.mxu1 }
 0x1c3   :  { %v594_v19 = vadd.f32 %v651_v14, %v593_v18 }
 0x1c4   :  { %v749_v20 = vpop.f32.mrf.mxu1 }
 0x1c5   :  { %599 = vst.msk [vmem:[%s1011_s6 + $0x8] sm:$0xff] %vm597_vm4, %v594_v19 }

</bundles_post_ra>
